<compile_context>
chip_gen: v7x
topology: tpu7x:2x2x1
jax: 0.10.0
libtpu: 0.0.40
codegen_flags: <defaults>
</compile_context>

<pallas_src>
import functools

import jax
import jax.numpy as jnp
from jax.experimental import pallas as pl
from jax.experimental.pallas import tpu as pltpu


# ----------------------------------------------------------------------------
# Kernel A: fused conv3x3 + BN + ReLU + LSTM input projection.
# One grid step == one (t, b) pair.  All weights are VMEM-resident (constant
# index_map); only the small padded NHWC frame is streamed per step.
# ----------------------------------------------------------------------------
def _conv_proj_kernel(xp_ref, wtap_ref, scale_ref, bias_ref, wxr_ref,
                      blstm_ref, xg_ref, *, H, W, Cin, Cout):
    Hp, Wp = H + 2, W + 2
    P = 3 * H * W

    x = xp_ref[...].reshape(3, Hp, Wp, Cin)        # padded NHWC, 3 views (f32)

    # In-kernel im2col: 9 shifted reads + 9 accumulating dots (f32 acc).
    acc = jnp.zeros((P, Cout), jnp.float32)
    k = 0
    for dy in range(3):
        for dx in range(3):
            tap = x[:, dy:dy + H, dx:dx + W, :].reshape(P, Cin)
            acc = acc + jnp.dot(tap, wtap_ref[k],
                                preferred_element_type=jnp.float32)
            k += 1

    # Folded BN + ReLU epilogue (f32).
    feat = jnp.maximum(acc * scale_ref[...] + bias_ref[...], 0.0)   # (P, Cout)

    # LSTM input projection without flattening through HBM:
    #   xg[g] = sum_{p,c} feat[p,c] * Wx[(p,c), g]
    # as Cout accumulating (1,P)@(P,4H) bf16 dots against the channel-major
    # permuted weight wxr (Cout, P, 4H); feat is transposed once on the XLU.
    featT = feat.T                                                  # (Cout, P)
    xg = blstm_ref[...]                                             # (1, 4H)
    for c in range(Cout):
        lhs = featT[c:c + 1, :].astype(wxr_ref.dtype)               # (1, P)
        xg = xg + jnp.dot(lhs, wxr_ref[c],
                          preferred_element_type=jnp.float32)       # (1, 4H)
    xg_ref[...] = xg                                                # lane-dense


def conv_proj(xp4, wtaps, bn_scale, bn_bias, wx_r, b_lstm, *, H, W, Cin, Cout):
    TB = xp4.shape[0]
    G = wx_r.shape[-1]
    Hp, Wp = H + 2, W + 2
    P = 3 * H * W
    kernel = functools.partial(_conv_proj_kernel, H=H, W=W, Cin=Cin, Cout=Cout)
    xg3 = pl.pallas_call(
        kernel,
        out_shape=jax.ShapeDtypeStruct((TB, 1, G), jnp.float32),
        grid=(TB,),
        in_specs=[
            pl.BlockSpec((None, 3 * Hp, Wp, Cin), lambda i: (i, 0, 0, 0)),
            pl.BlockSpec((9, Cin, Cout), lambda i: (0, 0, 0)),
            pl.BlockSpec((1, Cout), lambda i: (0, 0)),
            pl.BlockSpec((1, Cout), lambda i: (0, 0)),
            pl.BlockSpec((Cout, P, G), lambda i: (0, 0, 0)),
            pl.BlockSpec((1, G), lambda i: (0, 0)),
        ],
        out_specs=pl.BlockSpec((None, 1, G), lambda i: (i, 0, 0)),
        compiler_params=pltpu.CompilerParams(
            dimension_semantics=("parallel",),          # v7x: 2 TCs share steps
            vmem_limit_bytes=32 * 1024 * 1024),
    )(xp4, wtaps, bn_scale, bn_bias, wx_r, b_lstm)
    return xg3[:, 0, :]                                  # (T*B, 4H)


# ----------------------------------------------------------------------------
# Kernel B: whole LSTM recurrence + final classifier in ONE launch.
# xg, Wh, fc weights fully VMEM-resident; h/c carried in VMEM scratch; single
# lane-dense store of the (padded) logits at the end.
# ----------------------------------------------------------------------------
def _lstm_fc_kernel(xg_ref, wh_ref, fcw_ref, fcb_ref, out_ref, h_scr, c_scr,
                    *, hidden, seq_len):
    h_scr[...] = jnp.zeros_like(h_scr)
    c_scr[...] = jnp.zeros_like(c_scr)

    def step(t, carry):
        # single bf16 cast of the h carry per step; gate math stays f32.
        gates = xg_ref[t] + jnp.dot(h_scr[...].astype(wh_ref.dtype),
                                    wh_ref[...],
                                    preferred_element_type=jnp.float32)
        i_g = jax.nn.sigmoid(gates[:, 0 * hidden:1 * hidden])
        f_g = jax.nn.sigmoid(gates[:, 1 * hidden:2 * hidden])
        g_g = jnp.tanh(gates[:, 2 * hidden:3 * hidden])
        o_g = jax.nn.sigmoid(gates[:, 3 * hidden:4 * hidden])
        c_new = f_g * c_scr[...] + i_g * g_g
        c_scr[...] = c_new
        h_scr[...] = o_g * jnp.tanh(c_new)
        return carry

    jax.lax.fori_loop(0, seq_len, step, 0, unroll=True)

    # Fused final classifier on the last hidden state (only store).
    out_ref[...] = (jnp.dot(h_scr[...].astype(fcw_ref.dtype), fcw_ref[...],
                            preferred_element_type=jnp.float32)
                    + fcb_ref[...])


def lstm_scan_fc(xg_p, wh, fcw_p, fcb_p):
    T, Bp, G = xg_p.shape
    H = wh.shape[0]
    Ncp = fcw_p.shape[1]
    kernel = functools.partial(_lstm_fc_kernel, hidden=H, seq_len=T)
    return pl.pallas_call(
        kernel,
        out_shape=jax.ShapeDtypeStruct((Bp, Ncp), jnp.float32),
        grid=(1,),
        in_specs=[
            pl.BlockSpec((T, Bp, G), lambda i: (0, 0, 0)),
            pl.BlockSpec((H, G), lambda i: (0, 0)),
            pl.BlockSpec((H, Ncp), lambda i: (0, 0)),
            pl.BlockSpec((1, Ncp), lambda i: (0, 0)),
        ],
        out_specs=pl.BlockSpec((Bp, Ncp), lambda i: (0, 0)),
        scratch_shapes=[pltpu.VMEM((Bp, H), jnp.float32),   # h carry
                        pltpu.VMEM((Bp, H), jnp.float32)],  # c carry
        compiler_params=pltpu.CompilerParams(
            dimension_semantics=("arbitrary",),
            vmem_limit_bytes=32 * 1024 * 1024),
    )(xg_p, wh, fcw_p, fcb_p)


# ----------------------------------------------------------------------------
# Full forward pass (jitted; all weight prep hoisted to trace time)
# ----------------------------------------------------------------------------
@jax.jit
def cnnlstm_forward(params, x_front, x_right, x_left):
    B, T, Cin, H, W = x_front.shape
    Cout = params["conv_w"].shape[0]
    hid = params["w_hh"].shape[1]
    num_classes = params["fc_w"].shape[0]
    G = 4 * hid
    eps = 1e-5
    assert hid % 128 == 0, "gate slicing assumes hidden is a multiple of 128"

    # ---- hoisted weight prep ----
    # conv weight per tap, (9, Cin, Cout), tap index k = dy*3 + dx
    wtaps = jnp.transpose(params["conv_w"], (2, 3, 1, 0)).reshape(9, Cin, Cout)
    bn_scale = (params["bn_gamma"]
                * jax.lax.rsqrt(params["bn_var"] + eps)).reshape(1, Cout)
    bn_bias = ((params["conv_b"] - params["bn_mean"]) * bn_scale[0]
               + params["bn_beta"]).reshape(1, Cout)

    # LSTM input weight, channel-major permuted so that
    #   wx_r[c, (v,h,w), g] == w_ih.T[(v,c,h,w), g]   (PyTorch NCHW flatten)
    wx_r = params["w_ih"].T.reshape(3, Cout, H, W, G)
    wx_r = jnp.transpose(wx_r, (1, 0, 2, 3, 4)).reshape(
        Cout, 3 * H * W, G).astype(jnp.bfloat16)
    b_lstm = (params["b_ih"] + params["b_hh"]).reshape(1, G).astype(jnp.float32)
    wh = params["w_hh"].T.astype(jnp.bfloat16)                 # (hid, 4*hid)

    # classifier, padded to 128 output lanes
    ncp = ((num_classes + 127) // 128) * 128
    fcw_p = jnp.pad(params["fc_w"].T,
                    ((0, 0), (0, ncp - num_classes))).astype(jnp.bfloat16)
    fcb_p = jnp.pad(params["fc_b"], (0, ncp - num_classes)).reshape(1, ncp)

    # ---- inputs: NHWC, views stacked, spatially padded ONCE (no 9x im2col) ----
    Hp, Wp = H + 2, W + 2
    x_all = jnp.stack([x_front, x_left, x_right], axis=2)      # (B,T,3,Cin,H,W)
    x_all = jnp.transpose(x_all, (1, 0, 2, 4, 5, 3))           # (T,B,3,H,W,Cin)
    x_all = x_all.reshape(T * B, 3, H, W, Cin)
    xp4 = jnp.pad(x_all, ((0, 0), (0, 0), (1, 1), (1, 1), (0, 0)))
    xp4 = xp4.reshape(T * B, 3 * Hp, Wp, Cin)                  # rows = (t, b)

    # ---- Kernel A: conv + bn + relu + input projection -> xg for all (t,b) ----
    xg = conv_proj(xp4, wtaps, bn_scale, bn_bias, wx_r, b_lstm,
                   H=H, W=W, Cin=Cin, Cout=Cout)               # (T*B, 4*hid)

    # ---- Kernel B: full recurrence + classifier in one launch ----
    Bp = max(8, ((B + 7) // 8) * 8)           # pad batch to full sublane tiles
    xg_p = jnp.pad(xg.reshape(T, B, G), ((0, 0), (0, Bp - B), (0, 0)))
    logits_p = lstm_scan_fc(xg_p, wh, fcw_p, fcb_p)            # (Bp, ncp)
    return logits_p[:B, :num_classes]


# ----------------------------------------------------------------------------
# Pure-JAX float32 reference (same interpreted semantics) for validation
# ----------------------------------------------------------------------------
def reference_forward(params, x_front, x_right, x_left):
    eps = 1e-5
    B, T = x_front.shape[:2]
    hid = params["w_hh"].shape[1]

    def conv_bn_relu(x):                                  # x: (B, Cin, H, W)
        y = jax.lax.conv_general_dilated(
            x, params["conv_w"], window_strides=(1, 1), padding="SAME",
            dimension_numbers=("NCHW", "OIHW", "NCHW"))
        y = y + params["conv_b"][None, :, None, None]
        scale = params["bn_gamma"] / jnp.sqrt(params["bn_var"] + eps)
        y = ((y - params["bn_mean"][None, :, None, None])
             * scale[None, :, None, None]
             + params["bn_beta"][None, :, None, None])
        return jnp.maximum(y, 0.0)

    h = jnp.zeros((B, hid), jnp.float32)
    c = jnp.zeros((B, hid), jnp.float32)
    for t in range(T):
        feats = [conv_bn_relu(v[:, t]) for v in (x_front, x_left, x_right)]
        f = jnp.concatenate(feats, axis=1).reshape(B, -1)
        gates = (f @ params["w_ih"].T + params["b_ih"]
                 + h @ params["w_hh"].T + params["b_hh"])
        i_g, f_g, g_g, o_g = jnp.split(gates, 4, axis=1)
        c = jax.nn.sigmoid(f_g) * c + jax.nn.sigmoid(i_g) * jnp.tanh(g_g)
        h = jax.nn.sigmoid(o_g) * jnp.tanh(c)
    return h @ params["fc_w"].T + params["fc_b"]


# ----------------------------------------------------------------------------
# Deterministic parameter construction + run
# ----------------------------------------------------------------------------
def make_params(key, cin, cout, feat, hidden, num_classes):
    ks = jax.random.split(key, 8)
    return {
        "conv_w": 0.1 * jax.random.normal(ks[0], (cout, cin, 3, 3), jnp.float32),
        "conv_b": 0.1 * jax.random.normal(ks[1], (cout,), jnp.float32),
        "bn_gamma": 1.0 + 0.05 * jax.random.normal(ks[2], (cout,), jnp.float32),
        "bn_beta": 0.05 * jax.random.normal(ks[3], (cout,), jnp.float32),
        "bn_mean": jnp.zeros((cout,), jnp.float32),
        "bn_var": jnp.ones((cout,), jnp.float32),
        "w_ih": 0.05 * jax.random.normal(ks[4], (4 * hidden, feat), jnp.float32),
        "w_hh": 0.05 * jax.random.normal(ks[5], (4 * hidden, hidden), jnp.float32),
        "b_ih": jnp.zeros((4 * hidden,), jnp.float32),
        "b_hh": jnp.zeros((4 * hidden,), jnp.float32),
        "fc_w": 0.05 * jax.random.normal(ks[6], (num_classes, hidden), jnp.float32),
        "fc_b": 0.05 * jax.random.normal(ks[7], (num_classes,), jnp.float32),
    }


if __name__ == "__main__":
    # small shapes consistent with the module structure
    B, T, Cin, H, W = 2, 4, 8, 8, 8
    Cout = 8
    hidden = 128                       # multiple of 128 -> lane-aligned gates
    num_classes = 38                   # module hard-codes self.num_classes = 38
    feat = 3 * Cout * H * W            # concatenated & flattened conv features

    key = jax.random.PRNGKey(0)
    k_in, k_p = jax.random.split(key)
    ki = jax.random.split(k_in, 3)
    x_front = jax.random.normal(ki[0], (B, T, Cin, H, W), jnp.float32)
    x_right = jax.random.normal(ki[1], (B, T, Cin, H, W), jnp.float32)
    x_left = jax.random.normal(ki[2], (B, T, Cin, H, W), jnp.float32)

    params = make_params(k_p, Cin, Cout, feat, hidden, num_classes)

    out = jax.block_until_ready(cnnlstm_forward(params, x_front, x_right, x_left))
    assert out.shape == (B, num_classes), out.shape
    assert bool(jnp.all(jnp.isfinite(out)))

    ref = reference_forward(params, x_front, x_right, x_left)
    err = float(jnp.max(jnp.abs(out - ref)))
    assert err < 5e-2, f"max |out - ref| = {err}"    # bf16 matmul tolerance
    print("KERNEL_OK")
</pallas_src>

<mosaic_0001>
module attributes {stable_mosaic.version = 11 : i64} {
  func.func @_conv_proj_kernel(%arg0: i32, %arg1: memref<1x30x10x8xf32, #tpu.memory_space<vmem>>, %arg2: memref<9x8x8xf32, #tpu.memory_space<vmem>>, %arg3: memref<1x8xf32, #tpu.memory_space<vmem>>, %arg4: memref<1x8xf32, #tpu.memory_space<vmem>>, %arg5: memref<8x192x512xbf16, #tpu.memory_space<vmem>>, %arg6: memref<1x512xf32, #tpu.memory_space<vmem>>, %arg7: memref<1x1x512xf32, #tpu.memory_space<vmem>>) attributes {dimension_semantics = [#tpu.dimension_semantics<parallel>], iteration_bounds = array<i64: 8>, scalar_prefetch = 0 : i64, scratch_operands = 0 : i64, tpu.core_type = #tpu.core_type<tc>, window_params = [{transform_indices = @transform_0, window_bounds = array<i64: 1, 30, 10, 8>}, {pipeline_mode = #tpu.pipeline_mode<synchronous>, transform_indices = @transform_1, window_bounds = array<i64: 9, 8, 8>}, {pipeline_mode = #tpu.pipeline_mode<synchronous>, transform_indices = @transform_2, window_bounds = array<i64: 1, 8>}, {pipeline_mode = #tpu.pipeline_mode<synchronous>, transform_indices = @transform_3, window_bounds = array<i64: 1, 8>}, {pipeline_mode = #tpu.pipeline_mode<synchronous>, transform_indices = @transform_4, window_bounds = array<i64: 8, 192, 512>}, {pipeline_mode = #tpu.pipeline_mode<synchronous>, transform_indices = @transform_5, window_bounds = array<i64: 1, 512>}, {transform_indices = @transform_6, window_bounds = array<i64: 1, 1, 512>}]} {
    %c0 = arith.constant 0 : index
    %c0_0 = arith.constant 0 : index
    %c0_1 = arith.constant 0 : index
    %c0_2 = arith.constant 0 : index
    %0 = vector.load %arg1[%c0, %c0_0, %c0_1, %c0_2] : memref<1x30x10x8xf32, #tpu.memory_space<vmem>>, vector<1x30x10x8xf32>
    %1 = vector.shape_cast %0 : vector<1x30x10x8xf32> to vector<30x10x8xf32>
    %2 = vector.shape_cast %1 : vector<30x10x8xf32> to vector<3x10x10x8xf32>
    %cst = arith.constant 0.000000e+00 : f32
    %3 = vector.broadcast %cst : f32 to vector<192x8xf32>
    %4 = vector.extract_strided_slice %2 {offsets = [0, 0, 0, 0], sizes = [3, 8, 8, 8], strides = [1, 1, 1, 1]} : vector<3x10x10x8xf32> to vector<3x8x8x8xf32>
    %5 = vector.shape_cast %4 : vector<3x8x8x8xf32> to vector<192x8xf32>
    %c0_3 = arith.constant 0 : index
    %c0_4 = arith.constant 0 : index
    %c0_5 = arith.constant 0 : index
    %6 = vector.load %arg2[%c0_3, %c0_4, %c0_5] : memref<9x8x8xf32, #tpu.memory_space<vmem>>, vector<1x8x8xf32>
    %7 = vector.shape_cast %6 : vector<1x8x8xf32> to vector<8x8xf32>
    %cst_6 = arith.constant dense<0.000000e+00> : vector<192x8xf32>
    %8 = tpu.matmul %5, %7, %cst_6 {dimension_numbers = #tpu.dot_dimension_numbers<[1], [0], [0], [1], [0, 0, 1, 1], [], []>} : vector<192x8xf32>, vector<8x8xf32>, vector<192x8xf32> -> vector<192x8xf32>
    %9 = arith.addf %3, %8 : vector<192x8xf32>
    %10 = vector.extract_strided_slice %2 {offsets = [0, 0, 1, 0], sizes = [3, 8, 8, 8], strides = [1, 1, 1, 1]} : vector<3x10x10x8xf32> to vector<3x8x8x8xf32>
    %11 = vector.shape_cast %10 : vector<3x8x8x8xf32> to vector<192x8xf32>
    %c1 = arith.constant 1 : index
    %c0_7 = arith.constant 0 : index
    %c0_8 = arith.constant 0 : index
    %12 = vector.load %arg2[%c1, %c0_7, %c0_8] : memref<9x8x8xf32, #tpu.memory_space<vmem>>, vector<1x8x8xf32>
    %13 = vector.shape_cast %12 : vector<1x8x8xf32> to vector<8x8xf32>
    %cst_9 = arith.constant dense<0.000000e+00> : vector<192x8xf32>
    %14 = tpu.matmul %11, %13, %cst_9 {dimension_numbers = #tpu.dot_dimension_numbers<[1], [0], [0], [1], [0, 0, 1, 1], [], []>} : vector<192x8xf32>, vector<8x8xf32>, vector<192x8xf32> -> vector<192x8xf32>
    %15 = arith.addf %9, %14 : vector<192x8xf32>
    %16 = vector.extract_strided_slice %2 {offsets = [0, 0, 2, 0], sizes = [3, 8, 8, 8], strides = [1, 1, 1, 1]} : vector<3x10x10x8xf32> to vector<3x8x8x8xf32>
    %17 = vector.shape_cast %16 : vector<3x8x8x8xf32> to vector<192x8xf32>
    %c2 = arith.constant 2 : index
    %c0_10 = arith.constant 0 : index
    %c0_11 = arith.constant 0 : index
    %18 = vector.load %arg2[%c2, %c0_10, %c0_11] : memref<9x8x8xf32, #tpu.memory_space<vmem>>, vector<1x8x8xf32>
    %19 = vector.shape_cast %18 : vector<1x8x8xf32> to vector<8x8xf32>
    %cst_12 = arith.constant dense<0.000000e+00> : vector<192x8xf32>
    %20 = tpu.matmul %17, %19, %cst_12 {dimension_numbers = #tpu.dot_dimension_numbers<[1], [0], [0], [1], [0, 0, 1, 1], [], []>} : vector<192x8xf32>, vector<8x8xf32>, vector<192x8xf32> -> vector<192x8xf32>
    %21 = arith.addf %15, %20 : vector<192x8xf32>
    %22 = vector.extract_strided_slice %2 {offsets = [0, 1, 0, 0], sizes = [3, 8, 8, 8], strides = [1, 1, 1, 1]} : vector<3x10x10x8xf32> to vector<3x8x8x8xf32>
    %23 = vector.shape_cast %22 : vector<3x8x8x8xf32> to vector<192x8xf32>
    %c3 = arith.constant 3 : index
    %c0_13 = arith.constant 0 : index
    %c0_14 = arith.constant 0 : index
    %24 = vector.load %arg2[%c3, %c0_13, %c0_14] : memref<9x8x8xf32, #tpu.memory_space<vmem>>, vector<1x8x8xf32>
    %25 = vector.shape_cast %24 : vector<1x8x8xf32> to vector<8x8xf32>
    %cst_15 = arith.constant dense<0.000000e+00> : vector<192x8xf32>
    %26 = tpu.matmul %23, %25, %cst_15 {dimension_numbers = #tpu.dot_dimension_numbers<[1], [0], [0], [1], [0, 0, 1, 1], [], []>} : vector<192x8xf32>, vector<8x8xf32>, vector<192x8xf32> -> vector<192x8xf32>
    %27 = arith.addf %21, %26 : vector<192x8xf32>
    %28 = vector.extract_strided_slice %2 {offsets = [0, 1, 1, 0], sizes = [3, 8, 8, 8], strides = [1, 1, 1, 1]} : vector<3x10x10x8xf32> to vector<3x8x8x8xf32>
    %29 = vector.shape_cast %28 : vector<3x8x8x8xf32> to vector<192x8xf32>
    %c4 = arith.constant 4 : index
    %c0_16 = arith.constant 0 : index
    %c0_17 = arith.constant 0 : index
    %30 = vector.load %arg2[%c4, %c0_16, %c0_17] : memref<9x8x8xf32, #tpu.memory_space<vmem>>, vector<1x8x8xf32>
    %31 = vector.shape_cast %30 : vector<1x8x8xf32> to vector<8x8xf32>
    %cst_18 = arith.constant dense<0.000000e+00> : vector<192x8xf32>
    %32 = tpu.matmul %29, %31, %cst_18 {dimension_numbers = #tpu.dot_dimension_numbers<[1], [0], [0], [1], [0, 0, 1, 1], [], []>} : vector<192x8xf32>, vector<8x8xf32>, vector<192x8xf32> -> vector<192x8xf32>
    %33 = arith.addf %27, %32 : vector<192x8xf32>
    %34 = vector.extract_strided_slice %2 {offsets = [0, 1, 2, 0], sizes = [3, 8, 8, 8], strides = [1, 1, 1, 1]} : vector<3x10x10x8xf32> to vector<3x8x8x8xf32>
    %35 = vector.shape_cast %34 : vector<3x8x8x8xf32> to vector<192x8xf32>
    %c5 = arith.constant 5 : index
    %c0_19 = arith.constant 0 : index
    %c0_20 = arith.constant 0 : index
    %36 = vector.load %arg2[%c5, %c0_19, %c0_20] : memref<9x8x8xf32, #tpu.memory_space<vmem>>, vector<1x8x8xf32>
    %37 = vector.shape_cast %36 : vector<1x8x8xf32> to vector<8x8xf32>
    %cst_21 = arith.constant dense<0.000000e+00> : vector<192x8xf32>
    %38 = tpu.matmul %35, %37, %cst_21 {dimension_numbers = #tpu.dot_dimension_numbers<[1], [0], [0], [1], [0, 0, 1, 1], [], []>} : vector<192x8xf32>, vector<8x8xf32>, vector<192x8xf32> -> vector<192x8xf32>
    %39 = arith.addf %33, %38 : vector<192x8xf32>
    %40 = vector.extract_strided_slice %2 {offsets = [0, 2, 0, 0], sizes = [3, 8, 8, 8], strides = [1, 1, 1, 1]} : vector<3x10x10x8xf32> to vector<3x8x8x8xf32>
    %41 = vector.shape_cast %40 : vector<3x8x8x8xf32> to vector<192x8xf32>
    %c6 = arith.constant 6 : index
    %c0_22 = arith.constant 0 : index
    %c0_23 = arith.constant 0 : index
    %42 = vector.load %arg2[%c6, %c0_22, %c0_23] : memref<9x8x8xf32, #tpu.memory_space<vmem>>, vector<1x8x8xf32>
    %43 = vector.shape_cast %42 : vector<1x8x8xf32> to vector<8x8xf32>
    %cst_24 = arith.constant dense<0.000000e+00> : vector<192x8xf32>
    %44 = tpu.matmul %41, %43, %cst_24 {dimension_numbers = #tpu.dot_dimension_numbers<[1], [0], [0], [1], [0, 0, 1, 1], [], []>} : vector<192x8xf32>, vector<8x8xf32>, vector<192x8xf32> -> vector<192x8xf32>
    %45 = arith.addf %39, %44 : vector<192x8xf32>
    %46 = vector.extract_strided_slice %2 {offsets = [0, 2, 1, 0], sizes = [3, 8, 8, 8], strides = [1, 1, 1, 1]} : vector<3x10x10x8xf32> to vector<3x8x8x8xf32>
    %47 = vector.shape_cast %46 : vector<3x8x8x8xf32> to vector<192x8xf32>
    %c7 = arith.constant 7 : index
    %c0_25 = arith.constant 0 : index
    %c0_26 = arith.constant 0 : index
    %48 = vector.load %arg2[%c7, %c0_25, %c0_26] : memref<9x8x8xf32, #tpu.memory_space<vmem>>, vector<1x8x8xf32>
    %49 = vector.shape_cast %48 : vector<1x8x8xf32> to vector<8x8xf32>
    %cst_27 = arith.constant dense<0.000000e+00> : vector<192x8xf32>
    %50 = tpu.matmul %47, %49, %cst_27 {dimension_numbers = #tpu.dot_dimension_numbers<[1], [0], [0], [1], [0, 0, 1, 1], [], []>} : vector<192x8xf32>, vector<8x8xf32>, vector<192x8xf32> -> vector<192x8xf32>
    %51 = arith.addf %45, %50 : vector<192x8xf32>
    %52 = vector.extract_strided_slice %2 {offsets = [0, 2, 2, 0], sizes = [3, 8, 8, 8], strides = [1, 1, 1, 1]} : vector<3x10x10x8xf32> to vector<3x8x8x8xf32>
    %53 = vector.shape_cast %52 : vector<3x8x8x8xf32> to vector<192x8xf32>
    %c8 = arith.constant 8 : index
    %c0_28 = arith.constant 0 : index
    %c0_29 = arith.constant 0 : index
    %54 = vector.load %arg2[%c8, %c0_28, %c0_29] : memref<9x8x8xf32, #tpu.memory_space<vmem>>, vector<1x8x8xf32>
    %55 = vector.shape_cast %54 : vector<1x8x8xf32> to vector<8x8xf32>
    %cst_30 = arith.constant dense<0.000000e+00> : vector<192x8xf32>
    %56 = tpu.matmul %53, %55, %cst_30 {dimension_numbers = #tpu.dot_dimension_numbers<[1], [0], [0], [1], [0, 0, 1, 1], [], []>} : vector<192x8xf32>, vector<8x8xf32>, vector<192x8xf32> -> vector<192x8xf32>
    %57 = arith.addf %51, %56 : vector<192x8xf32>
    %c0_31 = arith.constant 0 : index
    %c0_32 = arith.constant 0 : index
    %58 = vector.load %arg3[%c0_31, %c0_32] : memref<1x8xf32, #tpu.memory_space<vmem>>, vector<1x8xf32>
    %59 = vector.broadcast %58 : vector<1x8xf32> to vector<192x8xf32>
    %60 = arith.mulf %57, %59 : vector<192x8xf32>
    %c0_33 = arith.constant 0 : index
    %c0_34 = arith.constant 0 : index
    %61 = vector.load %arg4[%c0_33, %c0_34] : memref<1x8xf32, #tpu.memory_space<vmem>>, vector<1x8xf32>
    %62 = vector.broadcast %61 : vector<1x8xf32> to vector<192x8xf32>
    %63 = arith.addf %60, %62 : vector<192x8xf32>
    %cst_35 = arith.constant 0.000000e+00 : f32
    %64 = vector.broadcast %cst_35 : f32 to vector<192x8xf32>
    %65 = arith.maximumf %63, %64 : vector<192x8xf32>
    %66 = tpu.transpose %65, [1, 0] : vector<192x8xf32> -> vector<8x192xf32>
    %c0_36 = arith.constant 0 : index
    %c0_37 = arith.constant 0 : index
    %67 = vector.load %arg6[%c0_36, %c0_37] : memref<1x512xf32, #tpu.memory_space<vmem>>, vector<1x512xf32>
    %68 = vector.extract_strided_slice %66 {offsets = [0, 0], sizes = [1, 192], strides = [1, 1]} : vector<8x192xf32> to vector<1x192xf32>
    %69 = arith.truncf %68 : vector<1x192xf32> to vector<1x192xbf16>
    %c0_38 = arith.constant 0 : index
    %c0_39 = arith.constant 0 : index
    %c0_40 = arith.constant 0 : index
    %70 = vector.load %arg5[%c0_38, %c0_39, %c0_40] : memref<8x192x512xbf16, #tpu.memory_space<vmem>>, vector<1x192x512xbf16>
    %71 = vector.shape_cast %70 : vector<1x192x512xbf16> to vector<192x512xbf16>
    %cst_41 = arith.constant dense<0.000000e+00> : vector<1x512xf32>
    %72 = tpu.matmul %69, %71, %cst_41 {dimension_numbers = #tpu.dot_dimension_numbers<[1], [0], [0], [1], [0, 0, 1, 1], [], []>} : vector<1x192xbf16>, vector<192x512xbf16>, vector<1x512xf32> -> vector<1x512xf32>
    %73 = arith.addf %67, %72 : vector<1x512xf32>
    %74 = vector.extract_strided_slice %66 {offsets = [1, 0], sizes = [1, 192], strides = [1, 1]} : vector<8x192xf32> to vector<1x192xf32>
    %75 = arith.truncf %74 : vector<1x192xf32> to vector<1x192xbf16>
    %c1_42 = arith.constant 1 : index
    %c0_43 = arith.constant 0 : index
    %c0_44 = arith.constant 0 : index
    %76 = vector.load %arg5[%c1_42, %c0_43, %c0_44] : memref<8x192x512xbf16, #tpu.memory_space<vmem>>, vector<1x192x512xbf16>
    %77 = vector.shape_cast %76 : vector<1x192x512xbf16> to vector<192x512xbf16>
    %cst_45 = arith.constant dense<0.000000e+00> : vector<1x512xf32>
    %78 = tpu.matmul %75, %77, %cst_45 {dimension_numbers = #tpu.dot_dimension_numbers<[1], [0], [0], [1], [0, 0, 1, 1], [], []>} : vector<1x192xbf16>, vector<192x512xbf16>, vector<1x512xf32> -> vector<1x512xf32>
    %79 = arith.addf %73, %78 : vector<1x512xf32>
    %80 = vector.extract_strided_slice %66 {offsets = [2, 0], sizes = [1, 192], strides = [1, 1]} : vector<8x192xf32> to vector<1x192xf32>
    %81 = arith.truncf %80 : vector<1x192xf32> to vector<1x192xbf16>
    %c2_46 = arith.constant 2 : index
    %c0_47 = arith.constant 0 : index
    %c0_48 = arith.constant 0 : index
    %82 = vector.load %arg5[%c2_46, %c0_47, %c0_48] : memref<8x192x512xbf16, #tpu.memory_space<vmem>>, vector<1x192x512xbf16>
    %83 = vector.shape_cast %82 : vector<1x192x512xbf16> to vector<192x512xbf16>
    %cst_49 = arith.constant dense<0.000000e+00> : vector<1x512xf32>
    %84 = tpu.matmul %81, %83, %cst_49 {dimension_numbers = #tpu.dot_dimension_numbers<[1], [0], [0], [1], [0, 0, 1, 1], [], []>} : vector<1x192xbf16>, vector<192x512xbf16>, vector<1x512xf32> -> vector<1x512xf32>
    %85 = arith.addf %79, %84 : vector<1x512xf32>
    %86 = vector.extract_strided_slice %66 {offsets = [3, 0], sizes = [1, 192], strides = [1, 1]} : vector<8x192xf32> to vector<1x192xf32>
    %87 = arith.truncf %86 : vector<1x192xf32> to vector<1x192xbf16>
    %c3_50 = arith.constant 3 : index
    %c0_51 = arith.constant 0 : index
    %c0_52 = arith.constant 0 : index
    %88 = vector.load %arg5[%c3_50, %c0_51, %c0_52] : memref<8x192x512xbf16, #tpu.memory_space<vmem>>, vector<1x192x512xbf16>
    %89 = vector.shape_cast %88 : vector<1x192x512xbf16> to vector<192x512xbf16>
    %cst_53 = arith.constant dense<0.000000e+00> : vector<1x512xf32>
    %90 = tpu.matmul %87, %89, %cst_53 {dimension_numbers = #tpu.dot_dimension_numbers<[1], [0], [0], [1], [0, 0, 1, 1], [], []>} : vector<1x192xbf16>, vector<192x512xbf16>, vector<1x512xf32> -> vector<1x512xf32>
    %91 = arith.addf %85, %90 : vector<1x512xf32>
    %92 = vector.extract_strided_slice %66 {offsets = [4, 0], sizes = [1, 192], strides = [1, 1]} : vector<8x192xf32> to vector<1x192xf32>
    %93 = arith.truncf %92 : vector<1x192xf32> to vector<1x192xbf16>
    %c4_54 = arith.constant 4 : index
    %c0_55 = arith.constant 0 : index
    %c0_56 = arith.constant 0 : index
    %94 = vector.load %arg5[%c4_54, %c0_55, %c0_56] : memref<8x192x512xbf16, #tpu.memory_space<vmem>>, vector<1x192x512xbf16>
    %95 = vector.shape_cast %94 : vector<1x192x512xbf16> to vector<192x512xbf16>
    %cst_57 = arith.constant dense<0.000000e+00> : vector<1x512xf32>
    %96 = tpu.matmul %93, %95, %cst_57 {dimension_numbers = #tpu.dot_dimension_numbers<[1], [0], [0], [1], [0, 0, 1, 1], [], []>} : vector<1x192xbf16>, vector<192x512xbf16>, vector<1x512xf32> -> vector<1x512xf32>
    %97 = arith.addf %91, %96 : vector<1x512xf32>
    %98 = vector.extract_strided_slice %66 {offsets = [5, 0], sizes = [1, 192], strides = [1, 1]} : vector<8x192xf32> to vector<1x192xf32>
    %99 = arith.truncf %98 : vector<1x192xf32> to vector<1x192xbf16>
    %c5_58 = arith.constant 5 : index
    %c0_59 = arith.constant 0 : index
    %c0_60 = arith.constant 0 : index
    %100 = vector.load %arg5[%c5_58, %c0_59, %c0_60] : memref<8x192x512xbf16, #tpu.memory_space<vmem>>, vector<1x192x512xbf16>
    %101 = vector.shape_cast %100 : vector<1x192x512xbf16> to vector<192x512xbf16>
    %cst_61 = arith.constant dense<0.000000e+00> : vector<1x512xf32>
    %102 = tpu.matmul %99, %101, %cst_61 {dimension_numbers = #tpu.dot_dimension_numbers<[1], [0], [0], [1], [0, 0, 1, 1], [], []>} : vector<1x192xbf16>, vector<192x512xbf16>, vector<1x512xf32> -> vector<1x512xf32>
    %103 = arith.addf %97, %102 : vector<1x512xf32>
    %104 = vector.extract_strided_slice %66 {offsets = [6, 0], sizes = [1, 192], strides = [1, 1]} : vector<8x192xf32> to vector<1x192xf32>
    %105 = arith.truncf %104 : vector<1x192xf32> to vector<1x192xbf16>
    %c6_62 = arith.constant 6 : index
    %c0_63 = arith.constant 0 : index
    %c0_64 = arith.constant 0 : index
    %106 = vector.load %arg5[%c6_62, %c0_63, %c0_64] : memref<8x192x512xbf16, #tpu.memory_space<vmem>>, vector<1x192x512xbf16>
    %107 = vector.shape_cast %106 : vector<1x192x512xbf16> to vector<192x512xbf16>
    %cst_65 = arith.constant dense<0.000000e+00> : vector<1x512xf32>
    %108 = tpu.matmul %105, %107, %cst_65 {dimension_numbers = #tpu.dot_dimension_numbers<[1], [0], [0], [1], [0, 0, 1, 1], [], []>} : vector<1x192xbf16>, vector<192x512xbf16>, vector<1x512xf32> -> vector<1x512xf32>
    %109 = arith.addf %103, %108 : vector<1x512xf32>
    %110 = vector.extract_strided_slice %66 {offsets = [7, 0], sizes = [1, 192], strides = [1, 1]} : vector<8x192xf32> to vector<1x192xf32>
    %111 = arith.truncf %110 : vector<1x192xf32> to vector<1x192xbf16>
    %c7_66 = arith.constant 7 : index
    %c0_67 = arith.constant 0 : index
    %c0_68 = arith.constant 0 : index
    %112 = vector.load %arg5[%c7_66, %c0_67, %c0_68] : memref<8x192x512xbf16, #tpu.memory_space<vmem>>, vector<1x192x512xbf16>
    %113 = vector.shape_cast %112 : vector<1x192x512xbf16> to vector<192x512xbf16>
    %cst_69 = arith.constant dense<0.000000e+00> : vector<1x512xf32>
    %114 = tpu.matmul %111, %113, %cst_69 {dimension_numbers = #tpu.dot_dimension_numbers<[1], [0], [0], [1], [0, 0, 1, 1], [], []>} : vector<1x192xbf16>, vector<192x512xbf16>, vector<1x512xf32> -> vector<1x512xf32>
    %115 = arith.addf %109, %114 : vector<1x512xf32>
    %c0_70 = arith.constant 0 : index
    %c0_71 = arith.constant 0 : index
    %c0_72 = arith.constant 0 : index
    %116 = vector.load %arg7[%c0_70, %c0_71, %c0_72] : memref<1x1x512xf32, #tpu.memory_space<vmem>>, vector<1x1x512xf32>
    %117 = vector.shape_cast %116 : vector<1x1x512xf32> to vector<1x512xf32>
    %118 = vector.shape_cast %115 : vector<1x512xf32> to vector<1x1x512xf32>
    tpu.vector_store %arg7[%c0_70, %c0_71, %c0_72], %118 {strides = array<i32>} : memref<1x1x512xf32, #tpu.memory_space<vmem>>, vector<1x1x512xf32>,
    return
  }
  func.func @transform_0(%arg0: i32) -> (i32, i32, i32, i32) {
    %c0_i32 = arith.constant 0 : i32
    %c0_i32_0 = arith.constant 0 : i32
    %c0_i32_1 = arith.constant 0 : i32
    %c0_i32_2 = arith.constant 0 : i32
    return %arg0, %c0_i32, %c0_i32_0, %c0_i32_1 : i32, i32, i32, i32
  }
  func.func @transform_1(%arg0: i32) -> (i32, i32, i32) {
    %c0_i32 = arith.constant 0 : i32
    %c0_i32_0 = arith.constant 0 : i32
    %c0_i32_1 = arith.constant 0 : i32
    %c0_i32_2 = arith.constant 0 : i32
    return %c0_i32, %c0_i32_0, %c0_i32_1 : i32, i32, i32
  }
  func.func @transform_2(%arg0: i32) -> (i32, i32) {
    %c0_i32 = arith.constant 0 : i32
    %c0_i32_0 = arith.constant 0 : i32
    %c0_i32_1 = arith.constant 0 : i32
    return %c0_i32, %c0_i32_0 : i32, i32
  }
  func.func @transform_3(%arg0: i32) -> (i32, i32) {
    %c0_i32 = arith.constant 0 : i32
    %c0_i32_0 = arith.constant 0 : i32
    %c0_i32_1 = arith.constant 0 : i32
    return %c0_i32, %c0_i32_0 : i32, i32
  }
  func.func @transform_4(%arg0: i32) -> (i32, i32, i32) {
    %c0_i32 = arith.constant 0 : i32
    %c0_i32_0 = arith.constant 0 : i32
    %c0_i32_1 = arith.constant 0 : i32
    %c0_i32_2 = arith.constant 0 : i32
    return %c0_i32, %c0_i32_0, %c0_i32_1 : i32, i32, i32
  }
  func.func @transform_5(%arg0: i32) -> (i32, i32) {
    %c0_i32 = arith.constant 0 : i32
    %c0_i32_0 = arith.constant 0 : i32
    %c0_i32_1 = arith.constant 0 : i32
    return %c0_i32, %c0_i32_0 : i32, i32
  }
  func.func @transform_6(%arg0: i32) -> (i32, i32, i32) {
    %c0_i32 = arith.constant 0 : i32
    %c0_i32_0 = arith.constant 0 : i32
    %c0_i32_1 = arith.constant 0 : i32
    return %arg0, %c0_i32, %c0_i32_0 : i32, i32, i32
  }
}

module attributes {stable_mosaic.version = 11 : i64} {
  func.func @_lstm_fc_kernel(%arg0: i32, %arg1: memref<4x8x512xf32, #tpu.memory_space<vmem>>, %arg2: memref<128x512xbf16, #tpu.memory_space<vmem>>, %arg3: memref<128x128xbf16, #tpu.memory_space<vmem>>, %arg4: memref<1x128xf32, #tpu.memory_space<vmem>>, %arg5: memref<8x128xf32, #tpu.memory_space<vmem>>, %arg6: memref<8x128xf32, #tpu.memory_space<vmem>>, %arg7: memref<8x128xf32, #tpu.memory_space<vmem>>) attributes {dimension_semantics = [#tpu.dimension_semantics<arbitrary>], iteration_bounds = array<i64: 1>, scalar_prefetch = 0 : i64, scratch_operands = 2 : i64, tpu.core_type = #tpu.core_type<tc>, window_params = [{pipeline_mode = #tpu.pipeline_mode<synchronous>, transform_indices = @transform_0, window_bounds = array<i64: 4, 8, 512>}, {pipeline_mode = #tpu.pipeline_mode<synchronous>, transform_indices = @transform_1, window_bounds = array<i64: 128, 512>}, {pipeline_mode = #tpu.pipeline_mode<synchronous>, transform_indices = @transform_2, window_bounds = array<i64: 128, 128>}, {pipeline_mode = #tpu.pipeline_mode<synchronous>, transform_indices = @transform_3, window_bounds = array<i64: 1, 128>}, {pipeline_mode = #tpu.pipeline_mode<synchronous>, transform_indices = @transform_4, window_bounds = array<i64: 8, 128>}]} {
    %cst = arith.constant 0.000000e+00 : f32
    %0 = vector.broadcast %cst : f32 to vector<8x128xf32>
    %c0 = arith.constant 0 : index
    %c0_0 = arith.constant 0 : index
    %1 = vector.load %arg6[%c0, %c0_0] : memref<8x128xf32, #tpu.memory_space<vmem>>, vector<8x128xf32>
    tpu.vector_store %arg6[%c0, %c0_0], %0 {strides = array<i32>} : memref<8x128xf32, #tpu.memory_space<vmem>>, vector<8x128xf32>,
    %cst_1 = arith.constant 0.000000e+00 : f32
    %2 = vector.broadcast %cst_1 : f32 to vector<8x128xf32>
    %c0_2 = arith.constant 0 : index
    %c0_3 = arith.constant 0 : index
    %3 = vector.load %arg7[%c0_2, %c0_3] : memref<8x128xf32, #tpu.memory_space<vmem>>, vector<8x128xf32>
    tpu.vector_store %arg7[%c0_2, %c0_3], %2 {strides = array<i32>} : memref<8x128xf32, #tpu.memory_space<vmem>>, vector<8x128xf32>,
    %c0_i32 = arith.constant 0 : i32
    %4 = arith.index_cast %c0_i32 : i32 to index
    %c0_4 = arith.constant 0 : index
    %c0_5 = arith.constant 0 : index
    %5 = vector.load %arg1[%4, %c0_4, %c0_5] : memref<4x8x512xf32, #tpu.memory_space<vmem>>, vector<1x8x512xf32>
    %6 = vector.shape_cast %5 : vector<1x8x512xf32> to vector<8x512xf32>
    %c0_6 = arith.constant 0 : index
    %c0_7 = arith.constant 0 : index
    %7 = vector.load %arg6[%c0_6, %c0_7] : memref<8x128xf32, #tpu.memory_space<vmem>>, vector<8x128xf32>
    %8 = arith.truncf %7 : vector<8x128xf32> to vector<8x128xbf16>
    %c0_8 = arith.constant 0 : index
    %c0_9 = arith.constant 0 : index
    %9 = vector.load %arg2[%c0_8, %c0_9] : memref<128x512xbf16, #tpu.memory_space<vmem>>, vector<128x512xbf16>
    %cst_10 = arith.constant dense<0.000000e+00> : vector<8x512xf32>
    %10 = tpu.matmul %8, %9, %cst_10 {dimension_numbers = #tpu.dot_dimension_numbers<[1], [0], [0], [1], [0, 0, 1, 1], [], []>} : vector<8x128xbf16>, vector<128x512xbf16>, vector<8x512xf32> -> vector<8x512xf32>
    %11 = arith.addf %6, %10 : vector<8x512xf32>
    %12 = vector.extract_strided_slice %11 {offsets = [0, 0], sizes = [8, 128], strides = [1, 1]} : vector<8x512xf32> to vector<8x128xf32>
    %13 = arith.negf %12 : vector<8x128xf32>
    %14 = math.exp %13 : vector<8x128xf32>
    %cst_11 = arith.constant 1.000000e+00 : f32
    %15 = vector.broadcast %cst_11 : f32 to vector<8x128xf32>
    %16 = arith.addf %15, %14 : vector<8x128xf32>
    %17 = arith.divf %15, %16 : vector<8x128xf32>
    %18 = vector.extract_strided_slice %11 {offsets = [0, 128], sizes = [8, 128], strides = [1, 1]} : vector<8x512xf32> to vector<8x128xf32>
    %19 = arith.negf %18 : vector<8x128xf32>
    %20 = math.exp %19 : vector<8x128xf32>
    %cst_12 = arith.constant 1.000000e+00 : f32
    %21 = vector.broadcast %cst_12 : f32 to vector<8x128xf32>
    %22 = arith.addf %21, %20 : vector<8x128xf32>
    %23 = arith.divf %21, %22 : vector<8x128xf32>
    %24 = vector.extract_strided_slice %11 {offsets = [0, 256], sizes = [8, 128], strides = [1, 1]} : vector<8x512xf32> to vector<8x128xf32>
    %25 = math.tanh %24 : vector<8x128xf32>
    %26 = vector.extract_strided_slice %11 {offsets = [0, 384], sizes = [8, 128], strides = [1, 1]} : vector<8x512xf32> to vector<8x128xf32>
    %27 = arith.negf %26 : vector<8x128xf32>
    %28 = math.exp %27 : vector<8x128xf32>
    %cst_13 = arith.constant 1.000000e+00 : f32
    %29 = vector.broadcast %cst_13 : f32 to vector<8x128xf32>
    %30 = arith.addf %29, %28 : vector<8x128xf32>
    %31 = arith.divf %29, %30 : vector<8x128xf32>
    %c0_14 = arith.constant 0 : index
    %c0_15 = arith.constant 0 : index
    %32 = vector.load %arg7[%c0_14, %c0_15] : memref<8x128xf32, #tpu.memory_space<vmem>>, vector<8x128xf32>
    %33 = arith.mulf %23, %32 : vector<8x128xf32>
    %34 = arith.mulf %17, %25 : vector<8x128xf32>
    %35 = arith.addf %33, %34 : vector<8x128xf32>
    %c0_16 = arith.constant 0 : index
    %c0_17 = arith.constant 0 : index
    %36 = vector.load %arg7[%c0_16, %c0_17] : memref<8x128xf32, #tpu.memory_space<vmem>>, vector<8x128xf32>
    tpu.vector_store %arg7[%c0_16, %c0_17], %35 {strides = array<i32>} : memref<8x128xf32, #tpu.memory_space<vmem>>, vector<8x128xf32>,
    %37 = math.tanh %35 : vector<8x128xf32>
    %38 = arith.mulf %31, %37 : vector<8x128xf32>
    %c0_18 = arith.constant 0 : index
    %c0_19 = arith.constant 0 : index
    %39 = vector.load %arg6[%c0_18, %c0_19] : memref<8x128xf32, #tpu.memory_space<vmem>>, vector<8x128xf32>
    tpu.vector_store %arg6[%c0_18, %c0_19], %38 {strides = array<i32>} : memref<8x128xf32, #tpu.memory_space<vmem>>, vector<8x128xf32>,
    %c1_i32 = arith.constant 1 : i32
    %40 = arith.index_cast %c1_i32 : i32 to index
    %c0_20 = arith.constant 0 : index
    %c0_21 = arith.constant 0 : index
    %41 = vector.load %arg1[%40, %c0_20, %c0_21] : memref<4x8x512xf32, #tpu.memory_space<vmem>>, vector<1x8x512xf32>
    %42 = vector.shape_cast %41 : vector<1x8x512xf32> to vector<8x512xf32>
    %c0_22 = arith.constant 0 : index
    %c0_23 = arith.constant 0 : index
    %43 = vector.load %arg6[%c0_22, %c0_23] : memref<8x128xf32, #tpu.memory_space<vmem>>, vector<8x128xf32>
    %44 = arith.truncf %43 : vector<8x128xf32> to vector<8x128xbf16>
    %c0_24 = arith.constant 0 : index
    %c0_25 = arith.constant 0 : index
    %45 = vector.load %arg2[%c0_24, %c0_25] : memref<128x512xbf16, #tpu.memory_space<vmem>>, vector<128x512xbf16>
    %cst_26 = arith.constant dense<0.000000e+00> : vector<8x512xf32>
    %46 = tpu.matmul %44, %45, %cst_26 {dimension_numbers = #tpu.dot_dimension_numbers<[1], [0], [0], [1], [0, 0, 1, 1], [], []>} : vector<8x128xbf16>, vector<128x512xbf16>, vector<8x512xf32> -> vector<8x512xf32>
    %47 = arith.addf %42, %46 : vector<8x512xf32>
    %48 = vector.extract_strided_slice %47 {offsets = [0, 0], sizes = [8, 128], strides = [1, 1]} : vector<8x512xf32> to vector<8x128xf32>
    %49 = arith.negf %48 : vector<8x128xf32>
    %50 = math.exp %49 : vector<8x128xf32>
    %cst_27 = arith.constant 1.000000e+00 : f32
    %51 = vector.broadcast %cst_27 : f32 to vector<8x128xf32>
    %52 = arith.addf %51, %50 : vector<8x128xf32>
    %53 = arith.divf %51, %52 : vector<8x128xf32>
    %54 = vector.extract_strided_slice %47 {offsets = [0, 128], sizes = [8, 128], strides = [1, 1]} : vector<8x512xf32> to vector<8x128xf32>
    %55 = arith.negf %54 : vector<8x128xf32>
    %56 = math.exp %55 : vector<8x128xf32>
    %cst_28 = arith.constant 1.000000e+00 : f32
    %57 = vector.broadcast %cst_28 : f32 to vector<8x128xf32>
    %58 = arith.addf %57, %56 : vector<8x128xf32>
    %59 = arith.divf %57, %58 : vector<8x128xf32>
    %60 = vector.extract_strided_slice %47 {offsets = [0, 256], sizes = [8, 128], strides = [1, 1]} : vector<8x512xf32> to vector<8x128xf32>
    %61 = math.tanh %60 : vector<8x128xf32>
    %62 = vector.extract_strided_slice %47 {offsets = [0, 384], sizes = [8, 128], strides = [1, 1]} : vector<8x512xf32> to vector<8x128xf32>
    %63 = arith.negf %62 : vector<8x128xf32>
    %64 = math.exp %63 : vector<8x128xf32>
    %cst_29 = arith.constant 1.000000e+00 : f32
    %65 = vector.broadcast %cst_29 : f32 to vector<8x128xf32>
    %66 = arith.addf %65, %64 : vector<8x128xf32>
    %67 = arith.divf %65, %66 : vector<8x128xf32>
    %c0_30 = arith.constant 0 : index
    %c0_31 = arith.constant 0 : index
    %68 = vector.load %arg7[%c0_30, %c0_31] : memref<8x128xf32, #tpu.memory_space<vmem>>, vector<8x128xf32>
    %69 = arith.mulf %59, %68 : vector<8x128xf32>
    %70 = arith.mulf %53, %61 : vector<8x128xf32>
    %71 = arith.addf %69, %70 : vector<8x128xf32>
    %c0_32 = arith.constant 0 : index
    %c0_33 = arith.constant 0 : index
    %72 = vector.load %arg7[%c0_32, %c0_33] : memref<8x128xf32, #tpu.memory_space<vmem>>, vector<8x128xf32>
    tpu.vector_store %arg7[%c0_32, %c0_33], %71 {strides = array<i32>} : memref<8x128xf32, #tpu.memory_space<vmem>>, vector<8x128xf32>,
    %73 = math.tanh %71 : vector<8x128xf32>
    %74 = arith.mulf %67, %73 : vector<8x128xf32>
    %c0_34 = arith.constant 0 : index
    %c0_35 = arith.constant 0 : index
    %75 = vector.load %arg6[%c0_34, %c0_35] : memref<8x128xf32, #tpu.memory_space<vmem>>, vector<8x128xf32>
    tpu.vector_store %arg6[%c0_34, %c0_35], %74 {strides = array<i32>} : memref<8x128xf32, #tpu.memory_space<vmem>>, vector<8x128xf32>,
    %c2_i32 = arith.constant 2 : i32
    %76 = arith.index_cast %c2_i32 : i32 to index
    %c0_36 = arith.constant 0 : index
    %c0_37 = arith.constant 0 : index
    %77 = vector.load %arg1[%76, %c0_36, %c0_37] : memref<4x8x512xf32, #tpu.memory_space<vmem>>, vector<1x8x512xf32>
    %78 = vector.shape_cast %77 : vector<1x8x512xf32> to vector<8x512xf32>
    %c0_38 = arith.constant 0 : index
    %c0_39 = arith.constant 0 : index
    %79 = vector.load %arg6[%c0_38, %c0_39] : memref<8x128xf32, #tpu.memory_space<vmem>>, vector<8x128xf32>
    %80 = arith.truncf %79 : vector<8x128xf32> to vector<8x128xbf16>
    %c0_40 = arith.constant 0 : index
    %c0_41 = arith.constant 0 : index
    %81 = vector.load %arg2[%c0_40, %c0_41] : memref<128x512xbf16, #tpu.memory_space<vmem>>, vector<128x512xbf16>
    %cst_42 = arith.constant dense<0.000000e+00> : vector<8x512xf32>
    %82 = tpu.matmul %80, %81, %cst_42 {dimension_numbers = #tpu.dot_dimension_numbers<[1], [0], [0], [1], [0, 0, 1, 1], [], []>} : vector<8x128xbf16>, vector<128x512xbf16>, vector<8x512xf32> -> vector<8x512xf32>
    %83 = arith.addf %78, %82 : vector<8x512xf32>
    %84 = vector.extract_strided_slice %83 {offsets = [0, 0], sizes = [8, 128], strides = [1, 1]} : vector<8x512xf32> to vector<8x128xf32>
    %85 = arith.negf %84 : vector<8x128xf32>
    %86 = math.exp %85 : vector<8x128xf32>
    %cst_43 = arith.constant 1.000000e+00 : f32
    %87 = vector.broadcast %cst_43 : f32 to vector<8x128xf32>
    %88 = arith.addf %87, %86 : vector<8x128xf32>
    %89 = arith.divf %87, %88 : vector<8x128xf32>
    %90 = vector.extract_strided_slice %83 {offsets = [0, 128], sizes = [8, 128], strides = [1, 1]} : vector<8x512xf32> to vector<8x128xf32>
    %91 = arith.negf %90 : vector<8x128xf32>
    %92 = math.exp %91 : vector<8x128xf32>
    %cst_44 = arith.constant 1.000000e+00 : f32
    %93 = vector.broadcast %cst_44 : f32 to vector<8x128xf32>
    %94 = arith.addf %93, %92 : vector<8x128xf32>
    %95 = arith.divf %93, %94 : vector<8x128xf32>
    %96 = vector.extract_strided_slice %83 {offsets = [0, 256], sizes = [8, 128], strides = [1, 1]} : vector<8x512xf32> to vector<8x128xf32>
    %97 = math.tanh %96 : vector<8x128xf32>
    %98 = vector.extract_strided_slice %83 {offsets = [0, 384], sizes = [8, 128], strides = [1, 1]} : vector<8x512xf32> to vector<8x128xf32>
    %99 = arith.negf %98 : vector<8x128xf32>
    %100 = math.exp %99 : vector<8x128xf32>
    %cst_45 = arith.constant 1.000000e+00 : f32
    %101 = vector.broadcast %cst_45 : f32 to vector<8x128xf32>
    %102 = arith.addf %101, %100 : vector<8x128xf32>
    %103 = arith.divf %101, %102 : vector<8x128xf32>
    %c0_46 = arith.constant 0 : index
    %c0_47 = arith.constant 0 : index
    %104 = vector.load %arg7[%c0_46, %c0_47] : memref<8x128xf32, #tpu.memory_space<vmem>>, vector<8x128xf32>
    %105 = arith.mulf %95, %104 : vector<8x128xf32>
    %106 = arith.mulf %89, %97 : vector<8x128xf32>
    %107 = arith.addf %105, %106 : vector<8x128xf32>
    %c0_48 = arith.constant 0 : index
    %c0_49 = arith.constant 0 : index
    %108 = vector.load %arg7[%c0_48, %c0_49] : memref<8x128xf32, #tpu.memory_space<vmem>>, vector<8x128xf32>
    tpu.vector_store %arg7[%c0_48, %c0_49], %107 {strides = array<i32>} : memref<8x128xf32, #tpu.memory_space<vmem>>, vector<8x128xf32>,
    %109 = math.tanh %107 : vector<8x128xf32>
    %110 = arith.mulf %103, %109 : vector<8x128xf32>
    %c0_50 = arith.constant 0 : index
    %c0_51 = arith.constant 0 : index
    %111 = vector.load %arg6[%c0_50, %c0_51] : memref<8x128xf32, #tpu.memory_space<vmem>>, vector<8x128xf32>
    tpu.vector_store %arg6[%c0_50, %c0_51], %110 {strides = array<i32>} : memref<8x128xf32, #tpu.memory_space<vmem>>, vector<8x128xf32>,
    %c3_i32 = arith.constant 3 : i32
    %112 = arith.index_cast %c3_i32 : i32 to index
    %c0_52 = arith.constant 0 : index
    %c0_53 = arith.constant 0 : index
    %113 = vector.load %arg1[%112, %c0_52, %c0_53] : memref<4x8x512xf32, #tpu.memory_space<vmem>>, vector<1x8x512xf32>
    %114 = vector.shape_cast %113 : vector<1x8x512xf32> to vector<8x512xf32>
    %c0_54 = arith.constant 0 : index
    %c0_55 = arith.constant 0 : index
    %115 = vector.load %arg6[%c0_54, %c0_55] : memref<8x128xf32, #tpu.memory_space<vmem>>, vector<8x128xf32>
    %116 = arith.truncf %115 : vector<8x128xf32> to vector<8x128xbf16>
    %c0_56 = arith.constant 0 : index
    %c0_57 = arith.constant 0 : index
    %117 = vector.load %arg2[%c0_56, %c0_57] : memref<128x512xbf16, #tpu.memory_space<vmem>>, vector<128x512xbf16>
    %cst_58 = arith.constant dense<0.000000e+00> : vector<8x512xf32>
    %118 = tpu.matmul %116, %117, %cst_58 {dimension_numbers = #tpu.dot_dimension_numbers<[1], [0], [0], [1], [0, 0, 1, 1], [], []>} : vector<8x128xbf16>, vector<128x512xbf16>, vector<8x512xf32> -> vector<8x512xf32>
    %119 = arith.addf %114, %118 : vector<8x512xf32>
    %120 = vector.extract_strided_slice %119 {offsets = [0, 0], sizes = [8, 128], strides = [1, 1]} : vector<8x512xf32> to vector<8x128xf32>
    %121 = arith.negf %120 : vector<8x128xf32>
    %122 = math.exp %121 : vector<8x128xf32>
    %cst_59 = arith.constant 1.000000e+00 : f32
    %123 = vector.broadcast %cst_59 : f32 to vector<8x128xf32>
    %124 = arith.addf %123, %122 : vector<8x128xf32>
    %125 = arith.divf %123, %124 : vector<8x128xf32>
    %126 = vector.extract_strided_slice %119 {offsets = [0, 128], sizes = [8, 128], strides = [1, 1]} : vector<8x512xf32> to vector<8x128xf32>
    %127 = arith.negf %126 : vector<8x128xf32>
    %128 = math.exp %127 : vector<8x128xf32>
    %cst_60 = arith.constant 1.000000e+00 : f32
    %129 = vector.broadcast %cst_60 : f32 to vector<8x128xf32>
    %130 = arith.addf %129, %128 : vector<8x128xf32>
    %131 = arith.divf %129, %130 : vector<8x128xf32>
    %132 = vector.extract_strided_slice %119 {offsets = [0, 256], sizes = [8, 128], strides = [1, 1]} : vector<8x512xf32> to vector<8x128xf32>
    %133 = math.tanh %132 : vector<8x128xf32>
    %134 = vector.extract_strided_slice %119 {offsets = [0, 384], sizes = [8, 128], strides = [1, 1]} : vector<8x512xf32> to vector<8x128xf32>
    %135 = arith.negf %134 : vector<8x128xf32>
    %136 = math.exp %135 : vector<8x128xf32>
    %cst_61 = arith.constant 1.000000e+00 : f32
    %137 = vector.broadcast %cst_61 : f32 to vector<8x128xf32>
    %138 = arith.addf %137, %136 : vector<8x128xf32>
    %139 = arith.divf %137, %138 : vector<8x128xf32>
    %c0_62 = arith.constant 0 : index
    %c0_63 = arith.constant 0 : index
    %140 = vector.load %arg7[%c0_62, %c0_63] : memref<8x128xf32, #tpu.memory_space<vmem>>, vector<8x128xf32>
    %141 = arith.mulf %131, %140 : vector<8x128xf32>
    %142 = arith.mulf %125, %133 : vector<8x128xf32>
    %143 = arith.addf %141, %142 : vector<8x128xf32>
    %c0_64 = arith.constant 0 : index
    %c0_65 = arith.constant 0 : index
    %144 = vector.load %arg7[%c0_64, %c0_65] : memref<8x128xf32, #tpu.memory_space<vmem>>, vector<8x128xf32>
    tpu.vector_store %arg7[%c0_64, %c0_65], %143 {strides = array<i32>} : memref<8x128xf32, #tpu.memory_space<vmem>>, vector<8x128xf32>,
    %145 = math.tanh %143 : vector<8x128xf32>
    %146 = arith.mulf %139, %145 : vector<8x128xf32>
    %c0_66 = arith.constant 0 : index
    %c0_67 = arith.constant 0 : index
    %147 = vector.load %arg6[%c0_66, %c0_67] : memref<8x128xf32, #tpu.memory_space<vmem>>, vector<8x128xf32>
    tpu.vector_store %arg6[%c0_66, %c0_67], %146 {strides = array<i32>} : memref<8x128xf32, #tpu.memory_space<vmem>>, vector<8x128xf32>,
    %c4_i32 = arith.constant 4 : i32
    %c0_68 = arith.constant 0 : index
    %c0_69 = arith.constant 0 : index
    %148 = vector.load %arg6[%c0_68, %c0_69] : memref<8x128xf32, #tpu.memory_space<vmem>>, vector<8x128xf32>
    %149 = arith.truncf %148 : vector<8x128xf32> to vector<8x128xbf16>
    %c0_70 = arith.constant 0 : index
    %c0_71 = arith.constant 0 : index
    %150 = vector.load %arg3[%c0_70, %c0_71] : memref<128x128xbf16, #tpu.memory_space<vmem>>, vector<128x128xbf16>
    %cst_72 = arith.constant dense<0.000000e+00> : vector<8x128xf32>
    %151 = tpu.matmul %149, %150, %cst_72 {dimension_numbers = #tpu.dot_dimension_numbers<[1], [0], [0], [1], [0, 0, 1, 1], [], []>} : vector<8x128xbf16>, vector<128x128xbf16>, vector<8x128xf32> -> vector<8x128xf32>
    %c0_73 = arith.constant 0 : index
    %c0_74 = arith.constant 0 : index
    %152 = vector.load %arg4[%c0_73, %c0_74] : memref<1x128xf32, #tpu.memory_space<vmem>>, vector<1x128xf32>
    %153 = vector.broadcast %152 : vector<1x128xf32> to vector<8x128xf32>
    %154 = arith.addf %151, %153 : vector<8x128xf32>
    %c0_75 = arith.constant 0 : index
    %c0_76 = arith.constant 0 : index
    %155 = vector.load %arg5[%c0_75, %c0_76] : memref<8x128xf32, #tpu.memory_space<vmem>>, vector<8x128xf32>
    tpu.vector_store %arg5[%c0_75, %c0_76], %154 {strides = array<i32>} : memref<8x128xf32, #tpu.memory_space<vmem>>, vector<8x128xf32>,
    return
  }
  func.func @transform_0(%arg0: i32) -> (i32, i32, i32) {
    %c0_i32 = arith.constant 0 : i32
    %c0_i32_0 = arith.constant 0 : i32
    %c0_i32_1 = arith.constant 0 : i32
    %c0_i32_2 = arith.constant 0 : i32
    return %c0_i32, %c0_i32_0, %c0_i32_1 : i32, i32, i32
  }
  func.func @transform_1(%arg0: i32) -> (i32, i32) {
    %c0_i32 = arith.constant 0 : i32
    %c0_i32_0 = arith.constant 0 : i32
    %c0_i32_1 = arith.constant 0 : i32
    return %c0_i32, %c0_i32_0 : i32, i32
  }
  func.func @transform_2(%arg0: i32) -> (i32, i32) {
    %c0_i32 = arith.constant 0 : i32
    %c0_i32_0 = arith.constant 0 : i32
    %c0_i32_1 = arith.constant 0 : i32
    return %c0_i32, %c0_i32_0 : i32, i32
  }
  func.func @transform_3(%arg0: i32) -> (i32, i32) {
    %c0_i32 = arith.constant 0 : i32
    %c0_i32_0 = arith.constant 0 : i32
    %c0_i32_1 = arith.constant 0 : i32
    return %c0_i32, %c0_i32_0 : i32, i32
  }
  func.func @transform_4(%arg0: i32) -> (i32, i32) {
    %c0_i32 = arith.constant 0 : i32
    %c0_i32_0 = arith.constant 0 : i32
    %c0_i32_1 = arith.constant 0 : i32
    return %c0_i32, %c0_i32_0 : i32, i32
  }
}

</mosaic_0001>

<bundles_post_ra>
// kernel: squeeze.1
= control target key start
LH: loop header
LB: loop body
LE: loop exit
PB: predicated region body
PF: predicated region fallthrough
CT: control target
= control target key end

     0   :  { %s237_s0 = inlined_call_operand.vmem [shape: f32[8,512], index: 0, kind: input, shape index: {}]   ;;  %s238_s1 = inlined_call_operand.vmem [shape: f32[4,2,512], index: 1, kind: output, shape index: {}]  }
   0x1   :  { %v2_v0 = vld [vmem:[%s237_s0] sm:$0xff]   ;;  %v149_v1 = vld [vmem:[%s237_s0 + $0x8] sm:$0xff]   ;;  %v150_v2 = vld [vmem:[%s237_s0 + $0x10] sm:$0xff]  }
   0x2   :  { %3 = vst [vmem:[#allocation0] sm:$0x3] %v2_v0   ;;  %5 = vst [vmem:[#allocation0 + $0x1e] sm:$0xc] %v2_v0   ;;  %v151_v3 = vld [vmem:[%s237_s0 + $0x18] sm:$0xff]  }
   0x3   :  { %7 = vst [vmem:[#allocation0 + $0x3c] sm:$0x30] %v2_v0   ;;  %9 = vst [vmem:[#allocation0 + $0x5a] sm:$0xc0] %v2_v0  }
   0x4   :  { %13 = vst [vmem:[#allocation0 + $0x8] sm:$0x3] %v149_v1   ;;  %15 = vst [vmem:[#allocation0 + $0x26] sm:$0xc] %v149_v1  }
   0x5   :  { %17 = vst [vmem:[#allocation0 + $0x44] sm:$0x30] %v149_v1   ;;  %19 = vst [vmem:[#allocation0 + $0x62] sm:$0xc0] %v149_v1  }
   0x6   :  { %23 = vst [vmem:[#allocation0 + $0x10] sm:$0x3] %v150_v2   ;;  %25 = vst [vmem:[#allocation0 + $0x2e] sm:$0xc] %v150_v2  }
   0x7   :  { %27 = vst [vmem:[#allocation0 + $0x4c] sm:$0x30] %v150_v2   ;;  %29 = vst [vmem:[#allocation0 + $0x6a] sm:$0xc0] %v150_v2  }
   0x8   :  { %33 = vst [vmem:[#allocation0 + $0x18] sm:$0x3] %v151_v3   ;;  %35 = vst [vmem:[#allocation0 + $0x36] sm:$0xc] %v151_v3  }
   0x9   :  { %37 = vst [vmem:[#allocation0 + $0x54] sm:$0x30] %v151_v3   ;;  %39 = vst [vmem:[#allocation0 + $0x72] sm:$0xc0] %v151_v3   ;;  %v43_v4 = vld [vmem:[#allocation0] sm:$0x3] }
   0xa   :  { %45 = vst [vmem:[%s238_s1] sm:$0x3] %v43_v4  ;;  %v64_v8 = vld [vmem:[#allocation0 + $0x20] sm:$0x3] }
   0xb   :  { %v47_v5 = vld [vmem:[#allocation0 + $0x8] sm:$0x3]  ;;  %155 = vst [vmem:[%s238_s1 + $0x8] sm:$0x3] %v64_v8  ;;  %v88_v12 = vld [vmem:[#allocation0 + $0x40] sm:$0x3] }
   0xc   :  { %152 = vst [vmem:[%s238_s1 + $0x2] sm:$0x3] %v47_v5  ;;  %v70_v9 = vld [vmem:[#allocation0 + $0x28] sm:$0x3]  ;;  %159 = vst [vmem:[%s238_s1 + $0x10] sm:$0x3] %v88_v12 }
   0xd   :  { %v52_v6 = vld [vmem:[#allocation0 + $0x10] sm:$0x3]  ;;  %156 = vst [vmem:[%s238_s1 + $0xa] sm:$0x3] %v70_v9  ;;  %v94_v13 = vld [vmem:[#allocation0 + $0x48] sm:$0x3] }
   0xe   :  { %153 = vst [vmem:[%s238_s1 + $0x4] sm:$0x3] %v52_v6  ;;  %v76_v10 = vld [vmem:[#allocation0 + $0x30] sm:$0x3]  ;;  %160 = vst [vmem:[%s238_s1 + $0x12] sm:$0x3] %v94_v13 }
   0xf   :  { %v58_v7 = vld [vmem:[#allocation0 + $0x18] sm:$0x3]  ;;  %157 = vst [vmem:[%s238_s1 + $0xc] sm:$0x3] %v76_v10  ;;  %v100_v14 = vld [vmem:[#allocation0 + $0x50] sm:$0x3] }
  0x10   :  { %154 = vst [vmem:[%s238_s1 + $0x6] sm:$0x3] %v58_v7  ;;  %v82_v11 = vld [vmem:[#allocation0 + $0x38] sm:$0x3]  ;;  %161 = vst [vmem:[%s238_s1 + $0x14] sm:$0x3] %v100_v14 }
  0x11   :  { %158 = vst [vmem:[%s238_s1 + $0xe] sm:$0x3] %v82_v11  ;;  %v106_v15 = vld [vmem:[#allocation0 + $0x58] sm:$0x3]  ;;  %v112_v16 = vld [vmem:[#allocation0 + $0x60] sm:$0x3] }
  0x12   :  { %162 = vst [vmem:[%s238_s1 + $0x16] sm:$0x3] %v106_v15  ;;  %v118_v17 = vld [vmem:[#allocation0 + $0x68] sm:$0x3]  ;;  %v124_v18 = vld [vmem:[#allocation0 + $0x70] sm:$0x3] }
  0x13   :  { %163 = vst [vmem:[%s238_s1 + $0x18] sm:$0x3] %v112_v16  ;;  %164 = vst [vmem:[%s238_s1 + $0x1a] sm:$0x3] %v118_v17  ;;  %v130_v19 = vld [vmem:[#allocation0 + $0x78] sm:$0x3] }
  0x14   :  { %165 = vst [vmem:[%s238_s1 + $0x1c] sm:$0x3] %v124_v18  ;;  %166 = vst [vmem:[%s238_s1 + $0x1e] sm:$0x3] %v130_v19 }

// kernel: cnnlstm_forward.3
= control target key start
LH: loop header
LB: loop body
LE: loop exit
PB: predicated region body
PF: predicated region fallthrough
CT: control target
= control target key end

     0   :  { %v1699_v1 = vmov 0   ;;  %v1700_v33 = vmov 0.0|0.0   ;;  %vm1702_vm0 = vmmov 0   ;;  %s2114_s1 = inlined_call_operand.vmem [shape: bf16[128,512], index: 1, kind: input, shape index: {}]   ;;  %s2115_s0 = inlined_call_operand.vmem [shape: f32[4,8,512], index: 0, kind: input, shape index: {}]   ;;  %s2116_s2 = inlined_call_operand.vmem [shape: bf16[128,128], index: 2, kind: input, shape index: {}]   ;;  %s2117_s3 = inlined_call_operand.vmem [shape: f32[1,128], index: 3, kind: input, shape index: {}]   ;;  %s2118_s4 = inlined_call_operand.vmem [shape: f32[8,128], index: 4, kind: output, shape index: {}]  }
   0x1   :  { %v1731_v0 = vld [vmem:[%s2114_s1 + $0x4] ss:$16 sps:$4 sm:$0xff]   ;;  %250 = vmatprep.mubr.bf16.mxu0 %v1699_v1  ;;  %291 = vmatprep.mubr.bf16.mxu1 %v1699_v1  ;;  %v1738_v2 = vld [vmem:[%s2114_s1] ss:$16 sps:$4 sm:$0xff]   ;;  %v1761_v6 = vld [vmem:[%s2114_s1 + $0xc] ss:$16 sps:$4 sm:$0xff]  }
   0x2   :  { %218 = vmatprep.subr.bf16.mxu0 %v1731_v0  ;;  %v1744_v3 = vld [vmem:[%s2114_s1 + $0x24] ss:$16 sps:$4 sm:$0xff]   ;;  %v1750_v4 = vld [vmem:[%s2114_s1 + $0x20] ss:$16 sps:$4 sm:$0xff]   ;;  %v1766_v7 = vld [vmem:[%s2114_s1 + $0x8] ss:$16 sps:$4 sm:$0xff]   ;;  %259 = vmatprep.subr.bf16.mxu1 %v1761_v6 }
   0x3   :  { %219 = vmatpush1.bf16.msra.mxu0 %v1738_v2  ;;  %v1756_v5 = vld [vmem:[%s2114_s1 + $0x44] ss:$16 sps:$4 sm:$0xff]   ;;  %v1772_v8 = vld [vmem:[%s2114_s1 + $0x40] ss:$16 sps:$4 sm:$0xff]   ;;  %260 = vmatpush1.bf16.msra.mxu1 %v1766_v7  ;;  %v1785_v10 = vld [vmem:[%s2114_s1 + $0x2c] ss:$16 sps:$4 sm:$0xff]  }
   0x4   :  { %220 = vmatprep.subr.bf16.mxu0 %v1744_v3  ;;  %v1779_v9 = vld [vmem:[%s2114_s1 + $0x64] ss:$16 sps:$4 sm:$0xff]   ;;  %v1790_v11 = vld [vmem:[%s2114_s1 + $0x28] ss:$16 sps:$4 sm:$0xff]   ;;  %261 = vmatprep.subr.bf16.mxu1 %v1785_v10  ;;  %v1797_v12 = vld [vmem:[%s2114_s1 + $0x60] ss:$16 sps:$4 sm:$0xff]  }
   0x5   :  { %v1802_v13 = vld [vmem:[%s2114_s1 + $0x84] ss:$16 sps:$4 sm:$0xff]   ;;  %v1807_v14 = vld [vmem:[%s2114_s1 + $0x4c] ss:$16 sps:$4 sm:$0xff]   ;;  %v1814_v15 = vld [vmem:[%s2114_s1 + $0x48] ss:$16 sps:$4 sm:$0xff]  }
   0x6   :  { %v1820_v16 = vld [vmem:[%s2114_s1 + $0x6c] ss:$16 sps:$4 sm:$0xff]   ;;  %v1826_v17 = vld [vmem:[%s2114_s1 + $0x80] ss:$16 sps:$4 sm:$0xff]   ;;  %v1832_v18 = vld [vmem:[%s2114_s1 + $0xa4] ss:$16 sps:$4 sm:$0xff]  }
   0x7   :  { %221 = vmatpush1.bf16.msra.mxu0 %v1750_v4  ;;  %262 = vmatpush1.bf16.msra.mxu1 %v1790_v11  ;;  %v1838_v19 = vld [vmem:[%s2114_s1 + $0x68] ss:$16 sps:$4 sm:$0xff]   ;;  %v1844_v20 = vld [vmem:[%s2114_s1 + $0x8c] ss:$16 sps:$4 sm:$0xff]   ;;  %v1850_v21 = vld [vmem:[%s2114_s1 + $0xa0] ss:$16 sps:$4 sm:$0xff]  }
   0x8   :  { %222 = vmatprep.subr.bf16.mxu0 %v1756_v5  ;;  %263 = vmatprep.subr.bf16.mxu1 %v1807_v14  ;;  %v1855_v22 = vld [vmem:[%s2114_s1 + $0xc4] ss:$16 sps:$4 sm:$0xff]   ;;  %v1862_v23 = vld [vmem:[%s2114_s1 + $0x88] ss:$16 sps:$4 sm:$0xff]   ;;  %v1868_v24 = vld [vmem:[%s2114_s1 + $0xac] ss:$16 sps:$4 sm:$0xff]  }
   0x9   :  { %v1874_v25 = vld [vmem:[%s2114_s1 + $0xc0] ss:$16 sps:$4 sm:$0xff]   ;;  %v1880_v26 = vld [vmem:[%s2114_s1 + $0xe4] ss:$16 sps:$4 sm:$0xff]   ;;  %v1886_v27 = vld [vmem:[%s2114_s1 + $0xa8] ss:$16 sps:$4 sm:$0xff]  }
   0xa   :  { %v1892_v28 = vld [vmem:[%s2114_s1 + $0xcc] ss:$16 sps:$4 sm:$0xff]   ;;  %v1898_v29 = vld [vmem:[%s2114_s1 + $0xe0] ss:$16 sps:$4 sm:$0xff]   ;;  %v1905_v30 = vld [vmem:[%s2114_s1 + $0xc8] ss:$16 sps:$4 sm:$0xff]  }
   0xb   :  { %223 = vmatpush1.bf16.msra.mxu0 %v1772_v8  ;;  %264 = vmatpush1.bf16.msra.mxu1 %v1814_v15  ;;  %v1911_v31 = vld [vmem:[%s2114_s1 + $0xec] ss:$16 sps:$4 sm:$0xff]   ;;  %v1918_v32 = vld [vmem:[%s2114_s1 + $0xe8] ss:$16 sps:$4 sm:$0xff]   ;;  %v20_v34 = vld [vmem:[%s2115_s0] sm:$0xff] }
   0xc   :  { %224 = vmatprep.subr.bf16.mxu0 %v1779_v9  ;;  %265 = vmatprep.subr.bf16.mxu1 %v1820_v16  ;;  %v21_v35 = vld [vmem:[%s2115_s0 + $0x8] sm:$0xff]  ;;  %v23_v44 = vld [vmem:[%s2115_s0 + $0x18] sm:$0xff]  ;;  %v22_v50 = vld [vmem:[%s2115_s0 + $0x10] sm:$0xff] }
   0xf   :  { %225 = vmatpush1.bf16.msra.mxu0 %v1797_v12  ;;  %266 = vmatpush1.bf16.msra.mxu1 %v1838_v19 }
  0x10   :  { %226 = vmatprep.subr.bf16.mxu0 %v1802_v13  ;;  %267 = vmatprep.subr.bf16.mxu1 %v1844_v20 }
  0x13   :  { %227 = vmatpush1.bf16.msra.mxu0 %v1826_v17  ;;  %268 = vmatpush1.bf16.msra.mxu1 %v1862_v23 }
  0x14   :  { %228 = vmatprep.subr.bf16.mxu0 %v1832_v18  ;;  %269 = vmatprep.subr.bf16.mxu1 %v1868_v24 }
  0x17   :  { %229 = vmatpush1.bf16.msra.mxu0 %v1850_v21  ;;  %270 = vmatpush1.bf16.msra.mxu1 %v1886_v27 }
  0x18   :  { %230 = vmatprep.subr.bf16.mxu0 %v1855_v22  ;;  %271 = vmatprep.subr.bf16.mxu1 %v1892_v28 }
  0x1b   :  { %231 = vmatpush1.bf16.msra.mxu0 %v1874_v25  ;;  %272 = vmatpush1.bf16.msra.mxu1 %v1905_v30 }
  0x1c   :  { %232 = vmatprep.subr.bf16.mxu0 %v1880_v26  ;;  %273 = vmatprep.subr.bf16.mxu1 %v1911_v31 }
  0x1f   :  { %233 = vmatpush1.bf16.msra.mxu0 %v1898_v29  ;;  %274 = vmatpush1.bf16.msra.mxu1 %v1918_v32 }
  0x20   :  { %530 = vmatprep.subr.bf16.mxu0 %v1731_v0  ;;  %571 = vmatprep.subr.bf16.mxu1 %v1761_v6 }
  0x22   :  { %251 = vmatmul.mubr.bf16.vlgmr.msra.gmra.mrb[0].mxu0 %v1700_v33  ;;  %292 = vmatmul.mubr.bf16.vlgmr.msra.gmra.mrb[0].mxu1 %v1700_v33 }
  0x23   :  { %531 = vmatpush1.bf16.msra.mxu0 %v1738_v2  ;;  %562 = vmatprep.mubr.bf16.mxu0 %v1699_v1 }
  0x24   :  { %532 = vmatprep.subr.bf16.mxu0 %v1744_v3  ;;  %572 = vmatpush1.bf16.msra.mxu1 %v1766_v7 }
  0x25   :  { %573 = vmatprep.subr.bf16.mxu1 %v1785_v10  ;;  %603 = vmatprep.mubr.bf16.mxu1 %v1699_v1 }
  0x27   :  { %533 = vmatpush1.bf16.msra.mxu0 %v1750_v4 }
  0x28   :  { %534 = vmatprep.subr.bf16.mxu0 %v1756_v5  ;;  %574 = vmatpush1.bf16.msra.mxu1 %v1790_v11 }
  0x29   :  { %575 = vmatprep.subr.bf16.mxu1 %v1807_v14 }
  0x2b   :  { %535 = vmatpush1.bf16.msra.mxu0 %v1772_v8 }
  0x2c   :  { %536 = vmatprep.subr.bf16.mxu0 %v1779_v9  ;;  %576 = vmatpush1.bf16.msra.mxu1 %v1814_v15 }
  0x2d   :  { %577 = vmatprep.subr.bf16.mxu1 %v1820_v16 }
  0x2f   :  { %537 = vmatpush1.bf16.msra.mxu0 %v1797_v12 }
  0x30   :  { %538 = vmatprep.subr.bf16.mxu0 %v1802_v13  ;;  %578 = vmatpush1.bf16.msra.mxu1 %v1838_v19 }
  0x31   :  { %579 = vmatprep.subr.bf16.mxu1 %v1844_v20 }
  0x33   :  { %539 = vmatpush1.bf16.msra.mxu0 %v1826_v17 }
  0x34   :  { %540 = vmatprep.subr.bf16.mxu0 %v1832_v18  ;;  %580 = vmatpush1.bf16.msra.mxu1 %v1862_v23 }
  0x35   :  { %581 = vmatprep.subr.bf16.mxu1 %v1868_v24 }
  0x37   :  { %541 = vmatpush1.bf16.msra.mxu0 %v1850_v21 }
  0x38   :  { %542 = vmatprep.subr.bf16.mxu0 %v1855_v22  ;;  %582 = vmatpush1.bf16.msra.mxu1 %v1886_v27 }
  0x39   :  { %583 = vmatprep.subr.bf16.mxu1 %v1892_v28 }
  0x3b   :  { %543 = vmatpush1.bf16.msra.mxu0 %v1874_v25 }
  0x3c   :  { %544 = vmatprep.subr.bf16.mxu0 %v1880_v26  ;;  %584 = vmatpush1.bf16.msra.mxu1 %v1905_v30 }
  0x3d   :  { %585 = vmatprep.subr.bf16.mxu1 %v1911_v31 }
  0x3f   :  { %545 = vmatpush1.bf16.msra.mxu0 %v1898_v29 }
  0x40   :  { %842 = vmatprep.subr.bf16.mxu0 %v1731_v0  ;;  %586 = vmatpush1.bf16.msra.mxu1 %v1918_v32 }
  0x41   :  { %883 = vmatprep.subr.bf16.mxu1 %v1761_v6 }
  0xf5   :  { %v252_v36 = vpop.f32.mrb[0].mxu0  ;;  %v293_v45 = vpop.f32.mrb[0].mxu1 }
  0xf6   :  { %v300_v37 = vadd.f32 %v252_v36, %v20_v34  ;;  %v254_v38 = vpop.f32.mrb[1].mxu0  ;;  %v295_v46 = vpop.f32.mrb[1].mxu1  ;;  %v302_v52 = vadd.f32 %v293_v45, %v22_v50  ;;  %v1423_v50 = vld [vmem:[%s2115_s0 + $0x38] sm:$0xff] }
  0xf7   :  { %v301_v39 = vadd.f32 %v254_v38, %v21_v35  ;;  %v256_v40 = vpop.f32.mrb[2].mxu0  ;;  %v303_v47 = vadd.f32 %v295_v46, %v23_v44  ;;  %v297_v48 = vpop.f32.mrb[2].mxu1  ;;  %v1420_v38 = vld [vmem:[%s2115_s0 + $0x20] sm:$0xff] }
  0xf8   :  { %v1417_v41 = vmul.f32 -1.442695, %v300_v37  ;;  %v257_v42 = vpop.f32.mrb[3].mxu0  ;;  %v298_v49 = vpop.f32.mrb[3].mxu1 }
  0xf9   :  { %v1418_v43 = vmul.f32 -1.442695, %v301_v39  ;;  %v1419_v51 = vmul.f32 -1.442695, %v303_v47  ;;  %v1421_v39 = vld [vmem:[%s2115_s0 + $0x28] sm:$0xff] }
  0xfa   :  { %1635 = vpow2.f32 %v1417_v41 }
  0xfb   :  { %1637 = vpow2.f32 %v1418_v43 }
  0xfc   :  { %1639 = vpow2.f32 %v1419_v51 }
  0xfd   :  { %1641 = vtanh.f32 %v302_v52  ;;  %v1422_v52 = vld [vmem:[%s2115_s0 + $0x30] sm:$0xff] }
 0x104   :  { %v1636_v53 = vpop.eup %1635 }
 0x105   :  { %v1638_v54 = vpop.eup %1637  ;;  %v307_v55 = vadd.f32 1.0, %v1636_v53 }
 0x106   :  { %v313_v56 = vadd.f32 1.0, %v1638_v54  ;;  %v1640_v57 = vpop.eup %1639 }
 0x107   :  { %1643 = vrcp.f32 %v307_v55  ;;  %v1642_v58 = vpop.eup %1641  ;;  %v320_v60 = vadd.f32 1.0, %v1640_v57 }
 0x108   :  { %1645 = vrcp.f32 %v313_v56 }
 0x109   :  { %1647 = vrcp.f32 %v320_v60 }
 0x111   :  { %v1644_v59 = vpop.eup %1643 }
 0x112   :  { %v1646_v61 = vpop.eup %1645  ;;  %v325_v62 = vmul.f32 %v1644_v59, %v1642_v58 }
 0x113   :  { %v324_v63 = vmul.f32 0.0, %v1646_v61  ;;  %v1648_v34 = vpop.eup %1647 }
 0x115   :  { %v1970_v33 = vadd.f32 %v325_v62, %v324_v63 }
 0x117   :  { %1649 = vtanh.f32 %v1970_v33 }
 0x121   :  { %v1650_v35 = vpop.eup %1649 }
 0x122   :  { %v329_v36 = vmul.f32 %v1650_v35, %v1648_v34 }
 0x124   :  { %v337_v37 = vpack.c.bf16 %v329_v36, %v329_v36 }
 0x126   :  { %563 = vmatmul.mubr.bf16.vlgmr.msra.gmra.mrb[4].mxu0 %v337_v37  ;;  %604 = vmatmul.mubr.bf16.vlgmr.msra.gmra.mrb[4].mxu1 %v337_v37 }
 0x127   :  { %843 = vmatpush1.bf16.msra.mxu0 %v1738_v2  ;;  %884 = vmatpush1.bf16.msra.mxu1 %v1766_v7 }
 0x128   :  { %844 = vmatprep.subr.bf16.mxu0 %v1744_v3  ;;  %885 = vmatprep.subr.bf16.mxu1 %v1785_v10 }
 0x129   :  { %874 = vmatprep.mubr.bf16.mxu0 %v1699_v1  ;;  %915 = vmatprep.mubr.bf16.mxu1 %v1699_v1 }
 0x12b   :  { %845 = vmatpush1.bf16.msra.mxu0 %v1750_v4  ;;  %886 = vmatpush1.bf16.msra.mxu1 %v1790_v11 }
 0x12c   :  { %846 = vmatprep.subr.bf16.mxu0 %v1756_v5  ;;  %887 = vmatprep.subr.bf16.mxu1 %v1807_v14 }
 0x12f   :  { %847 = vmatpush1.bf16.msra.mxu0 %v1772_v8  ;;  %888 = vmatpush1.bf16.msra.mxu1 %v1814_v15 }
 0x130   :  { %848 = vmatprep.subr.bf16.mxu0 %v1779_v9  ;;  %889 = vmatprep.subr.bf16.mxu1 %v1820_v16 }
 0x133   :  { %849 = vmatpush1.bf16.msra.mxu0 %v1797_v12  ;;  %890 = vmatpush1.bf16.msra.mxu1 %v1838_v19 }
 0x134   :  { %850 = vmatprep.subr.bf16.mxu0 %v1802_v13  ;;  %891 = vmatprep.subr.bf16.mxu1 %v1844_v20 }
 0x137   :  { %851 = vmatpush1.bf16.msra.mxu0 %v1826_v17  ;;  %892 = vmatpush1.bf16.msra.mxu1 %v1862_v23 }
 0x138   :  { %852 = vmatprep.subr.bf16.mxu0 %v1832_v18  ;;  %893 = vmatprep.subr.bf16.mxu1 %v1868_v24 }
 0x13b   :  { %853 = vmatpush1.bf16.msra.mxu0 %v1850_v21  ;;  %894 = vmatpush1.bf16.msra.mxu1 %v1886_v27 }
 0x13c   :  { %854 = vmatprep.subr.bf16.mxu0 %v1855_v22  ;;  %895 = vmatprep.subr.bf16.mxu1 %v1892_v28 }
 0x13f   :  { %855 = vmatpush1.bf16.msra.mxu0 %v1874_v25  ;;  %896 = vmatpush1.bf16.msra.mxu1 %v1905_v30 }
 0x140   :  { %856 = vmatprep.subr.bf16.mxu0 %v1880_v26  ;;  %897 = vmatprep.subr.bf16.mxu1 %v1911_v31 }
 0x143   :  { %857 = vmatpush1.bf16.msra.mxu0 %v1898_v29  ;;  %898 = vmatpush1.bf16.msra.mxu1 %v1918_v32 }
 0x144   :  { %1154 = vmatprep.subr.bf16.mxu0 %v1731_v0  ;;  %1195 = vmatprep.subr.bf16.mxu1 %v1761_v6 }
 0x1f9   :  { %v564_v40 = vpop.f32.mrb[4].mxu0  ;;  %v605_v41 = vpop.f32.mrb[4].mxu1 }
 0x1fa   :  { %v612_v42 = vadd.f32 %v1420_v38, %v564_v40  ;;  %v566_v43 = vpop.f32.mrb[5].mxu0  ;;  %v607_v44 = vpop.f32.mrb[5].mxu1  ;;  %v614_v54 = vadd.f32 %v1422_v52, %v605_v41  ;;  %v1499_v52 = vld [vmem:[%s2115_s0 + $0x68] sm:$0xff] }
 0x1fb   :  { %v613_v45 = vadd.f32 %v1421_v39, %v566_v43  ;;  %v568_v46 = vpop.f32.mrb[6].mxu0  ;;  %v609_v47 = vpop.f32.mrb[6].mxu1  ;;  %v615_v51 = vadd.f32 %v1423_v50, %v607_v44  ;;  %v1627_v44 = vld [vmem:[%s2116_s2] sm:$0xff]   ;;  %v1634_v50 = vld [vmem:[%s2116_s2 + $0x38] sm:$0xff]  }
 0x1fc   :  { %v1456_v48 = vmul.f32 -1.442695, %v612_v42  ;;  %v569_v0 = vpop.f32.mrb[7].mxu0  ;;  %v610_v49 = vpop.f32.mrb[7].mxu1  ;;  %v1628_v46 = vld [vmem:[%s2116_s2 + $0x8] sm:$0xff]   ;;  %v1629_v47 = vld [vmem:[%s2116_s2 + $0x10] sm:$0xff]  }
 0x1fd   :  { %v1457_v6 = vmul.f32 -1.442695, %v613_v45  ;;  %v1458_v53 = vmul.f32 -1.442695, %v615_v51  ;;  %v1701_v45 = vmov 0.0   ;;  %v1631_v0 = vld [vmem:[%s2116_s2 + $0x20] sm:$0xff]  }
 0x1fe   :  { %1651 = vpow2.f32 %v1456_v48  ;;  %v1630_v48 = vld [vmem:[%s2116_s2 + $0x18] sm:$0xff]   ;;  %v1632_v49 = vld [vmem:[%s2116_s2 + $0x28] sm:$0xff]   ;;  %v1498_v51 = vld [vmem:[%s2115_s0 + $0x60] sm:$0xff] }
 0x1ff   :  { %1653 = vpow2.f32 %v1457_v6  ;;  %v1633_v6 = vld [vmem:[%s2116_s2 + $0x30] sm:$0xff]  }
 0x200   :  { %1655 = vpow2.f32 %v1458_v53 }
 0x201   :  { %1657 = vtanh.f32 %v614_v54 }
 0x208   :  { %v1652_v55 = vpop.eup %1651 }
 0x209   :  { %v1654_v56 = vpop.eup %1653  ;;  %v619_v57 = vadd.f32 1.0, %v1652_v55 }
 0x20a   :  { %v625_v58 = vadd.f32 1.0, %v1654_v56  ;;  %v1656_v59 = vpop.eup %1655 }
 0x20b   :  { %1659 = vrcp.f32 %v619_v57  ;;  %v1658_v60 = vpop.eup %1657  ;;  %v632_v34 = vadd.f32 1.0, %v1656_v59 }
 0x20c   :  { %1661 = vrcp.f32 %v625_v58 }
 0x20d   :  { %1663 = vrcp.f32 %v632_v34 }
 0x215   :  { %v1660_v61 = vpop.eup %1659 }
 0x216   :  { %v1662_v62 = vpop.eup %1661  ;;  %v637_v63 = vmul.f32 %v1660_v61, %v1658_v60 }
 0x217   :  { %v636_v35 = vmul.f32 %v1662_v62, %v1970_v33  ;;  %v1664_v37 = vpop.eup %1663 }
 0x219   :  { %v2020_v36 = vadd.f32 %v637_v63, %v636_v35  ;;  %v1501_v35 = vld [vmem:[%s2115_s0 + $0x78] sm:$0xff] }
 0x21b   :  { %1665 = vtanh.f32 %v2020_v36 }
 0x225   :  { %v1666_v38 = vpop.eup %1665 }
 0x226   :  { %v641_v39 = vmul.f32 %v1666_v38, %v1664_v37  ;;  %v1500_v37 = vld [vmem:[%s2115_s0 + $0x70] sm:$0xff] }
 0x228   :  { %v649_v40 = vpack.c.bf16 %v641_v39, %v641_v39 }
 0x22a   :  { %875 = vmatmul.mubr.bf16.vlgmr.msra.gmra.mrb[8].mxu0 %v649_v40  ;;  %916 = vmatmul.mubr.bf16.vlgmr.msra.gmra.mrb[8].mxu1 %v649_v40 }
 0x22b   :  { %1155 = vmatpush1.bf16.msra.mxu0 %v1738_v2  ;;  %1196 = vmatpush1.bf16.msra.mxu1 %v1766_v7  ;;  %v1460_v2 = vld [vmem:[%s2115_s0 + $0x48] sm:$0xff] }
 0x22c   :  { %1156 = vmatprep.subr.bf16.mxu0 %v1744_v3  ;;  %1197 = vmatprep.subr.bf16.mxu1 %v1785_v10 }
 0x22d   :  { %1186 = vmatprep.mubr.bf16.mxu0 %v1699_v1  ;;  %1227 = vmatprep.mubr.bf16.mxu1 %v1699_v1  ;;  %v1459_v1 = vld [vmem:[%s2115_s0 + $0x40] sm:$0xff] }
 0x22f   :  { %1157 = vmatpush1.bf16.msra.mxu0 %v1750_v4  ;;  %1198 = vmatpush1.bf16.msra.mxu1 %v1790_v11 }
 0x230   :  { %1158 = vmatprep.subr.bf16.mxu0 %v1756_v5  ;;  %1199 = vmatprep.subr.bf16.mxu1 %v1807_v14 }
 0x233   :  { %1159 = vmatpush1.bf16.msra.mxu0 %v1772_v8  ;;  %1200 = vmatpush1.bf16.msra.mxu1 %v1814_v15 }
 0x234   :  { %1160 = vmatprep.subr.bf16.mxu0 %v1779_v9  ;;  %1201 = vmatprep.subr.bf16.mxu1 %v1820_v16  ;;  %v1462_v16 = vld [vmem:[%s2115_s0 + $0x58] sm:$0xff] }
 0x237   :  { %1161 = vmatpush1.bf16.msra.mxu0 %v1797_v12  ;;  %1202 = vmatpush1.bf16.msra.mxu1 %v1838_v19 }
 0x238   :  { %1162 = vmatprep.subr.bf16.mxu0 %v1802_v13  ;;  %1203 = vmatprep.subr.bf16.mxu1 %v1844_v20 }
 0x23b   :  { %1163 = vmatpush1.bf16.msra.mxu0 %v1826_v17  ;;  %1204 = vmatpush1.bf16.msra.mxu1 %v1862_v23 }
 0x23c   :  { %1164 = vmatprep.subr.bf16.mxu0 %v1832_v18  ;;  %1205 = vmatprep.subr.bf16.mxu1 %v1868_v24  ;;  %v1461_v18 = vld [vmem:[%s2115_s0 + $0x50] sm:$0xff] }
 0x23f   :  { %1165 = vmatpush1.bf16.msra.mxu0 %v1850_v21  ;;  %1206 = vmatpush1.bf16.msra.mxu1 %v1886_v27 }
 0x240   :  { %1166 = vmatprep.subr.bf16.mxu0 %v1855_v22  ;;  %1207 = vmatprep.subr.bf16.mxu1 %v1892_v28 }
 0x243   :  { %1167 = vmatpush1.bf16.msra.mxu0 %v1874_v25  ;;  %1208 = vmatpush1.bf16.msra.mxu1 %v1905_v30 }
 0x244   :  { %1168 = vmatprep.subr.bf16.mxu0 %v1880_v26  ;;  %1209 = vmatprep.subr.bf16.mxu1 %v1911_v31 }
 0x247   :  { %1169 = vmatpush1.bf16.msra.mxu0 %v1898_v29  ;;  %1210 = vmatpush1.bf16.msra.mxu1 %v1918_v32 }
 0x248   :  { %1555 = vmatprep.subr.bf16.mxu0 %v1701_v45 }
 0x2fd   :  { %v876_v3 = vpop.f32.mrb[8].mxu0  ;;  %v917_v4 = vpop.f32.mrb[8].mxu1 }
 0x2fe   :  { %v924_v5 = vadd.f32 %v1459_v1, %v876_v3  ;;  %v878_v7 = vpop.f32.mrb[9].mxu0  ;;  %v919_v8 = vpop.f32.mrb[9].mxu1  ;;  %v926_v20 = vadd.f32 %v1461_v18, %v917_v4 }
 0x2ff   :  { %v925_v9 = vadd.f32 %v1460_v2, %v878_v7  ;;  %v880_v10 = vpop.f32.mrb[10].mxu0  ;;  %v921_v11 = vpop.f32.mrb[10].mxu1  ;;  %v927_v17 = vadd.f32 %v1462_v16, %v919_v8 }
 0x300   :  { %v1495_v12 = vmul.f32 -1.442695, %v924_v5  ;;  %v881_v13 = vpop.f32.mrb[11].mxu0  ;;  %v922_v14 = vpop.f32.mrb[11].mxu1 }
 0x301   :  { %v1496_v15 = vmul.f32 -1.442695, %v925_v9  ;;  %v1497_v19 = vmul.f32 -1.442695, %v927_v17  ;;  %v1537_v17 = vld [vmem:[%s2117_s3] ss:$0 sm:$0xff] }
 0x302   :  { %1667 = vpow2.f32 %v1495_v12 }
 0x303   :  { %1669 = vpow2.f32 %v1496_v15 }
 0x304   :  { %1671 = vpow2.f32 %v1497_v19 }
 0x305   :  { %1673 = vtanh.f32 %v926_v20 }
 0x30c   :  { %v1668_v21 = vpop.eup %1667 }
 0x30d   :  { %v1670_v22 = vpop.eup %1669  ;;  %v931_v23 = vadd.f32 1.0, %v1668_v21 }
 0x30e   :  { %v937_v24 = vadd.f32 1.0, %v1670_v22  ;;  %v1672_v25 = vpop.eup %1671 }
 0x30f   :  { %1675 = vrcp.f32 %v931_v23  ;;  %v1674_v26 = vpop.eup %1673  ;;  %v944_v30 = vadd.f32 1.0, %v1672_v25 }
 0x310   :  { %1677 = vrcp.f32 %v937_v24 }
 0x311   :  { %1679 = vrcp.f32 %v944_v30 }
 0x319   :  { %v1676_v27 = vpop.eup %1675 }
 0x31a   :  { %v1678_v28 = vpop.eup %1677  ;;  %v949_v29 = vmul.f32 %v1676_v27, %v1674_v26 }
 0x31b   :  { %v948_v31 = vmul.f32 %v1678_v28, %v2020_v36  ;;  %v1680_v33 = vpop.eup %1679 }
 0x31d   :  { %v2068_v32 = vadd.f32 %v949_v29, %v948_v31 }
 0x31f   :  { %1681 = vtanh.f32 %v2068_v32 }
 0x329   :  { %v1682_v41 = vpop.eup %1681 }
 0x32a   :  { %v953_v42 = vmul.f32 %v1682_v41, %v1680_v33 }
 0x32c   :  { %v961_v43 = vpack.c.bf16 %v953_v42, %v953_v42 }
 0x32e   :  { %1187 = vmatmul.mubr.bf16.vlgmr.msra.gmra.mrb[12].mxu0 %v961_v43  ;;  %1228 = vmatmul.mubr.bf16.vlgmr.msra.gmra.mrb[12].mxu1 %v961_v43 }
 0x32f   :  { %1556 = vmatpush3.bf16.msra.mxu0 %v1627_v44  ;;  %1571 = vmatprep.mubr.msk.bf16.mxu0 %vm1702_vm0, %v1701_v45 }
 0x330   :  { %1557 = vmatprep.subr.bf16.mxu0 %v1701_v45 }
 0x333   :  { %1558 = vmatpush3.bf16.msra.mxu0 %v1628_v46 }
 0x334   :  { %1559 = vmatprep.subr.bf16.mxu0 %v1701_v45 }
 0x337   :  { %1560 = vmatpush3.bf16.msra.mxu0 %v1629_v47 }
 0x338   :  { %1561 = vmatprep.subr.bf16.mxu0 %v1701_v45 }
 0x33b   :  { %1562 = vmatpush3.bf16.msra.mxu0 %v1630_v48 }
 0x33c   :  { %1563 = vmatprep.subr.bf16.mxu0 %v1701_v45 }
 0x33f   :  { %1564 = vmatpush3.bf16.msra.mxu0 %v1631_v0 }
 0x340   :  { %1565 = vmatprep.subr.bf16.mxu0 %v1701_v45 }
 0x343   :  { %1566 = vmatpush3.bf16.msra.mxu0 %v1632_v49 }
 0x344   :  { %1567 = vmatprep.subr.bf16.mxu0 %v1701_v45 }
 0x347   :  { %1568 = vmatpush3.bf16.msra.mxu0 %v1633_v6 }
 0x348   :  { %1569 = vmatprep.subr.bf16.mxu0 %v1701_v45 }
 0x34b   :  { %1570 = vmatpush3.bf16.msra.mxu0 %v1634_v50 }
 0x401   :  { %v1188_v53 = vpop.f32.mrb[12].mxu0  ;;  %v1229_v54 = vpop.f32.mrb[12].mxu1 }
 0x402   :  { %v1236_v55 = vadd.f32 %v1498_v51, %v1188_v53  ;;  %v1190_v56 = vpop.f32.mrb[13].mxu0  ;;  %v1231_v57 = vpop.f32.mrb[13].mxu1  ;;  %v1238_v39 = vadd.f32 %v1500_v37, %v1229_v54 }
 0x403   :  { %v1237_v58 = vadd.f32 %v1499_v52, %v1190_v56  ;;  %v1192_v59 = vpop.f32.mrb[14].mxu0  ;;  %v1233_v60 = vpop.f32.mrb[14].mxu1  ;;  %v1239_v36 = vadd.f32 %v1501_v35, %v1231_v57 }
 0x404   :  { %v1534_v61 = vmul.f32 -1.442695, %v1236_v55  ;;  %v1193_v62 = vpop.f32.mrb[15].mxu0  ;;  %v1234_v63 = vpop.f32.mrb[15].mxu1 }
 0x405   :  { %v1535_v34 = vmul.f32 -1.442695, %v1237_v58  ;;  %v1536_v38 = vmul.f32 -1.442695, %v1239_v36 }
 0x406   :  { %1683 = vpow2.f32 %v1534_v61 }
 0x407   :  { %1685 = vpow2.f32 %v1535_v34 }
 0x408   :  { %1687 = vpow2.f32 %v1536_v38 }
 0x409   :  { %1689 = vtanh.f32 %v1238_v39 }
 0x410   :  { %v1684_v40 = vpop.eup %1683 }
 0x411   :  { %v1686_v1 = vpop.eup %1685  ;;  %v1243_v2 = vadd.f32 1.0, %v1684_v40 }
 0x412   :  { %v1249_v3 = vadd.f32 1.0, %v1686_v1  ;;  %v1688_v4 = vpop.eup %1687 }
 0x413   :  { %1691 = vrcp.f32 %v1243_v2  ;;  %v1690_v5 = vpop.eup %1689  ;;  %v1256_v10 = vadd.f32 1.0, %v1688_v4 }
 0x414   :  { %1693 = vrcp.f32 %v1249_v3 }
 0x415   :  { %1695 = vrcp.f32 %v1256_v10 }
 0x41d   :  { %v1692_v7 = vpop.eup %1691 }
 0x41e   :  { %v1694_v8 = vpop.eup %1693  ;;  %v1261_v9 = vmul.f32 %v1692_v7, %v1690_v5 }
 0x41f   :  { %v1260_v11 = vmul.f32 %v1694_v8, %v2068_v32  ;;  %v1696_v13 = vpop.eup %1695 }
 0x421   :  { %v1262_v12 = vadd.f32 %v1261_v9, %v1260_v11 }
 0x423   :  { %1697 = vtanh.f32 %v1262_v12 }
 0x42d   :  { %v1698_v14 = vpop.eup %1697 }
 0x42e   :  { %v1265_v15 = vmul.f32 %v1698_v14, %v1696_v13 }
 0x430   :  { %v1268_v16 = vpack.c.bf16 %v1265_v15, %v1265_v15 }
 0x432   :  { %1572 = vmatmul.mubr.bf16.vlgmr.msra.gmra.mrb[16].mxu0 %v1268_v16 }
 0x505   :  { %v1374_v18 = vpop.f32.mrb[16].mxu0 }
 0x506   :  { %v1375_v19 = vadd.f32 %v1537_v17, %v1374_v18  ;;  %v1573_v20 = vpop.f32.mrb[17].mxu0 }
 0x507   :  { %v1377_v21 = vpop.f32.mrb[18].mxu0 }
 0x508   :  { %1380 = vst [vmem:[%s2118_s4] sm:$0xff] %v1375_v19  ;;  %v1574_v22 = vpop.f32.mrb[19].mxu0 }

// kernel: cnnlstm_forward.2
= control target key start
LH: loop header
LB: loop body
LE: loop exit
PB: predicated region body
PF: predicated region fallthrough
CT: control target
= control target key end

     0   :  { %s8435_s21 = smov 0   ;;  %s10801_s0 = inlined_call_operand.vmem [shape: f32[8,30,10,8], index: 0, kind: input, shape index: {}]   ;;  %s10802_s1 = inlined_call_operand.vmem [shape: f32[9,8,8], index: 1, kind: input, shape index: {}]   ;;  %s10803_s2 = inlined_call_operand.vmem [shape: f32[1,8], index: 2, kind: input, shape index: {}]   ;;  %s10804_s3 = inlined_call_operand.vmem [shape: f32[1,8], index: 3, kind: input, shape index: {}]   ;;  %s10805_s4 = inlined_call_operand.vmem [shape: bf16[8,192,512], index: 4, kind: input, shape index: {}]   ;;  %s10806_s5 = inlined_call_operand.vmem [shape: f32[1,512], index: 5, kind: input, shape index: {}]   ;;  %s10807_s6 = inlined_call_operand.vmem [shape: f32[8,1,512], index: 6, kind: output, shape index: {}]  }
   0x1 LB: > { %s6053_s22 = sadd.s32 4294967295, %s8397_s21   ;;  %p6057_p0 = scmp.ge.s32.totalorder %s8397_s21, 1  ;;  %s8397_s21 = sphi %s8435_s21, %s16_s21  }
   0x2   : > { %p212_p1 = scmp.lt.s32.totalorder %s8397_s21, 9 }
   0x4   : > { %p213_p2 = pnand %p6057_p0, %p212_p1 }
   0x6   : > { %216 = sbr.rel (%p213_p2) target bundleno = 1543 (0x607), region = 44 }
   0xd   : > { %v6060_v0 = vld [vmem:[%s10802_s1 + $0x8] sm:$0xff]  ;;  %p241_p3 = scmp.lt.s32.totalorder %s6053_s22, 7  ;;  %v311_v1 = vld [vmem:[%s10802_s1] sm:$0xff]  ;;  %vm360_vm0 = vcmask 1046528   ;;  %vm435_vm1 = vcmask 64512   ;;  %v8485_v13 = vld [vmem:[%s10802_s1 + $0x10] sm:$0xff] }
   0xe   : > { %7249 = vmatprep.subr.mxu0 %v6060_v0  ;;  %vm902_vm2 = vcmask 1045504   ;;  %vm3025_vm3 = vcmask 523264  }
   0xf   : > { %7250 = vmatpush3.msra.mxu0 %v6060_v0  ;;  %s10858_s22 = smov (!%p241_p3, %s6053_s22), 7 }
  0x10   : > { %7287 = vmatprep.subr.mxu0 %v311_v1  ;;  %s7783_s27 = smul.u32 480, %s10858_s22 }
  0x12   : > { %s8455_s30 = scalar_lea.vmem %s10801_s0, %s7783_s27  ;;  %s6059_s27 = sshll.u32 %s10858_s22, 2 }
  0x13   : > { %v8458_v2 = vld [vmem:[%s8455_s30] sm:$0xff]  ;;  %v8461_v3 = vld [vmem:[%s8455_s30 + $0x8] sm:$0x3]  ;;  %v8464_v4 = vld [vmem:[%s8455_s30 + $0x10] sm:$0xff] }
  0x14   : > { %v361_v5 = vrot.slane %v8458_v2, 1  ;;  %v362_v6 = vrot.slane %v8461_v3, 1  ;;  %v8469_v7 = vld [vmem:[%s8455_s30 + $0x18] sm:$0x3]  ;;  %v364_v8 = vrot.slane %v8464_v4, 1  ;;  %v8474_v10 = vld [vmem:[%s8455_s30 + $0x20] sm:$0xff] }
  0x15   : > { %v365_v9 = vrot.slane %v8469_v7, 1  ;;  %v8477_v11 = vld [vmem:[%s8455_s30 + $0x28] sm:$0x3]  ;;  %v8480_v12 = vld [vmem:[%s8455_s30 + $0x30] sm:$0xff]  ;;  %v367_v15 = vrot.slane %v8474_v10, 1  ;;  %v8495_v19 = vld [vmem:[%s8455_s30 + $0x40] sm:$0xff] }
  0x16   : > { %v363_v14 = vsel %vm360_vm0, %v361_v5, %v362_v6  ;;  %v368_v16 = vrot.slane %v8477_v11, 1  ;;  %v8491_v17 = vld [vmem:[%s8455_s30 + $0x38] sm:$0x3]  ;;  %v370_v18 = vrot.slane %v8480_v12, 1  ;;  %v8503_v22 = vld [vmem:[%s8455_s30 + $0x48] sm:$0x3] }
  0x17   : > { %7251 = vmatprep.mubr.msk.f32.mxu0 %vm435_vm1, %v363_v14  ;;  %v8499_v20 = vsel %vm360_vm0, %v364_v8, %v365_v9  ;;  %v371_v21 = vrot.slane %v8491_v17, 1  ;;  %v373_v23 = vrot.slane %v8495_v19, 1  ;;  %v8507_v24 = vld [vmem:[%s8455_s30 + $0x50] sm:$0xff]  ;;  %v8510_v25 = vld [vmem:[%s8455_s30 + $0x60] sm:$0xff]  ;;  %v374_v27 = vrot.slane %v8503_v22, 1 }
  0x18   : > { %7252 = vmatmul.mubr.msk.f32.vlgmr.msra.gmra.mrb[0].mxu0 %vm435_vm1, %v8499_v20  ;;  %v8515_v26 = vsel %vm360_vm0, %v367_v15, %v368_v16  ;;  %v8519_v28 = vld [vmem:[%s8455_s30 + $0x58] sm:$0x3]  ;;  %v8522_v29 = vld [vmem:[%s8455_s30 + $0x68] sm:$0x3]  ;;  %v376_v31 = vrot.slane %v8507_v24, 1  ;;  %v379_v34 = vrot.slane %v8510_v25, 1 }
  0x19   : > { %7288 = vmatpush3.msra.mxu0 %v311_v1  ;;  %7254 = vmatprep.mubr.msk.f32.mxu0 %vm435_vm1, %v8515_v26  ;;  %v8527_v30 = vsel %vm360_vm0, %v370_v18, %v371_v21  ;;  %v377_v32 = vrot.slane %v8519_v28, 1  ;;  %v8532_v33 = vsel %vm360_vm0, %v373_v23, %v374_v27  ;;  %v380_v35 = vrot.slane %v8522_v29, 1  ;;  %v8537_v36 = vld [vmem:[%s8455_s30 + $0x70] sm:$0xff]  ;;  %v8540_v37 = vld [vmem:[%s8455_s30 + $0x78] sm:$0x3]  ;;  %v8544_v38 = vld [vmem:[%s8455_s30 + $0xa0] sm:$0xff] }
  0x1a   : > { %7325 = vmatprep.subr.mxu0 %v8485_v13  ;;  %v8547_v39 = vld [vmem:[%s8455_s30 + $0xa8] sm:$0x3]  ;;  %v382_v41 = vrot.slane %v8537_v36, 1  ;;  %v383_v42 = vrot.slane %v8540_v37, 1  ;;  %v385_v44 = vrot.slane %v8544_v38, 1  ;;  %v8564_v46 = vld [vmem:[%s8455_s30 + $0xb0] sm:$0xff] }
  0x1b   : > { %v8554_v40 = vsel %vm360_vm0, %v376_v31, %v377_v32  ;;  %v8559_v43 = vsel %vm360_vm0, %v379_v34, %v380_v35  ;;  %v386_v45 = vrot.slane %v8547_v39, 1  ;;  %v8567_v47 = vld [vmem:[%s8455_s30 + $0xb8] sm:$0x3]  ;;  %v8570_v48 = vld [vmem:[%s8455_s30 + $0xc0] sm:$0xff]  ;;  %v8573_v49 = vld [vmem:[%s8455_s30 + $0xc8] sm:$0x3] }
  0x1c   : > { %7255 = vmatmul.mubr.msk.f32.gmra.mrb[2].mxu0 %vm435_vm1, %v8527_v30  ;;  %10830 = vst [vmem:[#allocation2_spill] sm:$0xff] %v8554_v40  ;;  %10831 = vst [vmem:[#allocation3_spill] sm:$0xff] %v8559_v43  ;;  %v8580_v50 = vsel %vm360_vm0, %v382_v41, %v383_v42  ;;  %v388_v51 = vrot.slane %v8564_v46, 1  ;;  %v389_v52 = vrot.slane %v8567_v47, 1  ;;  %v391_v54 = vrot.slane %v8570_v48, 1  ;;  %v8588_v56 = vld [vmem:[%s8455_s30 + $0xd0] sm:$0xff] }
  0x1d   : > { %7257 = vmatprep.mubr.msk.f32.mxu0 %vm435_vm1, %v8532_v33  ;;  %10832 = vst [vmem:[#allocation4_spill] sm:$0xff] %v8580_v50  ;;  %v387_v53 = vsel %vm360_vm0, %v385_v44, %v386_v45  ;;  %v392_v55 = vrot.slane %v8573_v49, 1  ;;  %v8591_v57 = vld [vmem:[%s8455_s30 + $0xd8] sm:$0x3]  ;;  %v8594_v58 = vld [vmem:[%s8455_s30 + $0xe0] sm:$0xff]  ;;  %v904_v60 = vrot.slane %v8461_v3, 2 }
  0x1e   : > { %v8597_v59 = vld [vmem:[%s8455_s30 + $0xe8] sm:$0x3]  ;;  %v8604_v61 = vsel %vm360_vm0, %v388_v51, %v389_v52  ;;  %v394_v62 = vrot.slane %v8588_v56, 1  ;;  %v395_v63 = vrot.slane %v8591_v57, 1  ;;  %v397_v1 = vrot.slane %v8594_v58, 1  ;;  %v8614_v3 = vld [vmem:[%s8455_s30 + $0xf0] sm:$0xff] }
  0x1f   : > { %10833 = vst [vmem:[#allocation5_spill] sm:$0xff] %v8604_v61  ;;  %v8609_v0 = vsel %vm360_vm0, %v391_v54, %v392_v55  ;;  %v398_v5 = vrot.slane %v8597_v59, 1  ;;  %v8617_v6 = vld [vmem:[%s8455_s30 + $0xf8] sm:$0x3]  ;;  %v8620_v8 = vld [vmem:[%s8455_s30 + $0x100] sm:$0xff]  ;;  %v903_v14 = vrot.slane %v8458_v2, 2 }
  0x20   : > { %7258 = vmatmul.mubr.msk.f32.gmra.mrb[4].mxu0 %vm435_vm1, %v8554_v40  ;;  %10834 = vst [vmem:[#allocation6_spill] sm:$0xff] %v8609_v0  ;;  %v8623_v9 = vld [vmem:[%s8455_s30 + $0x108] sm:$0x3]  ;;  %v8629_v15 = vld [vmem:[%s8455_s30 + $0x110] sm:$0xff]  ;;  %v8632_v16 = vld [vmem:[%s8455_s30 + $0x118] sm:$0x3]  ;;  %v8637_v18 = vsel %vm360_vm0, %v394_v62, %v395_v63 }
  0x21   : > { %7260 = vmatprep.mubr.msk.f32.mxu0 %vm435_vm1, %v8559_v43  ;;  %10835 = vst [vmem:[#allocation7_spill] sm:$0xff] %v8637_v18  ;;  %v400_v21 = vrot.slane %v8614_v3, 1  ;;  %v401_v23 = vrot.slane %v8617_v6, 1  ;;  %v8642_v27 = vld [vmem:[%s8455_s30 + $0x140] sm:$0xff]  ;;  %v8645_v31 = vld [vmem:[%s8455_s30 + $0x148] sm:$0x3]  ;;  %v8648_v32 = vsel %vm902_vm2, %v903_v14, %v904_v60  ;;  %v8651_v34 = vsel %vm360_vm0, %v397_v1, %v398_v5 }
  0x22   : > { %10836 = vst [vmem:[#allocation8_spill] sm:$0xff] %v8651_v34  ;;  %v403_v35 = vrot.slane %v8620_v8, 1  ;;  %v404_v41 = vrot.slane %v8623_v9, 1  ;;  %v8658_v42 = vld [vmem:[%s8455_s30 + $0x150] sm:$0xff]  ;;  %v8661_v44 = vld [vmem:[%s8455_s30 + $0x158] sm:$0x3] }
  0x23   : > { %v8666_v45 = vsel %vm360_vm0, %v400_v21, %v401_v23  ;;  %v406_v51 = vrot.slane %v8629_v15, 1  ;;  %v407_v52 = vrot.slane %v8632_v16, 1  ;;  %v8674_v54 = vld [vmem:[%s8455_s30 + $0x168] sm:$0x3]  ;;  %v927_v55 = vrot.slane %v8544_v38, 2  ;;  %v8686_v5 = vld [vmem:[%s8455_s30 + $0x170] sm:$0xff] }
  0x24   : > { %7261 = vmatmul.mubr.msk.f32.gmra.mrb[6].mxu0 %vm435_vm1, %v8580_v50  ;;  %10837 = vst [vmem:[#allocation9_spill] sm:$0xff] %v8666_v45  ;;  %v8678_v60 = vsel %vm360_vm0, %v403_v35, %v404_v41  ;;  %v409_v62 = vrot.slane %v8642_v27, 1  ;;  %v410_v63 = vrot.slane %v8645_v31, 1  ;;  %v928_v1 = vrot.slane %v8547_v39, 2  ;;  %v8689_v14 = vld [vmem:[%s8455_s30 + $0x178] sm:$0x3] }
  0x25   : > { %7263 = vmatprep.mubr.msk.f32.mxu0 %vm435_vm1, %v387_v53  ;;  %v8671_v53 = vld [vmem:[%s8455_s30 + $0x160] sm:$0xff]  ;;  %10838 = vst [vmem:[#allocation10_spill] sm:$0xff] %v8678_v60  ;;  %v8697_v23 = vsel %vm360_vm0, %v406_v51, %v407_v52  ;;  %v412_v39 = vrot.slane %v8658_v42, 1  ;;  %v413_v35 = vrot.slane %v8661_v44, 1  ;;  %v8713_v51 = vld [vmem:[%s8455_s30 + $0x190] sm:$0xff] }
  0x26   : > { %v8692_v21 = vsel %vm902_vm2, %v927_v55, %v928_v1  ;;  %10839 = vst [vmem:[#allocation11_spill] sm:$0xff] %v8697_v23  ;;  %v8702_v41 = vld [vmem:[%s8455_s30 + $0x180] sm:$0xff]  ;;  %v415_v55 = vrot.slane %v8671_v53, 1  ;;  %v416_v1 = vrot.slane %v8674_v54, 1  ;;  %v8716_v52 = vld [vmem:[%s8455_s30 + $0x198] sm:$0x3] }
  0x28   : > { %7264 = vmatmul.mubr.msk.f32.gmra.mrb[8].mxu0 %vm435_vm1, %v8604_v61  ;;  %v8731_v61 = vsel %vm360_vm0, %v415_v55, %v416_v1  ;;  %v424_v55 = vrot.slane %v8713_v51, 1  ;;  %v425_v1 = vrot.slane %v8716_v52, 1 }
  0x29   : > { %7266 = vmatprep.mubr.msk.f32.mxu0 %vm435_vm1, %v8609_v0  ;;  %v8728_v0 = vld [vmem:[%s8455_s30 + $0x1a8] sm:$0x3]  ;;  %10841 = vst [vmem:[#allocation13_spill] sm:$0xff] %v8731_v61 }
  0x2c   : > { %7267 = vmatmul.mubr.msk.f32.gmra.mrb[10].mxu0 %vm435_vm1, %v8637_v18  ;;  %v8725_v18 = vld [vmem:[%s8455_s30 + $0x1a0] sm:$0xff] }
  0x2d   : > { %7269 = vmatprep.mubr.msk.f32.mxu0 %vm435_vm1, %v8651_v34  ;;  %v411_v34 = vsel %vm360_vm0, %v409_v62, %v410_v63  ;;  %v418_v62 = vrot.slane %v8686_v5, 1  ;;  %v419_v63 = vrot.slane %v8689_v14, 1  ;;  %v427_v40 = vrot.slane %v8725_v18, 1 }
  0x30   : > { %7270 = vmatmul.mubr.msk.f32.gmra.mrb[12].mxu0 %vm435_vm1, %v8666_v45  ;;  %v8705_v45 = vld [vmem:[%s8455_s30 + $0x188] sm:$0x3] }
  0x31   : > { %7272 = vmatprep.mubr.msk.f32.mxu0 %vm435_vm1, %v8678_v60  ;;  %v8720_v60 = vsel %vm360_vm0, %v412_v39, %v413_v35  ;;  %v422_v50 = vrot.slane %v8705_v45, 1  ;;  %v8741_v39 = vld [vmem:[%s8455_s30 + $0x1b8] sm:$0x3]  ;;  %v8746_v35 = vsel %vm360_vm0, %v418_v62, %v419_v63  ;;  %v8760_v62 = vsel %vm360_vm0, %v424_v55, %v425_v1 }
  0x32   : > { %10840 = vst [vmem:[#allocation12_spill] sm:$0xff] %v8720_v60  ;;  %v913_v55 = vrot.slane %v8491_v17, 2  ;;  %v916_v1 = vrot.slane %v8503_v22, 2  ;;  %v918_v17 = vrot.slane %v8507_v24, 2  ;;  %v922_v22 = vrot.slane %v8522_v29, 2 }
  0x33   : > { %v930_v29 = vrot.slane %v8564_v46, 2 }
  0x34   : > { %7273 = vmatmul.mubr.msk.f32.gmra.mrb[14].mxu0 %vm435_vm1, %v8697_v23  ;;  %v421_v23 = vrot.slane %v8702_v41, 1 }
  0x35   : > { %7275 = vmatprep.mubr.msk.f32.mxu0 %vm435_vm1, %v411_v34  ;;  %v8738_v34 = vld [vmem:[%s8455_s30 + $0x1b0] sm:$0xff] }
  0x36   : > { %v8751_v43 = vsel %vm360_vm0, %v421_v23, %v422_v50  ;;  %v430_v63 = vrot.slane %v8738_v34, 1 }
  0x38   : > { %7276 = vmatmul.mubr.msk.f32.gmra.mrb[16].mxu0 %vm435_vm1, %v8720_v60  ;;  %v428_v60 = vrot.slane %v8728_v0, 1 }
  0x39   : > { %7278 = vmatprep.mubr.msk.f32.mxu0 %vm435_vm1, %v8731_v61  ;;  %v431_v61 = vrot.slane %v8741_v39, 1 }
  0x3a   : > { %v8765_v50 = vsel %vm360_vm0, %v427_v40, %v428_v60  ;;  %v6134_v40 = vld [vmem:[%s10802_s1 + $0x18] sm:$0xff] }
  0x3b   : > { %v8772_v23 = vsel %vm360_vm0, %v430_v63, %v431_v61  ;;  %v910_v61 = vrot.slane %v8477_v11, 2  ;;  %v915_v11 = vrot.slane %v8495_v19, 2 }
  0x3c   : > { %7279 = vmatmul.mubr.msk.f32.gmra.mrb[18].mxu0 %vm435_vm1, %v8746_v35 }
  0x3d   : > { %7281 = vmatprep.mubr.msk.f32.mxu0 %vm435_vm1, %v8751_v43  ;;  %v8859_v63 = vsel %vm902_vm2, %v915_v11, %v916_v1 }
  0x40   : > { %7282 = vmatmul.mubr.msk.f32.gmra.mrb[20].mxu0 %vm435_vm1, %v8760_v62 }
  0x41   : > { %7284 = vmatprep.mubr.msk.f32.mxu0 %vm435_vm1, %v8765_v50 }
  0x44   : > { %7285 = vmatmul.mubr.msk.f32.gmra.mrb[22].mxu0 %vm435_vm1, %v8772_v23 }
  0x45   : > { %7289 = vmatprep.mubr.msk.f32.mxu0 %vm435_vm1, %v8458_v2  ;;  %v907_v2 = vrot.slane %v8469_v7, 2  ;;  %v912_v7 = vrot.slane %v8480_v12, 2 }
  0x48   : > { %7290 = vmatmul.mubr.msk.f32.vlgmr.msra.gmra.mrb[0].mxu0 %vm435_vm1, %v8464_v4 }
  0x49   : > { %7326 = vmatpush3.msra.mxu0 %v8485_v13  ;;  %7292 = vmatprep.mubr.msk.f32.mxu0 %vm435_vm1, %v8474_v10  ;;  %v906_v13 = vrot.slane %v8464_v4, 2  ;;  %v8842_v4 = vld [vmem:[%s10802_s1 + $0x20] sm:$0xff] }
  0x4a   : > { %7363 = vmatprep.subr.mxu0 %v6134_v40 }
  0x4b   : > { %v8835_v60 = vsel %vm902_vm2, %v906_v13, %v907_v2  ;;  %v931_v13 = vrot.slane %v8567_v47, 2  ;;  %v939_v47 = vrot.slane %v8594_v58, 2 }
  0x4c   : > { %7293 = vmatmul.mubr.msk.f32.gmra.mrb[2].mxu0 %vm435_vm1, %v8480_v12  ;;  %v8854_v12 = vsel %vm902_vm2, %v912_v7, %v913_v55  ;;  %v937_v7 = vrot.slane %v8591_v57, 2  ;;  %v943_v57 = vrot.slane %v8617_v6, 2  ;;  %v949_v6 = vrot.slane %v8632_v16, 2 }
  0x4d   : > { %7295 = vmatprep.mubr.msk.f32.mxu0 %vm435_vm1, %v8495_v19  ;;  %v921_v19 = vrot.slane %v8510_v25, 2  ;;  %v955_v16 = vrot.slane %v8661_v44, 2 }
  0x4f   : > { %v8874_v2 = vsel %vm902_vm2, %v921_v19, %v922_v22  ;;  %v960_v19 = vrot.slane %v8686_v5, 2  ;;  %v963_v22 = vrot.slane %v8702_v41, 2 }
  0x50   : > { %7296 = vmatmul.mubr.msk.f32.gmra.mrb[4].mxu0 %vm435_vm1, %v8507_v24  ;;  %v924_v24 = vrot.slane %v8537_v36, 2 }
  0x51   : > { %7298 = vmatprep.mubr.msk.f32.mxu0 %vm435_vm1, %v8510_v25 }
  0x54   : > { %7299 = vmatmul.mubr.msk.f32.gmra.mrb[6].mxu0 %vm435_vm1, %v8537_v36  ;;  %v933_v36 = vrot.slane %v8570_v48, 2 }
  0x55   : > { %7301 = vmatprep.mubr.msk.f32.mxu0 %vm435_vm1, %v8544_v38  ;;  %v909_v38 = vrot.slane %v8474_v10, 2 }
  0x57   : > { %v8845_v10 = vsel %vm902_vm2, %v909_v38, %v910_v61  ;;  %v8892_v38 = vsel %vm902_vm2, %v930_v29, %v931_v13  ;;  %v936_v61 = vrot.slane %v8588_v56, 2  ;;  %v973_v29 = vrot.slane %v8741_v39, 2  ;;  %v6184_v39 = vld [vmem:[%s10802_s1 + $0x28] sm:$0xff] }
  0x58   : > { %7302 = vmatmul.mubr.msk.f32.gmra.mrb[8].mxu0 %vm435_vm1, %v8564_v46 }
  0x59   : > { %7304 = vmatprep.mubr.msk.f32.mxu0 %vm435_vm1, %v8570_v48  ;;  %v940_v48 = vrot.slane %v8597_v59, 2  ;;  %v946_v59 = vrot.slane %v8623_v9, 2  ;;  %v952_v9 = vrot.slane %v8645_v31, 2 }
  0x5c   : > { %7305 = vmatmul.mubr.msk.f32.gmra.mrb[10].mxu0 %vm435_vm1, %v8588_v56  ;;  %v942_v56 = vrot.slane %v8614_v3, 2 }
  0x5d   : > { %7307 = vmatprep.mubr.msk.f32.mxu0 %vm435_vm1, %v8594_v58  ;;  %v945_v58 = vrot.slane %v8620_v8, 2 }
  0x5e   : > { %v8920_v55 = vsel %vm902_vm2, %v942_v56, %v943_v57  ;;  %v9026_v56 = vld [vmem:[%s8455_s30 + $0x80] sm:$0xff]  ;;  %v8377_v57 = vld [vmem:[%s8455_s30 + $0xb0] sm:$0xff] }
  0x5f   : > { %v8925_v11 = vsel %vm902_vm2, %v945_v58, %v946_v59  ;;  %v9033_v58 = vld [vmem:[%s8455_s30 + $0xc0] sm:$0xff]  ;;  %v9038_v59 = vld [vmem:[%s8455_s30 + $0xd0] sm:$0xff] }
  0x60   : > { %7308 = vmatmul.mubr.msk.f32.gmra.mrb[12].mxu0 %vm435_vm1, %v8614_v3  ;;  %v948_v3 = vrot.slane %v8629_v15, 2 }
  0x61   : > { %7310 = vmatprep.mubr.msk.f32.mxu0 %vm435_vm1, %v8620_v8  ;;  %v951_v8 = vrot.slane %v8642_v27, 2 }
  0x62   : > { %v8934_v1 = vsel %vm902_vm2, %v948_v3, %v949_v6  ;;  %v9043_v3 = vld [vmem:[%s8455_s30 + $0xe0] sm:$0xff]  ;;  %v9048_v6 = vld [vmem:[%s8455_s30 + $0xf0] sm:$0xff] }
  0x64   : > { %7311 = vmatmul.mubr.msk.f32.gmra.mrb[14].mxu0 %vm435_vm1, %v8629_v15  ;;  %v954_v15 = vrot.slane %v8658_v42, 2 }
  0x65   : > { %7313 = vmatprep.mubr.msk.f32.mxu0 %vm435_vm1, %v8642_v27  ;;  %v958_v27 = vrot.slane %v8674_v54, 2 }
  0x66   : > { %v8945_v31 = vsel %vm902_vm2, %v954_v15, %v955_v16  ;;  %v9063_v15 = vld [vmem:[%s8455_s30 + $0x120] sm:$0xff]  ;;  %v8384_v16 = vld [vmem:[%s8455_s30 + $0x150] sm:$0xff] }
  0x68   : > { %7314 = vmatmul.mubr.msk.f32.gmra.mrb[16].mxu0 %vm435_vm1, %v8658_v42  ;;  %v961_v42 = vrot.slane %v8689_v14, 2  ;;  %v967_v14 = vrot.slane %v8716_v52, 2  ;;  %v972_v52 = vrot.slane %v8738_v34, 2 }
  0x69   : > { %7316 = vmatprep.mubr.msk.f32.mxu0 %vm435_vm1, %v8671_v53 }
  0x6a   : > { %v8959_v54 = vsel %vm902_vm2, %v960_v19, %v961_v42  ;;  %v9091_v19 = vld [vmem:[%s8455_s30 + $0x1c0] sm:$0xff]  ;;  %v6209_v42 = vld [vmem:[%s10802_s1 + $0x30] sm:$0xff] }
  0x6c   : > { %7317 = vmatmul.mubr.msk.f32.gmra.mrb[18].mxu0 %vm435_vm1, %v8686_v5  ;;  %v966_v5 = vrot.slane %v8713_v51, 2 }
  0x6d   : > { %7319 = vmatprep.mubr.msk.f32.mxu0 %vm435_vm1, %v8702_v41  ;;  %v970_v41 = vrot.slane %v8728_v0, 2  ;;  %v8985_v0 = vsel %vm902_vm2, %v972_v52, %v973_v29  ;;  %v288_v52 = vld [vmem:[%s8455_s30 + $0x128] sm:$0x3]  ;;  %v10848_v29 = vld [vmem:[#allocation8_spill] sm:$0xff] }
  0x70   : > { %7320 = vmatmul.mubr.msk.f32.gmra.mrb[20].mxu0 %vm435_vm1, %v8713_v51 }
  0x71   : > { %7322 = vmatprep.mubr.msk.f32.mxu0 %vm435_vm1, %v8725_v18 }
  0x74   : > { %7323 = vmatmul.mubr.msk.f32.gmra.mrb[22].mxu0 %vm435_vm1, %v8738_v34 }
  0x75   : > { %7327 = vmatprep.mubr.msk.f32.mxu0 %vm435_vm1, %v8648_v32  ;;  %v919_v32 = vrot.slane %v8519_v28, 2  ;;  %v925_v28 = vrot.slane %v8540_v37, 2  ;;  %v934_v37 = vrot.slane %v8573_v49, 2  ;;  %v8906_v49 = vsel %vm902_vm2, %v936_v61, %v937_v7  ;;  %v9001_v61 = vld [vmem:[%s8455_s30 + $0x30] sm:$0xff]  ;;  %v9006_v7 = vld [vmem:[%s8455_s30 + $0x40] sm:$0xff] }
  0x77   : > { %v8881_v25 = vsel %vm902_vm2, %v924_v24, %v925_v28  ;;  %v8897_v46 = vsel %vm902_vm2, %v933_v36, %v934_v37  ;;  %v8973_v28 = vsel %vm902_vm2, %v966_v5, %v967_v14  ;;  %v8370_v36 = vld [vmem:[%s8455_s30 + $0x10] sm:$0xff]  ;;  %v8995_v37 = vld [vmem:[%s8455_s30 + $0x20] sm:$0xff]  ;;  %v10845_v14 = vld [vmem:[#allocation5_spill] sm:$0xff] }
  0x78   : > { %7328 = vmatmul.mubr.msk.f32.vlgmr.msra.gmra.mrb[0].mxu0 %vm435_vm1, %v8835_v60 }
  0x79   : > { %7364 = vmatpush3.msra.mxu0 %v6134_v40  ;;  %7330 = vmatprep.mubr.msk.f32.mxu0 %vm435_vm1, %v8845_v10  ;;  %v8869_v40 = vsel %vm902_vm2, %v918_v17, %v919_v32  ;;  %v953_v17 = vsel %vm902_vm2, %v951_v8, %v952_v9  ;;  %v957_v32 = vrot.slane %v8671_v53, 2  ;;  %v964_v53 = vrot.slane %v8705_v45, 2  ;;  %v9053_v8 = vld [vmem:[%s8455_s30 + $0x100] sm:$0xff]  ;;  %v9058_v9 = vld [vmem:[%s8455_s30 + $0x110] sm:$0xff] }
  0x7a   : > { %7401 = vmatprep.subr.mxu0 %v8842_v4  ;;  %v969_v45 = vrot.slane %v8725_v18, 2 }
  0x7b   : > { %v8950_v44 = vsel %vm902_vm2, %v957_v32, %v958_v27  ;;  %v8964_v24 = vsel %vm902_vm2, %v963_v22, %v964_v53  ;;  %v9075_v32 = vld [vmem:[%s8455_s30 + $0x170] sm:$0xff]  ;;  %v9080_v27 = vld [vmem:[%s8455_s30 + $0x180] sm:$0xff]  ;;  %v10843_v22 = vld [vmem:[#allocation3_spill] sm:$0xff] }
  0x7c   : > { %7331 = vmatmul.mubr.msk.f32.gmra.mrb[2].mxu0 %vm435_vm1, %v8854_v12  ;;  %v8978_v13 = vsel %vm902_vm2, %v969_v45, %v970_v41  ;;  %v10844_v53 = vld [vmem:[#allocation4_spill] sm:$0xff]  ;;  %v10846_v45 = vld [vmem:[#allocation6_spill] sm:$0xff]  ;;  %v10847_v41 = vld [vmem:[#allocation7_spill] sm:$0xff] }
  0x7d   : > { %7333 = vmatprep.mubr.msk.f32.mxu0 %vm435_vm1, %v8859_v63 }
  0x80   : > { %7334 = vmatmul.mubr.msk.f32.gmra.mrb[4].mxu0 %vm435_vm1, %v8869_v40 }
  0x81   : > { %7336 = vmatprep.mubr.msk.f32.mxu0 %vm435_vm1, %v8874_v2 }
  0x84   : > { %7337 = vmatmul.mubr.msk.f32.gmra.mrb[6].mxu0 %vm435_vm1, %v8881_v25 }
  0x85   : > { %7339 = vmatprep.mubr.msk.f32.mxu0 %vm435_vm1, %v8692_v21  ;;  %v8911_v21 = vsel %vm902_vm2, %v939_v47, %v940_v48  ;;  %v9011_v47 = vld [vmem:[%s8455_s30 + $0x50] sm:$0xff] }
  0x86   : > { %v9021_v48 = vld [vmem:[%s8455_s30 + $0x70] sm:$0xff] }
  0x88   : > { %7340 = vmatmul.mubr.msk.f32.gmra.mrb[8].mxu0 %vm435_vm1, %v8892_v38 }
  0x89   : > { %7342 = vmatprep.mubr.msk.f32.mxu0 %vm435_vm1, %v8897_v46 }
  0x8c   : > { %7343 = vmatmul.mubr.msk.f32.gmra.mrb[10].mxu0 %vm435_vm1, %v8906_v49 }
  0x8d   : > { %7345 = vmatprep.mubr.msk.f32.mxu0 %vm435_vm1, %v8911_v21 }
  0x90   : > { %7346 = vmatmul.mubr.msk.f32.gmra.mrb[12].mxu0 %vm435_vm1, %v8920_v55 }
  0x91   : > { %7348 = vmatprep.mubr.msk.f32.mxu0 %vm435_vm1, %v8925_v11 }
  0x94   : > { %7349 = vmatmul.mubr.msk.f32.gmra.mrb[14].mxu0 %vm435_vm1, %v8934_v1 }
  0x95   : > { %7351 = vmatprep.mubr.msk.f32.mxu0 %vm435_vm1, %v953_v17  ;;  %v9070_v17 = vld [vmem:[%s8455_s30 + $0x160] sm:$0xff] }
  0x98   : > { %7352 = vmatmul.mubr.msk.f32.gmra.mrb[16].mxu0 %vm435_vm1, %v8945_v31 }
  0x99   : > { %7354 = vmatprep.mubr.msk.f32.mxu0 %vm435_vm1, %v8950_v44 }
  0x9c   : > { %7355 = vmatmul.mubr.msk.f32.gmra.mrb[18].mxu0 %vm435_vm1, %v8959_v54 }
  0x9d   : > { %7357 = vmatprep.mubr.msk.f32.mxu0 %vm435_vm1, %v8964_v24 }
  0xa0   : > { %7358 = vmatmul.mubr.msk.f32.gmra.mrb[20].mxu0 %vm435_vm1, %v8973_v28 }
  0xa1   : > { %7360 = vmatprep.mubr.msk.f32.mxu0 %vm435_vm1, %v8978_v13 }
  0xa4   : > { %7361 = vmatmul.mubr.msk.f32.gmra.mrb[22].mxu0 %vm435_vm1, %v8985_v0 }
  0xa5   : > { %7365 = vmatprep.mubr.msk.f32.mxu0 %vm435_vm1, %v8370_v36  ;;  %v1460_v36 = vrot.slane %v9063_v15, 1 }
  0xa8   : > { %7366 = vmatmul.mubr.msk.f32.vlgmr.msra.gmra.mrb[0].mxu0 %vm435_vm1, %v8995_v37 }
  0xa9   : > { %7402 = vmatpush3.msra.mxu0 %v8842_v4  ;;  %7368 = vmatprep.mubr.msk.f32.mxu0 %vm435_vm1, %v9001_v61  ;;  %v9016_v4 = vld [vmem:[%s8455_s30 + $0x60] sm:$0xff] }
  0xaa   : > { %7439 = vmatprep.subr.mxu0 %v6184_v39 }
  0xac   : > { %7369 = vmatmul.mubr.msk.f32.gmra.mrb[2].mxu0 %vm435_vm1, %v9006_v7 }
  0xad   : > { %7371 = vmatprep.mubr.msk.f32.mxu0 %vm435_vm1, %v9011_v47 }
  0xb0   : > { %7372 = vmatmul.mubr.msk.f32.gmra.mrb[4].mxu0 %vm435_vm1, %v9016_v4 }
  0xb1   : > { %7374 = vmatprep.mubr.msk.f32.mxu0 %vm435_vm1, %v9021_v48 }
  0xb4   : > { %7375 = vmatmul.mubr.msk.f32.gmra.mrb[6].mxu0 %vm435_vm1, %v9026_v56 }
  0xb5   : > { %7377 = vmatprep.mubr.msk.f32.mxu0 %vm435_vm1, %v8377_v57  ;;  %v1461_v57 = vrot.slane %v288_v52, 1 }
  0xb8   : > { %7378 = vmatmul.mubr.msk.f32.gmra.mrb[8].mxu0 %vm435_vm1, %v9033_v58 }
  0xb9   : > { %7380 = vmatprep.mubr.msk.f32.mxu0 %vm435_vm1, %v9038_v59 }
  0xbc   : > { %7381 = vmatmul.mubr.msk.f32.gmra.mrb[10].mxu0 %vm435_vm1, %v9043_v3 }
  0xbd   : > { %7383 = vmatprep.mubr.msk.f32.mxu0 %vm435_vm1, %v9048_v6 }
  0xc0   : > { %7384 = vmatmul.mubr.msk.f32.gmra.mrb[12].mxu0 %vm435_vm1, %v9053_v8 }
  0xc1   : > { %7386 = vmatprep.mubr.msk.f32.mxu0 %vm435_vm1, %v9058_v9 }
  0xc4   : > { %7387 = vmatmul.mubr.msk.f32.gmra.mrb[14].mxu0 %vm435_vm1, %v9063_v15 }
  0xc5   : > { %7389 = vmatprep.mubr.msk.f32.mxu0 %vm435_vm1, %v8384_v16  ;;  %v10850_v16 = vld [vmem:[#allocation10_spill] sm:$0xff] }
  0xc8   : > { %7390 = vmatmul.mubr.msk.f32.gmra.mrb[16].mxu0 %vm435_vm1, %v9070_v17 }
  0xc9   : > { %7392 = vmatprep.mubr.msk.f32.mxu0 %vm435_vm1, %v9075_v32 }
  0xcc   : > { %7393 = vmatmul.mubr.msk.f32.gmra.mrb[18].mxu0 %vm435_vm1, %v9080_v27 }
  0xcd   : > { %7395 = vmatprep.mubr.msk.f32.mxu0 %vm435_vm1, %v8713_v51  ;;  %v1457_v51 = vrot.slane %v9026_v56, 1 }
  0xd0   : > { %7396 = vmatmul.mubr.msk.f32.gmra.mrb[20].mxu0 %vm435_vm1, %v8725_v18  ;;  %v268_v18 = vld [vmem:[%s8455_s30 + $0x88] sm:$0x3] }
  0xd1   : > { %7398 = vmatprep.mubr.msk.f32.mxu0 %vm435_vm1, %v8738_v34  ;;  %v1458_v34 = vrot.slane %v268_v18, 1 }
  0xd3   : > { %v9115_v5 = vsel %vm360_vm0, %v1457_v51, %v1458_v34  ;;  %v10851_v51 = vld [vmem:[#allocation11_spill] sm:$0xff]  ;;  %v9136_v34 = vsel %vm360_vm0, %v1460_v36, %v1461_v57 }
  0xd4   : > { %7399 = vmatmul.mubr.msk.f32.gmra.mrb[22].mxu0 %vm435_vm1, %v9091_v19 }
  0xd5   : > { %7403 = vmatprep.mubr.msk.f32.mxu0 %vm435_vm1, %v8499_v20  ;;  %v10842_v20 = vld [vmem:[#allocation2_spill] sm:$0xff] }
  0xd8   : > { %7404 = vmatmul.mubr.msk.f32.vlgmr.msra.gmra.mrb[0].mxu0 %vm435_vm1, %v8515_v26 }
  0xd9   : > { %7440 = vmatpush3.msra.mxu0 %v6184_v39  ;;  %7406 = vmatprep.mubr.msk.f32.mxu0 %vm435_vm1, %v8527_v30  ;;  %v10849_v39 = vld [vmem:[#allocation9_spill] sm:$0xff] }
  0xda   : > { %7477 = vmatprep.subr.mxu0 %v6209_v42 }
  0xdc   : > { %7407 = vmatmul.mubr.msk.f32.gmra.mrb[2].mxu0 %vm435_vm1, %v8532_v33 }
  0xdd   : > { %7409 = vmatprep.mubr.msk.f32.mxu0 %vm435_vm1, %v10842_v20 }
  0xe0   : > { %7410 = vmatmul.mubr.msk.f32.gmra.mrb[4].mxu0 %vm435_vm1, %v10843_v22 }
  0xe1   : > { %7412 = vmatprep.mubr.msk.f32.mxu0 %vm435_vm1, %v10844_v53 }
  0xe4   : > { %7413 = vmatmul.mubr.msk.f32.gmra.mrb[6].mxu0 %vm435_vm1, %v9115_v5 }
  0xe5   : > { %7415 = vmatprep.mubr.msk.f32.mxu0 %vm435_vm1, %v10845_v14  ;;  %v10852_v14 = vld [vmem:[#allocation12_spill] sm:$0xff] }
  0xe8   : > { %7416 = vmatmul.mubr.msk.f32.gmra.mrb[8].mxu0 %vm435_vm1, %v10846_v45 }
  0xe9   : > { %7418 = vmatprep.mubr.msk.f32.mxu0 %vm435_vm1, %v10847_v41 }
  0xec   : > { %7419 = vmatmul.mubr.msk.f32.gmra.mrb[10].mxu0 %vm435_vm1, %v10848_v29  ;;  %v10853_v29 = vld [vmem:[#allocation13_spill] sm:$0xff] }
  0xed   : > { %7421 = vmatprep.mubr.msk.f32.mxu0 %vm435_vm1, %v10849_v39  ;;  %v308_v39 = vld [vmem:[%s8455_s30 + $0x1c8] sm:$0x3] }
  0xee   : > { %v1464_v36 = vrot.slane %v308_v39, 1 }
  0xf0   : > { %7422 = vmatmul.mubr.msk.f32.gmra.mrb[12].mxu0 %vm435_vm1, %v10850_v16 }
  0xf1   : > { %7424 = vmatprep.mubr.msk.f32.mxu0 %vm435_vm1, %v10851_v51  ;;  %v1463_v51 = vrot.slane %v9091_v19, 1 }
  0xf3   : > { %v9157_v57 = vsel %vm360_vm0, %v1463_v51, %v1464_v36  ;;  %v1683_v51 = vrot.slane %v9026_v56, 2  ;;  %v1687_v36 = vrot.slane %v288_v52, 2  ;;  %v1689_v52 = vrot.slane %v9091_v19, 2 }
  0xf4   : > { %7425 = vmatmul.mubr.msk.f32.gmra.mrb[14].mxu0 %vm435_vm1, %v9136_v34 }
  0xf5   : > { %7427 = vmatprep.mubr.msk.f32.mxu0 %vm435_vm1, %v10852_v14  ;;  %v6234_v14 = vld [vmem:[%s10802_s1 + $0x38] sm:$0xff] }
  0xf8   : > { %7428 = vmatmul.mubr.msk.f32.gmra.mrb[16].mxu0 %vm435_vm1, %v10853_v29 }
  0xf9   : > { %7430 = vmatprep.mubr.msk.f32.mxu0 %vm435_vm1, %v8746_v35 }
  0xfc   : > { %7431 = vmatmul.mubr.msk.f32.gmra.mrb[18].mxu0 %vm435_vm1, %v8751_v43 }
  0xfd   : > { %7433 = vmatprep.mubr.msk.f32.mxu0 %vm435_vm1, %v8760_v62 }
 0x100   : > { %7434 = vmatmul.mubr.msk.f32.gmra.mrb[20].mxu0 %vm435_vm1, %v8765_v50 }
 0x101   : > { %7436 = vmatprep.mubr.msk.f32.mxu0 %vm435_vm1, %v8772_v23 }
 0x104   : > { %7437 = vmatmul.mubr.msk.f32.gmra.mrb[22].mxu0 %vm435_vm1, %v9157_v57 }
 0x105   : > { %7441 = vmatprep.mubr.msk.f32.mxu0 %vm435_vm1, %v8835_v60  ;;  %v1684_v60 = vrot.slane %v268_v18, 2  ;;  %v1686_v18 = vrot.slane %v9063_v15, 2 }
 0x108   : > { %7442 = vmatmul.mubr.msk.f32.vlgmr.msra.gmra.mrb[0].mxu0 %vm435_vm1, %v8845_v10 }
 0x109   : > { %7478 = vmatpush3.msra.mxu0 %v6209_v42  ;;  %7444 = vmatprep.mubr.msk.f32.mxu0 %vm435_vm1, %v8854_v12  ;;  %v9180_v42 = vsel %vm902_vm2, %v1683_v51, %v1684_v60  ;;  %v1690_v51 = vrot.slane %v308_v39, 2  ;;  %v6259_v60 = vld [vmem:[%s10802_s1 + $0x40] sm:$0xff]  ;;  %v7829_v39 = vld [vmem:[%s10805_s4 + $0x6ac] ss:$16 sps:$4 sm:$0xff]  }
 0x10a   : > { %7515 = vmatprep.subr.mxu0 %v6234_v14 }
 0x10c   : > { %7445 = vmatmul.mubr.msk.f32.gmra.mrb[2].mxu0 %vm435_vm1, %v8859_v63 }
 0x10d   : > { %7447 = vmatprep.mubr.msk.f32.mxu0 %vm435_vm1, %v8869_v40 }
 0x110   : > { %7448 = vmatmul.mubr.msk.f32.gmra.mrb[4].mxu0 %vm435_vm1, %v8874_v2 }
 0x111   : > { %7450 = vmatprep.mubr.msk.f32.mxu0 %vm435_vm1, %v8881_v25 }
 0x114   : > { %7451 = vmatmul.mubr.msk.f32.gmra.mrb[6].mxu0 %vm435_vm1, %v9180_v42 }
 0x115   : > { %7453 = vmatprep.mubr.msk.f32.mxu0 %vm435_vm1, %v8892_v38  ;;  %v9200_v38 = vsel %vm902_vm2, %v1686_v18, %v1687_v36  ;;  %v7833_v18 = vld [vmem:[%s10805_s4 + $0x6c8] ss:$16 sps:$4 sm:$0xff]   ;;  %v7836_v36 = vld [vmem:[%s10805_s4 + $0xe4] ss:$16 sps:$4 sm:$0xff]  }
 0x118   : > { %7454 = vmatmul.mubr.msk.f32.gmra.mrb[8].mxu0 %vm435_vm1, %v8897_v46 }
 0x119   : > { %7456 = vmatprep.mubr.msk.f32.mxu0 %vm435_vm1, %v8906_v49 }
 0x11c   : > { %7457 = vmatmul.mubr.msk.f32.gmra.mrb[10].mxu0 %vm435_vm1, %v8911_v21 }
 0x11d   : > { %7459 = vmatprep.mubr.msk.f32.mxu0 %vm435_vm1, %v8920_v55 }
 0x120   : > { %7460 = vmatmul.mubr.msk.f32.gmra.mrb[12].mxu0 %vm435_vm1, %v8925_v11 }
 0x121   : > { %7462 = vmatprep.mubr.msk.f32.mxu0 %vm435_vm1, %v8934_v1 }
 0x124   : > { %7463 = vmatmul.mubr.msk.f32.gmra.mrb[14].mxu0 %vm435_vm1, %v9200_v38 }
 0x125   : > { %7465 = vmatprep.mubr.msk.f32.mxu0 %vm435_vm1, %v8945_v31  ;;  %v9220_v31 = vsel %vm902_vm2, %v1689_v52, %v1690_v51  ;;  %v7838_v52 = vld [vmem:[%s10805_s4 + $0xe0] ss:$16 sps:$4 sm:$0xff]   ;;  %v7839_v51 = vld [vmem:[%s10805_s4 + $0x6e8] ss:$16 sps:$4 sm:$0xff]  }
 0x128   : > { %7466 = vmatmul.mubr.msk.f32.gmra.mrb[16].mxu0 %vm435_vm1, %v8950_v44 }
 0x129   : > { %7468 = vmatprep.mubr.msk.f32.mxu0 %vm435_vm1, %v8959_v54 }
 0x12c   : > { %7469 = vmatmul.mubr.msk.f32.gmra.mrb[18].mxu0 %vm435_vm1, %v8964_v24 }
 0x12d   : > { %7471 = vmatprep.mubr.msk.f32.mxu0 %vm435_vm1, %v8973_v28 }
 0x130   : > { %7472 = vmatmul.mubr.msk.f32.gmra.mrb[20].mxu0 %vm435_vm1, %v8978_v13 }
 0x131   : > { %7474 = vmatprep.mubr.msk.f32.mxu0 %vm435_vm1, %v8985_v0 }
 0x134   : > { %7475 = vmatmul.mubr.msk.f32.gmra.mrb[22].mxu0 %vm435_vm1, %v9220_v31 }
 0x135   : > { %7479 = vmatprep.mubr.msk.f32.mxu0 %vm435_vm1, %v8995_v37  ;;  %v9242_v37 = vld [vmem:[%s8455_s30 + $0x90] sm:$0xff] }
 0x138   : > { %7480 = vmatmul.mubr.msk.f32.vlgmr.msra.gmra.mrb[0].mxu0 %vm435_vm1, %v9001_v61  ;;  %v9261_v61 = vld [vmem:[%s8455_s30 + $0x130] sm:$0xff] }
 0x139   : > { %7516 = vmatpush3.msra.mxu0 %v6234_v14  ;;  %7482 = vmatprep.mubr.msk.f32.mxu0 %vm435_vm1, %v9006_v7  ;;  %v8388_v7 = vld [vmem:[%s8455_s30 + $0x190] sm:$0xff]  ;;  %v7835_v14 = vld [vmem:[%s10805_s4 + $0x6cc] ss:$16 sps:$4 sm:$0xff]  }
 0x13a   : > { %7553 = vmatprep.subr.mxu0 %v6259_v60 }
 0x13c   : > { %7483 = vmatmul.mubr.msk.f32.gmra.mrb[2].mxu0 %vm435_vm1, %v9011_v47  ;;  %v8389_v47 = vld [vmem:[%s8455_s30 + $0x1a0] sm:$0xff] }
 0x13d   : > { %7485 = vmatprep.mubr.msk.f32.mxu0 %vm435_vm1, %v9016_v4  ;;  %v8390_v4 = vld [vmem:[%s8455_s30 + $0x1b0] sm:$0xff] }
 0x140   : > { %7486 = vmatmul.mubr.msk.f32.gmra.mrb[4].mxu0 %vm435_vm1, %v9021_v48  ;;  %v9280_v48 = vld [vmem:[%s8455_s30 + $0x1d0] sm:$0xff] }
 0x141   : > { %7488 = vmatprep.mubr.msk.f32.mxu0 %vm435_vm1, %v9026_v56  ;;  %v270_v56 = vld [vmem:[%s8455_s30 + $0x98] sm:$0x3] }
 0x144   : > { %7489 = vmatmul.mubr.msk.f32.gmra.mrb[6].mxu0 %vm435_vm1, %v9242_v37 }
 0x145   : > { %7491 = vmatprep.mubr.msk.f32.mxu0 %vm435_vm1, %v9033_v58  ;;  %v2132_v58 = vrot.slane %v9242_v37, 1 }
 0x148   : > { %7492 = vmatmul.mubr.msk.f32.gmra.mrb[8].mxu0 %vm435_vm1, %v9038_v59  ;;  %v2133_v59 = vrot.slane %v270_v56, 1 }
 0x149   : > { %7494 = vmatprep.mubr.msk.f32.mxu0 %vm435_vm1, %v9043_v3  ;;  %v10855_v3 = vld [vmem:[#allocation9_spill] sm:$0xff] }
 0x14c   : > { %7495 = vmatmul.mubr.msk.f32.gmra.mrb[10].mxu0 %vm435_vm1, %v9048_v6  ;;  %v2135_v6 = vrot.slane %v9261_v61, 1 }
 0x14d   : > { %7497 = vmatprep.mubr.msk.f32.mxu0 %vm435_vm1, %v9053_v8 }
 0x150   : > { %7498 = vmatmul.mubr.msk.f32.gmra.mrb[12].mxu0 %vm435_vm1, %v9058_v9  ;;  %v10856_v9 = vld [vmem:[#allocation11_spill] sm:$0xff] }
 0x151   : > { %7500 = vmatprep.mubr.msk.f32.mxu0 %vm435_vm1, %v9063_v15 }
 0x154   : > { %7501 = vmatmul.mubr.msk.f32.gmra.mrb[14].mxu0 %vm435_vm1, %v9261_v61 }
 0x155   : > { %7503 = vmatprep.mubr.msk.f32.mxu0 %vm435_vm1, %v9070_v17  ;;  %v310_v17 = vld [vmem:[%s8455_s30 + $0x1d8] sm:$0x3] }
 0x158   : > { %7504 = vmatmul.mubr.msk.f32.gmra.mrb[16].mxu0 %vm435_vm1, %v9075_v32  ;;  %v2138_v32 = vrot.slane %v9280_v48, 1 }
 0x159   : > { %7506 = vmatprep.mubr.msk.f32.mxu0 %vm435_vm1, %v9080_v27  ;;  %v2139_v27 = vrot.slane %v310_v17, 1 }
 0x15c   : > { %7507 = vmatmul.mubr.msk.f32.gmra.mrb[18].mxu0 %vm435_vm1, %v8388_v7  ;;  %v7848_v7 = vld [vmem:[%s10805_s4 + $0x124] ss:$16 sps:$4 sm:$0xff]  }
 0x15d   : > { %7509 = vmatprep.mubr.msk.f32.mxu0 %vm435_vm1, %v8389_v47  ;;  %v7853_v47 = vld [vmem:[%s10805_s4 + $0x72c] ss:$16 sps:$4 sm:$0xff]  }
 0x160   : > { %7510 = vmatmul.mubr.msk.f32.gmra.mrb[20].mxu0 %vm435_vm1, %v8390_v4  ;;  %v7850_v4 = vld [vmem:[%s10805_s4 + $0x120] ss:$16 sps:$4 sm:$0xff]  }
 0x161   : > { %7512 = vmatprep.mubr.msk.f32.mxu0 %vm435_vm1, %v9091_v19  ;;  %v7817_v19 = vld [vmem:[%s10805_s4 + $0x66c] ss:$16 sps:$4 sm:$0xff]  }
 0x164   : > { %7513 = vmatmul.mubr.msk.f32.gmra.mrb[22].mxu0 %vm435_vm1, %v9280_v48 }
 0x165   : > { %7517 = vmatprep.mubr.msk.f32.mxu0 %vm435_vm1, %v8515_v26  ;;  %v2134_v26 = vsel %vm360_vm0, %v2132_v58, %v2133_v59  ;;  %v7859_v58 = vld [vmem:[%s10805_s4 + $0x74c] ss:$16 sps:$4 sm:$0xff]   ;;  %v7856_v59 = vld [vmem:[%s10805_s4 + $0x140] ss:$16 sps:$4 sm:$0xff]  }
 0x168   : > { %7518 = vmatmul.mubr.msk.f32.vlgmr.msra.gmra.mrb[0].mxu0 %vm435_vm1, %v8527_v30  ;;  %v10854_v30 = vld [vmem:[#allocation8_spill] sm:$0xff] }
 0x169   : > { %7554 = vmatpush3.msra.mxu0 %v6259_v60  ;;  %7520 = vmatprep.mubr.msk.f32.mxu0 %vm435_vm1, %v8532_v33  ;;  %v290_v33 = vld [vmem:[%s8455_s30 + $0x138] sm:$0x3]  ;;  %v7847_v60 = vld [vmem:[%s10805_s4 + $0x70c] ss:$16 sps:$4 sm:$0xff]   ;;  %s249_s30 = scalar_lea.vmem %s10807_s6, %s6059_s27 }
 0x16a   : > { %v2136_v8 = vrot.slane %v290_v33, 1 }
 0x16c   : > { %7521 = vmatmul.mubr.msk.f32.gmra.mrb[2].mxu0 %vm435_vm1, %v10842_v20  ;;  %v2137_v15 = vsel %vm360_vm0, %v2135_v6, %v2136_v8  ;;  %v7814_v20 = vld [vmem:[%s10805_s4 + $0x60] ss:$16 sps:$4 sm:$0xff]  }
 0x16d   : > { %7523 = vmatprep.mubr.msk.f32.mxu0 %vm435_vm1, %v10843_v22  ;;  %v7815_v22 = vld [vmem:[%s10805_s4 + $0x668] ss:$16 sps:$4 sm:$0xff]  }
 0x170   : > { %7524 = vmatmul.mubr.msk.f32.gmra.mrb[4].mxu0 %vm435_vm1, %v10844_v53  ;;  %v7818_v53 = vld [vmem:[%s10805_s4 + $0x84] ss:$16 sps:$4 sm:$0xff]  }
 0x171   : > { %7526 = vmatprep.mubr.msk.f32.mxu0 %vm435_vm1, %v9115_v5  ;;  %v7823_v5 = vld [vmem:[%s10805_s4 + $0x68c] ss:$16 sps:$4 sm:$0xff]  }
 0x174   : > { %7527 = vmatmul.mubr.msk.f32.gmra.mrb[6].mxu0 %vm435_vm1, %v2134_v26  ;;  %v7857_v26 = vld [vmem:[%s10805_s4 + $0x748] ss:$16 sps:$4 sm:$0xff]  }
 0x175   : > { %7529 = vmatprep.mubr.msk.f32.mxu0 %vm435_vm1, %v10846_v45  ;;  %v7820_v45 = vld [vmem:[%s10805_s4 + $0x80] ss:$16 sps:$4 sm:$0xff]  }
 0x178   : > { %7530 = vmatmul.mubr.msk.f32.gmra.mrb[8].mxu0 %vm435_vm1, %v10847_v41  ;;  %v7821_v41 = vld [vmem:[%s10805_s4 + $0x688] ss:$16 sps:$4 sm:$0xff]  }
 0x179   : > { %7532 = vmatprep.mubr.msk.f32.mxu0 %vm435_vm1, %v10854_v30  ;;  %v7860_v30 = vld [vmem:[%s10805_s4 + $0x164] ss:$16 sps:$4 sm:$0xff]  }
 0x17c   : > { %7533 = vmatmul.mubr.msk.f32.gmra.mrb[10].mxu0 %vm435_vm1, %v10855_v3  ;;  %v9530_v3 = vld [vmem:[%s10803_s2] ss:$0 sm:$0xff] }
 0x17d   : > { %7535 = vmatprep.mubr.msk.f32.mxu0 %vm435_vm1, %v10850_v16  ;;  %v7826_v16 = vld [vmem:[%s10805_s4 + $0xa0] ss:$16 sps:$4 sm:$0xff]  }
 0x180   : > { %7536 = vmatmul.mubr.msk.f32.gmra.mrb[12].mxu0 %vm435_vm1, %v10856_v9  ;;  %v9535_v9 = vld [vmem:[%s10804_s3] ss:$0 sm:$0xff] }
 0x181   : > { %7538 = vmatprep.mubr.msk.f32.mxu0 %vm435_vm1, %v9136_v34  ;;  %v7827_v34 = vld [vmem:[%s10805_s4 + $0x6a8] ss:$16 sps:$4 sm:$0xff]  }
 0x184   : > { %7539 = vmatmul.mubr.msk.f32.gmra.mrb[14].mxu0 %vm435_vm1, %v2137_v15 }
 0x185   : > { %7541 = vmatprep.mubr.msk.f32.mxu0 %vm435_vm1, %v10853_v29  ;;  %v7824_v29 = vld [vmem:[%s10805_s4 + $0xa4] ss:$16 sps:$4 sm:$0xff]  }
 0x188   : > { %7542 = vmatmul.mubr.msk.f32.gmra.mrb[16].mxu0 %vm435_vm1, %v8746_v35  ;;  %v2140_v35 = vsel %vm360_vm0, %v2138_v32, %v2139_v27 }
 0x189   : > { %7544 = vmatprep.mubr.msk.f32.mxu0 %vm435_vm1, %v8751_v43  ;;  %v2358_v43 = vrot.slane %v9242_v37, 2  ;;  %v7844_v37 = vld [vmem:[%s10805_s4 + $0x100] ss:$16 sps:$4 sm:$0xff]  }
 0x18c   : > { %7545 = vmatmul.mubr.msk.f32.gmra.mrb[18].mxu0 %vm435_vm1, %v8760_v62  ;;  %v2359_v62 = vrot.slane %v270_v56, 2  ;;  %v7854_v56 = vld [vmem:[%s10805_s4 + $0x144] ss:$16 sps:$4 sm:$0xff]  }
 0x18d   : > { %7547 = vmatprep.mubr.msk.f32.mxu0 %vm435_vm1, %v8765_v50 }
 0x18e   : > { %v2360_v50 = vsel %vm902_vm2, %v2358_v43, %v2359_v62 }
 0x190   : > { %7548 = vmatmul.mubr.msk.f32.gmra.mrb[20].mxu0 %vm435_vm1, %v8772_v23  ;;  %v2361_v23 = vrot.slane %v9261_v61, 2  ;;  %v7845_v61 = vld [vmem:[%s10805_s4 + $0x708] ss:$16 sps:$4 sm:$0xff]  }
 0x191   : > { %7550 = vmatprep.mubr.msk.f32.mxu0 %vm435_vm1, %v9157_v57  ;;  %v7830_v57 = vld [vmem:[%s10805_s4 + $0xc4] ss:$16 sps:$4 sm:$0xff]  }
 0x194   : > { %7551 = vmatmul.mubr.msk.f32.gmra.mrb[22].mxu0 %vm435_vm1, %v2140_v35 }
 0x195   : > { %7555 = vmatprep.mubr.msk.f32.mxu0 %vm435_vm1, %v8845_v10  ;;  %v2362_v10 = vrot.slane %v290_v33, 2  ;;  %v7862_v33 = vld [vmem:[%s10805_s4 + $0x160] ss:$16 sps:$4 sm:$0xff]  }
 0x198   : > { %7556 = vmatmul.mubr.msk.f32.vlgmr.msra.gmra.mrb[0].mxu0 %vm435_vm1, %v8854_v12  ;;  %v2363_v12 = vsel %vm902_vm2, %v2361_v23, %v2362_v10 }
 0x199   : > { %7558 = vmatprep.mubr.msk.f32.mxu0 %vm435_vm1, %v8859_v63  ;;  %v2364_v63 = vrot.slane %v9280_v48, 2  ;;  %v7851_v48 = vld [vmem:[%s10805_s4 + $0x728] ss:$16 sps:$4 sm:$0xff]  }
 0x19c   : > { %7559 = vmatmul.mubr.msk.f32.gmra.mrb[2].mxu0 %vm435_vm1, %v8869_v40  ;;  %v2365_v40 = vrot.slane %v310_v17, 2 }
 0x19d   : > { %7561 = vmatprep.mubr.msk.f32.mxu0 %vm435_vm1, %v8874_v2 }
 0x19e   : > { %v2366_v2 = vsel %vm902_vm2, %v2364_v63, %v2365_v40 }
 0x1a0   : > { %7562 = vmatmul.mubr.msk.f32.gmra.mrb[4].mxu0 %vm435_vm1, %v8881_v25  ;;  %v7794_v25 = vld [vmem:[%s10805_s4 + $0x4] ss:$16 sps:$4 sm:$0xff]  }
 0x1a1   : > { %7564 = vmatprep.mubr.msk.f32.mxu0 %vm435_vm1, %v9180_v42  ;;  %3029 = vmatprep.subr.bf16.mxu1 %v7794_v25  ;;  %v7832_v42 = vld [vmem:[%s10805_s4 + $0xc0] ss:$16 sps:$4 sm:$0xff]  }
 0x1a4   : > { %7565 = vmatmul.mubr.msk.f32.gmra.mrb[6].mxu0 %vm435_vm1, %v2360_v50 }
 0x1a5   : > { %7567 = vmatprep.mubr.msk.f32.mxu0 %vm435_vm1, %v8897_v46  ;;  %v7796_v46 = vld [vmem:[%s10805_s4] ss:$16 sps:$4 sm:$0xff]  }
 0x1a6   : > { %3030 = vmatpush1.bf16.msra.mxu1 %v7796_v46 }
 0x1a8   : > { %7568 = vmatmul.mubr.msk.f32.gmra.mrb[8].mxu0 %vm435_vm1, %v8906_v49  ;;  %v7797_v49 = vld [vmem:[%s10805_s4 + $0x608] ss:$16 sps:$4 sm:$0xff]  }
 0x1a9   : > { %7570 = vmatprep.mubr.msk.f32.mxu0 %vm435_vm1, %v8911_v21  ;;  %v7799_v21 = vld [vmem:[%s10805_s4 + $0x60c] ss:$16 sps:$4 sm:$0xff]  }
 0x1aa   : > { %4703 = vmatprep.subr.bf16.mxu0 %v7799_v21 }
 0x1ab   : > { %4704 = vmatpush1.bf16.msra.mxu0 %v7797_v49 }
 0x1ac   : > { %7571 = vmatmul.mubr.msk.f32.gmra.mrb[10].mxu0 %vm435_vm1, %v8920_v55  ;;  %v7800_v55 = vld [vmem:[%s10805_s4 + $0x24] ss:$16 sps:$4 sm:$0xff]  }
 0x1ad   : > { %7573 = vmatprep.mubr.msk.f32.mxu0 %vm435_vm1, %v8925_v11  ;;  %v7805_v11 = vld [vmem:[%s10805_s4 + $0x62c] ss:$16 sps:$4 sm:$0xff]   ;;  %3031 = vmatprep.subr.bf16.mxu1 %v7800_v55 }
 0x1ae   : > { %4705 = vmatprep.subr.bf16.mxu0 %v7805_v11 }
 0x1b0   : > { %7574 = vmatmul.mubr.msk.f32.gmra.mrb[12].mxu0 %vm435_vm1, %v8934_v1  ;;  %v7802_v1 = vld [vmem:[%s10805_s4 + $0x20] ss:$16 sps:$4 sm:$0xff]  }
 0x1b1   : > { %7576 = vmatprep.mubr.msk.f32.mxu0 %vm435_vm1, %v9200_v38  ;;  %3032 = vmatpush1.bf16.msra.mxu1 %v7802_v1  ;;  %v7841_v38 = vld [vmem:[%s10805_s4 + $0x6ec] ss:$16 sps:$4 sm:$0xff]  }
 0x1b4   : > { %7577 = vmatmul.mubr.msk.f32.gmra.mrb[14].mxu0 %vm435_vm1, %v2363_v12 }
 0x1b5   : > { %7579 = vmatprep.mubr.msk.f32.mxu0 %vm435_vm1, %v8950_v44  ;;  %v7803_v44 = vld [vmem:[%s10805_s4 + $0x628] ss:$16 sps:$4 sm:$0xff]  }
 0x1b6   : > { %4706 = vmatpush1.bf16.msra.mxu0 %v7803_v44 }
 0x1b8   : > { %7580 = vmatmul.mubr.msk.f32.gmra.mrb[16].mxu0 %vm435_vm1, %v8959_v54  ;;  %v7806_v54 = vld [vmem:[%s10805_s4 + $0x44] ss:$16 sps:$4 sm:$0xff]  }
 0x1b9   : > { %7582 = vmatprep.mubr.msk.f32.mxu0 %vm435_vm1, %v8964_v24  ;;  %v7811_v24 = vld [vmem:[%s10805_s4 + $0x64c] ss:$16 sps:$4 sm:$0xff]   ;;  %3033 = vmatprep.subr.bf16.mxu1 %v7806_v54 }
 0x1ba   : > { %4707 = vmatprep.subr.bf16.mxu0 %v7811_v24 }
 0x1bc   : > { %7583 = vmatmul.mubr.msk.f32.gmra.mrb[18].mxu0 %vm435_vm1, %v8973_v28  ;;  %v7808_v28 = vld [vmem:[%s10805_s4 + $0x40] ss:$16 sps:$4 sm:$0xff]  }
 0x1bd   : > { %7585 = vmatprep.mubr.msk.f32.mxu0 %vm435_vm1, %v8978_v13  ;;  %v7809_v13 = vld [vmem:[%s10805_s4 + $0x648] ss:$16 sps:$4 sm:$0xff]   ;;  %3034 = vmatpush1.bf16.msra.mxu1 %v7808_v28 }
 0x1be   : > { %4708 = vmatpush1.bf16.msra.mxu0 %v7809_v13 }
 0x1bf   : > { %4709 = vmatprep.subr.bf16.mxu0 %v7817_v19 }
 0x1c0   : > { %7586 = vmatmul.mubr.msk.f32.gmra.mrb[20].mxu0 %vm435_vm1, %v8985_v0  ;;  %v7812_v0 = vld [vmem:[%s10805_s4 + $0x64] ss:$16 sps:$4 sm:$0xff]  }
 0x1c1   : > { %7588 = vmatprep.mubr.msk.f32.mxu0 %vm435_vm1, %v9220_v31  ;;  %3035 = vmatprep.subr.bf16.mxu1 %v7812_v0  ;;  %v7842_v31 = vld [vmem:[%s10805_s4 + $0x104] ss:$16 sps:$4 sm:$0xff]  }
 0x1c2   : > { %3036 = vmatpush1.bf16.msra.mxu1 %v7814_v20  ;;  %4710 = vmatpush1.bf16.msra.mxu0 %v7815_v22 }
 0x1c3   : > { %3037 = vmatprep.subr.bf16.mxu1 %v7818_v53  ;;  %4711 = vmatprep.subr.bf16.mxu0 %v7823_v5 }
 0x1c4   : > { %7589 = vmatmul.mubr.msk.f32.gmra.mrb[22].mxu0 %vm435_vm1, %v2366_v2 }
 0x1c6   : > { %3038 = vmatpush1.bf16.msra.mxu1 %v7820_v45  ;;  %4712 = vmatpush1.bf16.msra.mxu0 %v7821_v41 }
 0x1c7   : > { %3039 = vmatprep.subr.bf16.mxu1 %v7824_v29  ;;  %4713 = vmatprep.subr.bf16.mxu0 %v7829_v39 }
 0x1ca   : > { %3040 = vmatpush1.bf16.msra.mxu1 %v7826_v16  ;;  %4714 = vmatpush1.bf16.msra.mxu0 %v7827_v34 }
 0x1cb   : > { %3041 = vmatprep.subr.bf16.mxu1 %v7830_v57  ;;  %4715 = vmatprep.subr.bf16.mxu0 %v7835_v14 }
 0x1ce   : > { %3042 = vmatpush1.bf16.msra.mxu1 %v7832_v42  ;;  %4716 = vmatpush1.bf16.msra.mxu0 %v7833_v18 }
 0x1cf   : > { %3043 = vmatprep.subr.bf16.mxu1 %v7836_v36  ;;  %4717 = vmatprep.subr.bf16.mxu0 %v7841_v38 }
 0x1d2   : > { %3044 = vmatpush1.bf16.msra.mxu1 %v7838_v52  ;;  %4718 = vmatpush1.bf16.msra.mxu0 %v7839_v51 }
 0x1d3   : > { %3045 = vmatprep.subr.bf16.mxu1 %v7842_v31  ;;  %4719 = vmatprep.subr.bf16.mxu0 %v7847_v60 }
 0x1d6   : > { %3046 = vmatpush1.bf16.msra.mxu1 %v7844_v37  ;;  %4720 = vmatpush1.bf16.msra.mxu0 %v7845_v61 }
 0x1d7   : > { %3047 = vmatprep.subr.bf16.mxu1 %v7848_v7  ;;  %4721 = vmatprep.subr.bf16.mxu0 %v7853_v47 }
 0x1da   : > { %3048 = vmatpush1.bf16.msra.mxu1 %v7850_v4  ;;  %4722 = vmatpush1.bf16.msra.mxu0 %v7851_v48 }
 0x1db   : > { %3049 = vmatprep.subr.bf16.mxu1 %v7854_v56  ;;  %4723 = vmatprep.subr.bf16.mxu0 %v7859_v58  ;;  %v7865_v56 = vld [vmem:[%s10805_s4 + $0x76c] ss:$16 sps:$4 sm:$0xff]  }
 0x1de   : > { %3050 = vmatpush1.bf16.msra.mxu1 %v7856_v59  ;;  %4724 = vmatpush1.bf16.msra.mxu0 %v7857_v26  ;;  %v7863_v59 = vld [vmem:[%s10805_s4 + $0x768] ss:$16 sps:$4 sm:$0xff]  }
 0x1df   : > { %3051 = vmatprep.subr.bf16.mxu1 %v7860_v30  ;;  %4725 = vmatprep.subr.bf16.mxu0 %v7865_v56  ;;  %v7889_v56 = vld [vmem:[%s10805_s4 + $0x7ec] ss:$16 sps:$4 sm:$0xff]  }
 0x1e2   : > { %3052 = vmatpush1.bf16.msra.mxu1 %v7862_v33  ;;  %4726 = vmatpush1.bf16.msra.mxu0 %v7863_v59  ;;  %v7887_v59 = vld [vmem:[%s10805_s4 + $0x7e8] ss:$16 sps:$4 sm:$0xff]  }
 0x26b   : > { %v7557_v6 = vpop.f32.mrb[0].mxu0 }
 0x26c   : > { %v2441_v8 = vpop.f32.mrb[1].mxu0  ;;  %v2592_v15 = vmul.f32 %v7557_v6, %v9530_v3  ;;  %v7868_v6 = vld [vmem:[%s10805_s4 + $0xc] ss:$16 sps:$4 sm:$0xff]  }
 0x26d   : > { %v2591_v17 = vmul.f32 %v9530_v3, %v2441_v8  ;;  %3070 = vmatprep.subr.bf16.mxu1 %v7868_v6  ;;  %v7893_v6 = vld [vmem:[%s10805_s4 + $0x808] ss:$16 sps:$4 sm:$0xff]  }
 0x26e   : > { %v2623_v50 = vadd.f32 %v9535_v9, %v2592_v15 }
 0x26f   : > { %v7560_v32 = vpop.f32.mrb[2].mxu0  ;;  %v2622_v27 = vadd.f32 %v9535_v9, %v2591_v17 }
 0x270   : > { %v2451_v35 = vpop.f32.mrb[3].mxu0  ;;  %v2594_v12 = vmul.f32 %v7560_v32, %v9530_v3  ;;  %v2647_v63 = vmax.f32 %v2623_v50, 0.0 }
 0x271   : > { %v2593_v43 = vmul.f32 %v9530_v3, %v2451_v35  ;;  %v2646_v62 = vmax.f32 %v2622_v27, 0.0  ;;  %v7871_v35 = vld [vmem:[%s10805_s4 + $0x78c] ss:$16 sps:$4 sm:$0xff]  }
 0x272   : > { %v2625_v21 = vadd.f32 %v9535_v9, %v2594_v12  ;;  %5110 = vmatprep.subr.bf16.mxu0 %v7871_v35  ;;  %v7907_v35 = vld [vmem:[%s10805_s4 + $0x84c] ss:$16 sps:$4 sm:$0xff]  }
 0x273   : > { %2670 = vxpose.xlu1.b32.start [1/16] (narrow) %v2646_v62, 8  ;;  %v7563_v23 = vpop.f32.mrb[4].mxu0  ;;  %v2624_v40 = vadd.f32 %v9535_v9, %v2593_v43 }
 0x274   : > { %v2461_v10 = vpop.f32.mrb[5].mxu0  ;;  %v2596_v1 = vmul.f32 %v7563_v23, %v9530_v3  ;;  %v2649_v44 = vmax.f32 %v2625_v21, 0.0 }
 0x275   : > { %v2595_v46 = vmul.f32 %v9530_v3, %v2461_v10  ;;  %v2648_v49 = vmax.f32 %v2624_v40, 0.0 }
 0x276   : > { %v2627_v19 = vadd.f32 %v9535_v9, %v2596_v1 }
 0x277   : > { %2671 = vxpose.xlu1.b32.cont [2/16] (narrow) %v2647_v63, 8  ;;  %v7566_v2 = vpop.f32.mrb[6].mxu0  ;;  %v2626_v54 = vadd.f32 %v9535_v9, %v2595_v46 }
 0x278   : > { %v2471_v25 = vpop.f32.mrb[7].mxu0  ;;  %v2598_v53 = vmul.f32 %v7566_v2, %v9530_v3  ;;  %v2651_v5 = vmax.f32 %v2627_v19, 0.0 }
 0x279   : > { %v2597_v13 = vmul.f32 %v9530_v3, %v2471_v25  ;;  %v2650_v0 = vmax.f32 %v2626_v54, 0.0 }
 0x27a   : > { %v2629_v34 = vadd.f32 %v9535_v9, %v2598_v53 }
 0x27b   : > { %2672 = vxpose.xlu1.b32.cont [3/16] (narrow) %v2648_v49, 8  ;;  %v7569_v55 = vpop.f32.mrb[8].mxu0  ;;  %v2628_v45 = vadd.f32 %v9535_v9, %v2597_v13 }
 0x27c   : > { %v2481_v11 = vpop.f32.mrb[9].mxu0  ;;  %v2600_v14 = vmul.f32 %v7569_v55, %v9530_v3  ;;  %v2653_v38 = vmax.f32 %v2629_v34, 0.0 }
 0x27d   : > { %v2599_v39 = vmul.f32 %v9530_v3, %v2481_v11  ;;  %v2652_v16 = vmax.f32 %v2628_v45, 0.0 }
 0x27e   : > { %v2631_v61 = vadd.f32 %v9535_v9, %v2600_v14  ;;  %v7866_v14 = vld [vmem:[%s10805_s4 + $0x8] ss:$16 sps:$4 sm:$0xff]  }
 0x27f   : > { %2673 = vxpose.xlu1.b32.cont [4/16] (narrow) %v2649_v44, 8  ;;  %v7572_v24 = vpop.f32.mrb[10].mxu0  ;;  %v2630_v52 = vadd.f32 %v9535_v9, %v2599_v39 }
 0x280   : > { %v2491_v28 = vpop.f32.mrb[11].mxu0  ;;  %v2602_v26 = vmul.f32 %v7572_v24, %v9530_v3  ;;  %v2655_v33 = vmax.f32 %v2631_v61, 0.0  ;;  %v7878_v61 = vld [vmem:[%s10805_s4 + $0x48] ss:$16 sps:$4 sm:$0xff]  }
 0x281   : > { %v2601_v60 = vmul.f32 %v9530_v3, %v2491_v28  ;;  %v2654_v47 = vmax.f32 %v2630_v52, 0.0  ;;  %v7872_v52 = vld [vmem:[%s10805_s4 + $0x28] ss:$16 sps:$4 sm:$0xff]  }
 0x282   : > { %v2633_v50 = vadd.f32 %v9535_v9, %v2602_v26  ;;  %v7890_v26 = vld [vmem:[%s10805_s4 + $0x88] ss:$16 sps:$4 sm:$0xff]  }
 0x283   : > { %2674 = vxpose.xlu1.b32.cont [5/16] (narrow) %v2650_v0, 8  ;;  %v7575_v20 = vpop.f32.mrb[12].mxu0  ;;  %v2632_v17 = vadd.f32 %v9535_v9, %v2601_v60  ;;  %v7880_v60 = vld [vmem:[%s10805_s4 + $0x4c] ss:$16 sps:$4 sm:$0xff]  }
 0x284   : > { %v2501_v22 = vpop.f32.mrb[13].mxu0  ;;  %v2604_v40 = vmul.f32 %v7575_v20, %v9530_v3  ;;  %v2657_v2 = vmax.f32 %v2633_v50, 0.0  ;;  %v7908_v50 = vld [vmem:[%s10805_s4 + $0xe8] ss:$16 sps:$4 sm:$0xff]  }
 0x285   : > { %v2603_v43 = vmul.f32 %v9530_v3, %v2501_v22  ;;  %v2656_v10 = vmax.f32 %v2632_v17, 0.0  ;;  %v7904_v17 = vld [vmem:[%s10805_s4 + $0xcc] ss:$16 sps:$4 sm:$0xff]  }
 0x286   : > { %v2635_v11 = vadd.f32 %v9535_v9, %v2604_v40  ;;  %v7919_v40 = vld [vmem:[%s10805_s4 + $0x88c] ss:$16 sps:$4 sm:$0xff]  }
 0x287   : > { %2675 = vxpose.xlu1.b32.cont [6/16] (narrow) %v2651_v5, 8  ;;  %v9552_v41 = vpop.f32.mrb[14].mxu0  ;;  %v2634_v49 = vadd.f32 %v9535_v9, %v2603_v43  ;;  %v7910_v43 = vld [vmem:[%s10805_s4 + $0xec] ss:$16 sps:$4 sm:$0xff]  }
 0x288   : > { %v2511_v29 = vpop.f32.mrb[15].mxu0  ;;  %v2606_v28 = vmul.f32 %v9552_v41, %v9530_v3  ;;  %v2659_v13 = vmax.f32 %v2635_v11, 0.0  ;;  %v7926_v11 = vld [vmem:[%s10805_s4 + $0x148] ss:$16 sps:$4 sm:$0xff]  }
 0x289   : > { %v2605_v55 = vmul.f32 %v9530_v3, %v2511_v29  ;;  %v2658_v44 = vmax.f32 %v2634_v49, 0.0  ;;  %v7925_v49 = vld [vmem:[%s10805_s4 + $0x8ac] ss:$16 sps:$4 sm:$0xff]  }
 0x28a   : > { %v2637_v45 = vadd.f32 %v9535_v9, %v2606_v28  ;;  %v7937_v28 = vld [vmem:[%s10805_s4 + $0x8ec] ss:$16 sps:$4 sm:$0xff]  }
 0x28b   : > { %2676 = vxpose.xlu1.b32.cont [7/16] (narrow) %v2652_v16, 8  ;;  %v7581_v57 = vpop.f32.mrb[16].mxu0  ;;  %v2636_v20 = vadd.f32 %v9535_v9, %v2605_v55  ;;  %v7923_v55 = vld [vmem:[%s10805_s4 + $0x8a8] ss:$16 sps:$4 sm:$0xff]  }
 0x28c   : > { %v2521_v42 = vpop.f32.mrb[17].mxu0  ;;  %v2608_v18 = vmul.f32 %v7581_v57, %v9530_v3  ;;  %v2661_v39 = vmax.f32 %v2637_v45, 0.0 }
 0x28d   : > { %v2607_v36 = vmul.f32 %v9530_v3, %v2521_v42  ;;  %v2660_v53 = vmax.f32 %v2636_v20, 0.0  ;;  %v7938_v20 = vld [vmem:[%s10805_s4 + $0x180] ss:$16 sps:$4 sm:$0xff]  }
 0x28e   : > { %v2639_v48 = vadd.f32 %v9535_v9, %v2608_v18 }
 0x28f   : > { %2677 = vxpose.xlu1.b32.cont [8/16] (narrow) %v2653_v38, 8  ;;  %v7584_v51 = vpop.f32.mrb[18].mxu0  ;;  %v2638_v31 = vadd.f32 %v9535_v9, %v2607_v36  ;;  %v7869_v38 = vld [vmem:[%s10805_s4 + $0x788] ss:$16 sps:$4 sm:$0xff]  }
 0x290   : > { %v2531_v37 = vpop.f32.mrb[19].mxu0  ;;  %v2610_v8 = vmul.f32 %v7584_v51, %v9530_v3  ;;  %v2663_v15 = vmax.f32 %v2639_v48, 0.0  ;;  %v7884_v48 = vld [vmem:[%s10805_s4 + $0x68] ss:$16 sps:$4 sm:$0xff]  }
 0x291   : > { %v2609_v7 = vmul.f32 %v9530_v3, %v2531_v37  ;;  %v2662_v4 = vmax.f32 %v2638_v31, 0.0  ;;  %v7877_v31 = vld [vmem:[%s10805_s4 + $0x7ac] ss:$16 sps:$4 sm:$0xff]   ;;  %v7875_v37 = vld [vmem:[%s10805_s4 + $0x7a8] ss:$16 sps:$4 sm:$0xff]  }
 0x292   : > { %v2641_v63 = vadd.f32 %v9535_v9, %v2610_v8  ;;  %v7896_v8 = vld [vmem:[%s10805_s4 + $0xa8] ss:$16 sps:$4 sm:$0xff]  }
 0x293   : > { %2678 = vxpose.xlu1.b32.cont [9/16] (narrow) %v2654_v47, 8  ;;  %2702 = vxpose.xlu0.b32.start [1/8] (short) (narrow) %v2662_v4, 8  ;;  %v7587_v58 = vpop.f32.mrb[20].mxu0  ;;  %v2640_v32 = vadd.f32 %v9535_v9, %v2609_v7  ;;  %v7883_v7 = vld [vmem:[%s10805_s4 + $0x7cc] ss:$16 sps:$4 sm:$0xff]  }
 0x294   : > { %v2541_v30 = vpop.f32.mrb[21].mxu0  ;;  %v2612_v25 = vmul.f32 %v7587_v58, %v9530_v3  ;;  %v2665_v46 = vmax.f32 %v2641_v63, 0.0  ;;  %v7886_v47 = vld [vmem:[%s10805_s4 + $0x6c] ss:$16 sps:$4 sm:$0xff]   ;;  %v7881_v4 = vld [vmem:[%s10805_s4 + $0x7c8] ss:$16 sps:$4 sm:$0xff]  }
 0x295   : > { %v2611_v23 = vmul.f32 %v9530_v3, %v2541_v30  ;;  %v2664_v12 = vmax.f32 %v2640_v32, 0.0  ;;  %v7892_v58 = vld [vmem:[%s10805_s4 + $0x8c] ss:$16 sps:$4 sm:$0xff]   ;;  %v7899_v32 = vld [vmem:[%s10805_s4 + $0x828] ss:$16 sps:$4 sm:$0xff]  }
 0x296   : > { %v2643_v24 = vadd.f32 %v9535_v9, %v2612_v25  ;;  %v7895_v30 = vld [vmem:[%s10805_s4 + $0x80c] ss:$16 sps:$4 sm:$0xff]   ;;  %v7914_v63 = vld [vmem:[%s10805_s4 + $0x108] ss:$16 sps:$4 sm:$0xff]  }
 0x297   : > { %2679 = vxpose.xlu1.b32.cont [10/16] (narrow) %v2655_v33, 8  ;;  %2703 = vxpose.xlu0.b32.cont [2/8] (short) (narrow) %v2663_v15, 8  ;;  %v7590_v27 = vpop.f32.mrb[22].mxu0  ;;  %v2642_v21 = vadd.f32 %v9535_v9, %v2611_v23  ;;  %v7898_v33 = vld [vmem:[%s10805_s4 + $0xac] ss:$16 sps:$4 sm:$0xff]  }
 0x298   : > { %v2551_v62 = vpop.f32.mrb[23].mxu0  ;;  %v2614_v0 = vmul.f32 %v7590_v27, %v9530_v3  ;;  %v2667_v19 = vmax.f32 %v2643_v24, 0.0  ;;  %v7901_v15 = vld [vmem:[%s10805_s4 + $0x82c] ss:$16 sps:$4 sm:$0xff]   ;;  %v7902_v27 = vld [vmem:[%s10805_s4 + $0xc8] ss:$16 sps:$4 sm:$0xff]  }
 0x299   : > { %v2613_v1 = vmul.f32 %v9530_v3, %v2551_v62  ;;  %v2666_v54 = vmax.f32 %v2642_v21, 0.0  ;;  %v7905_v62 = vld [vmem:[%s10805_s4 + $0x848] ss:$16 sps:$4 sm:$0xff]   ;;  %v7913_v23 = vld [vmem:[%s10805_s4 + $0x86c] ss:$16 sps:$4 sm:$0xff]  }
 0x29a   : > { %v2645_v29 = vadd.f32 %v9535_v9, %v2614_v0  ;;  %v7917_v25 = vld [vmem:[%s10805_s4 + $0x888] ss:$16 sps:$4 sm:$0xff]   ;;  %v7928_v21 = vld [vmem:[%s10805_s4 + $0x14c] ss:$16 sps:$4 sm:$0xff]  }
 0x29b   : > { %2680 = vxpose.xlu1.b32.cont [11/16] (narrow) %v2656_v10, 8  ;;  %2704 = vxpose.xlu0.b32.cont [3/8] (short) (narrow) %v2664_v12, 8  ;;  %v2644_v22 = vadd.f32 %v9535_v9, %v2613_v1  ;;  %v7874_v9 = vld [vmem:[%s10805_s4 + $0x2c] ss:$16 sps:$4 sm:$0xff]   ;;  %v7911_v12 = vld [vmem:[%s10805_s4 + $0x868] ss:$16 sps:$4 sm:$0xff]  }
 0x29c   : > { %v2669_v41 = vmax.f32 %v2645_v29, 0.0  ;;  %v7916_v10 = vld [vmem:[%s10805_s4 + $0x10c] ss:$16 sps:$4 sm:$0xff]   ;;  %v7932_v24 = vld [vmem:[%s10805_s4 + $0x168] ss:$16 sps:$4 sm:$0xff]  }
 0x29d   : > { %v2668_v5 = vmax.f32 %v2644_v22, 0.0  ;;  %v7931_v1 = vld [vmem:[%s10805_s4 + $0x8cc] ss:$16 sps:$4 sm:$0xff]   ;;  %v7935_v0 = vld [vmem:[%s10805_s4 + $0x8e8] ss:$16 sps:$4 sm:$0xff]  }
 0x29e   : > { %v7943_v22 = vld [vmem:[%s10805_s4 + $0x90c] ss:$16 sps:$4 sm:$0xff]   ;;  %v7944_v29 = vld [vmem:[%s10805_s4 + $0x1a0] ss:$16 sps:$4 sm:$0xff]  }
 0x29f   : > { %2681 = vxpose.xlu1.b32.cont [12/16] (narrow) %v2657_v2, 8  ;;  %2705 = vxpose.xlu0.b32.cont [4/8] (short) (narrow) %v2665_v46, 8  ;;  %v7922_v2 = vld [vmem:[%s10805_s4 + $0x12c] ss:$16 sps:$4 sm:$0xff]   ;;  %v7920_v46 = vld [vmem:[%s10805_s4 + $0x128] ss:$16 sps:$4 sm:$0xff]  }
 0x2a3   : > { %2682 = vxpose.xlu1.b32.cont [13/16] (narrow) %v2658_v44, 8  ;;  %2706 = vxpose.xlu0.b32.cont [5/8] (short) (narrow) %v2666_v54, 8  ;;  %v7934_v44 = vld [vmem:[%s10805_s4 + $0x16c] ss:$16 sps:$4 sm:$0xff]   ;;  %v7929_v54 = vld [vmem:[%s10805_s4 + $0x8c8] ss:$16 sps:$4 sm:$0xff]  }
 0x2a7   : > { %2683 = vxpose.xlu1.b32.cont [14/16] (narrow) %v2659_v13, 8  ;;  %2707 = vxpose.xlu0.b32.cont [6/8] (short) (narrow) %v2667_v19, 8  ;;  %v7940_v13 = vld [vmem:[%s10805_s4 + $0x184] ss:$16 sps:$4 sm:$0xff]  }
 0x2ab   : > { %2684 = vxpose.xlu1.b32.cont [15/16] (narrow) %v2660_v53, 8  ;;  %2708 = vxpose.xlu0.b32.cont [7/8] (short) (narrow) %v2668_v5, 8  ;;  %v7946_v53 = vld [vmem:[%s10805_s4 + $0x1a4] ss:$16 sps:$4 sm:$0xff]   ;;  %v7941_v5 = vld [vmem:[%s10805_s4 + $0x908] ss:$16 sps:$4 sm:$0xff]  }
 0x2af   : > { %2685 = vxpose.xlu1.b32.end [16/16] (narrow) %v2661_v39, 8  ;;  %2709 = vxpose.xlu0.b32.end [8/8] (short) (narrow) %v2669_v41, 8  ;;  %v7949_v39 = vld [vmem:[%s10805_s4 + $0x92c] ss:$16 sps:$4 sm:$0xff]  }
 0x2f3   : > { %v2686_v3 = vpop.trf.xlu1 }
 0x2f4   : > { %v9600_v16 = vpack.c.bf16 %v2686_v3, %v2686_v3  ;;  %v7952_v3 = vld [vmem:[%s10805_s4 + $0x1c4] ss:$16 sps:$4 sm:$0xff]  }
 0x2f6   : > { %v4416_v36 = vrot.slane %v9600_v16, 2  ;;  %v9765_v19 = vshrl.u32 %v9600_v16, 16 }
 0x2f8   : > { %v4823_v45 = vrot.slane %v9765_v19, 2 }
 0x313   : > { %v2718_v34 = vpop.trf.xlu0 }
 0x314   : > { %v9602_v57 = vpack.c.bf16 %v2718_v34, %v2718_v34  ;;  %v7947_v34 = vld [vmem:[%s10805_s4 + $0x928] ss:$16 sps:$4 sm:$0xff]  }
 0x316   : > { %v9611_v42 = vshrl.u32 %v9602_v57, 16  ;;  %6334 = vmatprep.mubr.msk.bf16.mxu1 %vm3025_vm3, %v9602_v57  ;;  %v4417_v18 = vrot.slane %v9602_v57, 2  ;;  %v5231_v41 = vrot.slane %v9602_v57, 3 }
 0x317   : > { %3062 = vmatmul.mubr.bf16.vlgmr.msra.gmra.mrb[0].mxu1 %v9600_v16 }
 0x318   : > { %3071 = vmatpush1.bf16.msra.mxu1 %v7866_v14  ;;  %6335 = vmatprep.mubr.msk.bf16.mxu1 %vm3025_vm3, %v9602_v57  ;;  %v4824_v51 = vrot.slane %v9611_v42, 2  ;;  %v7950_v14 = vld [vmem:[%s10805_s4 + $0x1c0] ss:$16 sps:$4 sm:$0xff]  }
 0x319   : > { %6727 = vmatprep.mubr.msk.bf16.mxu0 %vm3025_vm3, %v4417_v18  ;;  %3072 = vmatprep.subr.bf16.mxu1 %v7874_v9  ;;  %v7955_v9 = vld [vmem:[%s10805_s4 + $0x94c] ss:$16 sps:$4 sm:$0xff]  }
 0x31a   : > { %4736 = vmatmul.mubr.bf16.vlgmr.msra.gmra.mrb[24].mxu0 %v4416_v36 }
 0x31b   : > { %5111 = vmatpush1.bf16.msra.mxu0 %v7869_v38  ;;  %6825 = vmatprep.mubr.msk.bf16.mxu0 %vm3025_vm3, %v4824_v51  ;;  %v7958_v38 = vld [vmem:[%s10805_s4 + $0x1e4] ss:$16 sps:$4 sm:$0xff]  }
 0x31c   : > { %3073 = vmatpush1.bf16.msra.mxu1 %v7872_v52  ;;  %5112 = vmatprep.subr.bf16.mxu0 %v7877_v31  ;;  %v7953_v52 = vld [vmem:[%s10805_s4 + $0x948] ss:$16 sps:$4 sm:$0xff]   ;;  %v7956_v31 = vld [vmem:[%s10805_s4 + $0x1e0] ss:$16 sps:$4 sm:$0xff]  }
 0x31d   : > { %3074 = vmatprep.subr.bf16.mxu1 %v7880_v60  ;;  %v7961_v60 = vld [vmem:[%s10805_s4 + $0x96c] ss:$16 sps:$4 sm:$0xff]  }
 0x31f   : > { %5113 = vmatpush1.bf16.msra.mxu0 %v7875_v37  ;;  %v7964_v37 = vld [vmem:[%s10805_s4 + $0x204] ss:$16 sps:$4 sm:$0xff]  }
 0x320   : > { %3075 = vmatpush1.bf16.msra.mxu1 %v7878_v61  ;;  %5114 = vmatprep.subr.bf16.mxu0 %v7883_v7  ;;  %v7959_v61 = vld [vmem:[%s10805_s4 + $0x968] ss:$16 sps:$4 sm:$0xff]   ;;  %v7962_v7 = vld [vmem:[%s10805_s4 + $0x200] ss:$16 sps:$4 sm:$0xff]  }
 0x321   : > { %3076 = vmatprep.subr.bf16.mxu1 %v7886_v47  ;;  %v7967_v47 = vld [vmem:[%s10805_s4 + $0x98c] ss:$16 sps:$4 sm:$0xff]  }
 0x323   : > { %5115 = vmatpush1.bf16.msra.mxu0 %v7881_v4  ;;  %v7970_v4 = vld [vmem:[%s10805_s4 + $0x224] ss:$16 sps:$4 sm:$0xff]  }
 0x324   : > { %3077 = vmatpush1.bf16.msra.mxu1 %v7884_v48  ;;  %5116 = vmatprep.subr.bf16.mxu0 %v7889_v56  ;;  %v7965_v48 = vld [vmem:[%s10805_s4 + $0x988] ss:$16 sps:$4 sm:$0xff]   ;;  %v7968_v56 = vld [vmem:[%s10805_s4 + $0x220] ss:$16 sps:$4 sm:$0xff]  }
 0x325   : > { %3078 = vmatprep.subr.bf16.mxu1 %v7892_v58  ;;  %v7973_v58 = vld [vmem:[%s10805_s4 + $0x9ac] ss:$16 sps:$4 sm:$0xff]  }
 0x327   : > { %5117 = vmatpush1.bf16.msra.mxu0 %v7887_v59  ;;  %v7976_v59 = vld [vmem:[%s10805_s4 + $0x244] ss:$16 sps:$4 sm:$0xff]  }
 0x328   : > { %3079 = vmatpush1.bf16.msra.mxu1 %v7890_v26  ;;  %5118 = vmatprep.subr.bf16.mxu0 %v7895_v30  ;;  %v7971_v26 = vld [vmem:[%s10805_s4 + $0x9a8] ss:$16 sps:$4 sm:$0xff]   ;;  %v7974_v30 = vld [vmem:[%s10805_s4 + $0x240] ss:$16 sps:$4 sm:$0xff]  }
 0x329   : > { %3080 = vmatprep.subr.bf16.mxu1 %v7898_v33  ;;  %v7979_v33 = vld [vmem:[%s10805_s4 + $0x9cc] ss:$16 sps:$4 sm:$0xff]  }
 0x32b   : > { %5119 = vmatpush1.bf16.msra.mxu0 %v7893_v6  ;;  %v7982_v6 = vld [vmem:[%s10805_s4 + $0x264] ss:$16 sps:$4 sm:$0xff]  }
 0x32c   : > { %3081 = vmatpush1.bf16.msra.mxu1 %v7896_v8  ;;  %5120 = vmatprep.subr.bf16.mxu0 %v7901_v15  ;;  %v7977_v8 = vld [vmem:[%s10805_s4 + $0x9c8] ss:$16 sps:$4 sm:$0xff]   ;;  %v7980_v15 = vld [vmem:[%s10805_s4 + $0x260] ss:$16 sps:$4 sm:$0xff]  }
 0x32d   : > { %3082 = vmatprep.subr.bf16.mxu1 %v7904_v17  ;;  %v7985_v17 = vld [vmem:[%s10805_s4 + $0x9ec] ss:$16 sps:$4 sm:$0xff]  }
 0x32f   : > { %5121 = vmatpush1.bf16.msra.mxu0 %v7899_v32  ;;  %v7988_v32 = vld [vmem:[%s10805_s4 + $0x284] ss:$16 sps:$4 sm:$0xff]  }
 0x330   : > { %3083 = vmatpush1.bf16.msra.mxu1 %v7902_v27  ;;  %5122 = vmatprep.subr.bf16.mxu0 %v7907_v35  ;;  %v7983_v27 = vld [vmem:[%s10805_s4 + $0x9e8] ss:$16 sps:$4 sm:$0xff]   ;;  %v7986_v35 = vld [vmem:[%s10805_s4 + $0x280] ss:$16 sps:$4 sm:$0xff]  }
 0x331   : > { %3084 = vmatprep.subr.bf16.mxu1 %v7910_v43  ;;  %v7991_v43 = vld [vmem:[%s10805_s4 + $0xa0c] ss:$16 sps:$4 sm:$0xff]  }
 0x333   : > { %5123 = vmatpush1.bf16.msra.mxu0 %v7905_v62  ;;  %v7994_v62 = vld [vmem:[%s10805_s4 + $0x2a4] ss:$16 sps:$4 sm:$0xff]  }
 0x334   : > { %3085 = vmatpush1.bf16.msra.mxu1 %v7908_v50  ;;  %5124 = vmatprep.subr.bf16.mxu0 %v7913_v23  ;;  %v7989_v50 = vld [vmem:[%s10805_s4 + $0xa08] ss:$16 sps:$4 sm:$0xff]   ;;  %v7992_v23 = vld [vmem:[%s10805_s4 + $0x2a0] ss:$16 sps:$4 sm:$0xff]  }
 0x335   : > { %3086 = vmatprep.subr.bf16.mxu1 %v7916_v10  ;;  %v7997_v10 = vld [vmem:[%s10805_s4 + $0xa2c] ss:$16 sps:$4 sm:$0xff]  }
 0x337   : > { %5125 = vmatpush1.bf16.msra.mxu0 %v7911_v12  ;;  %v8000_v12 = vld [vmem:[%s10805_s4 + $0x2c4] ss:$16 sps:$4 sm:$0xff]  }
 0x338   : > { %3087 = vmatpush1.bf16.msra.mxu1 %v7914_v63  ;;  %5126 = vmatprep.subr.bf16.mxu0 %v7919_v40  ;;  %v7995_v63 = vld [vmem:[%s10805_s4 + $0xa28] ss:$16 sps:$4 sm:$0xff]   ;;  %v7998_v40 = vld [vmem:[%s10805_s4 + $0x2c0] ss:$16 sps:$4 sm:$0xff]  }
 0x339   : > { %3088 = vmatprep.subr.bf16.mxu1 %v7922_v2  ;;  %v8003_v2 = vld [vmem:[%s10805_s4 + $0xa4c] ss:$16 sps:$4 sm:$0xff]  }
 0x33b   : > { %5127 = vmatpush1.bf16.msra.mxu0 %v7917_v25  ;;  %v8006_v25 = vld [vmem:[%s10805_s4 + $0x2e4] ss:$16 sps:$4 sm:$0xff]  }
 0x33c   : > { %3089 = vmatpush1.bf16.msra.mxu1 %v7920_v46  ;;  %5128 = vmatprep.subr.bf16.mxu0 %v7925_v49  ;;  %v8001_v46 = vld [vmem:[%s10805_s4 + $0xa48] ss:$16 sps:$4 sm:$0xff]   ;;  %v8004_v49 = vld [vmem:[%s10805_s4 + $0x2e0] ss:$16 sps:$4 sm:$0xff]  }
 0x33d   : > { %3090 = vmatprep.subr.bf16.mxu1 %v7928_v21  ;;  %v8009_v21 = vld [vmem:[%s10805_s4 + $0xa6c] ss:$16 sps:$4 sm:$0xff]  }
 0x33f   : > { %5129 = vmatpush1.bf16.msra.mxu0 %v7923_v55  ;;  %v8012_v55 = vld [vmem:[%s10805_s4 + $0x18c] ss:$16 sps:$4 sm:$0xff]  }
 0x340   : > { %3091 = vmatpush1.bf16.msra.mxu1 %v7926_v11  ;;  %5130 = vmatprep.subr.bf16.mxu0 %v7931_v1  ;;  %v8007_v11 = vld [vmem:[%s10805_s4 + $0xa68] ss:$16 sps:$4 sm:$0xff]  }
 0x341   : > { %3092 = vmatprep.subr.bf16.mxu1 %v7934_v44  ;;  %v8010_v1 = vld [vmem:[%s10805_s4 + $0x188] ss:$16 sps:$4 sm:$0xff]   ;;  %v8015_v44 = vld [vmem:[%s10805_s4 + $0xa8c] ss:$16 sps:$4 sm:$0xff]  }
 0x343   : > { %5131 = vmatpush1.bf16.msra.mxu0 %v7929_v54  ;;  %v8018_v54 = vld [vmem:[%s10805_s4 + $0x1ac] ss:$16 sps:$4 sm:$0xff]  }
 0x344   : > { %3093 = vmatpush1.bf16.msra.mxu1 %v7932_v24  ;;  %5132 = vmatprep.subr.bf16.mxu0 %v7937_v28  ;;  %v8013_v24 = vld [vmem:[%s10805_s4 + $0xa88] ss:$16 sps:$4 sm:$0xff]   ;;  %v5230_v28 = vrot.slane %v9600_v16, 3 }
 0x345   : > { %3439 = vmatprep.subr.bf16.mxu1 %v7940_v13  ;;  %v8016_v13 = vld [vmem:[%s10805_s4 + $0x1a8] ss:$16 sps:$4 sm:$0xff]  }
 0x347   : > { %5133 = vmatpush1.bf16.msra.mxu0 %v7935_v0  ;;  %3103 = vmatmul.mubr.bf16.vlgmr.msra.gmra.mrb[4].mxu1 %v9600_v16  ;;  %v8021_v0 = vld [vmem:[%s10805_s4 + $0xaac] ss:$16 sps:$4 sm:$0xff]  }
 0x348   : > { %3440 = vmatpush1.bf16.msra.mxu1 %v7938_v20  ;;  %6432 = vmatprep.mubr.msk.bf16.mxu1 %vm3025_vm3, %v9611_v42  ;;  %v5638_v20 = vrot.slane %v9611_v42, 3 }
 0x349   : > { %5517 = vmatprep.subr.bf16.mxu0 %v7943_v22  ;;  %3441 = vmatprep.subr.bf16.mxu1 %v7946_v53  ;;  %v8024_v22 = vld [vmem:[%s10805_s4 + $0x1cc] ss:$16 sps:$4 sm:$0xff]   ;;  %v8019_v53 = vld [vmem:[%s10805_s4 + $0xaa8] ss:$16 sps:$4 sm:$0xff]  }
 0x34a   : > { %5143 = vmatmul.mubr.bf16.vlgmr.msra.gmra.mrb[28].mxu0 %v4823_v45 }
 0x34b   : > { %5518 = vmatpush1.bf16.msra.mxu0 %v7941_v5  ;;  %6923 = vmatprep.mubr.msk.bf16.mxu0 %vm3025_vm3, %v5231_v41  ;;  %v8022_v5 = vld [vmem:[%s10805_s4 + $0x1c8] ss:$16 sps:$4 sm:$0xff]  }
 0x34c   : > { %3442 = vmatpush1.bf16.msra.mxu1 %v7944_v29  ;;  %5519 = vmatprep.subr.bf16.mxu0 %v7949_v39  ;;  %v8027_v29 = vld [vmem:[%s10805_s4 + $0xacc] ss:$16 sps:$4 sm:$0xff]  }
 0x34d   : > { %3443 = vmatprep.subr.bf16.mxu1 %v7952_v3  ;;  %v8030_v39 = vld [vmem:[%s10805_s4 + $0x1ec] ss:$16 sps:$4 sm:$0xff]   ;;  %v8025_v3 = vld [vmem:[%s10805_s4 + $0xac8] ss:$16 sps:$4 sm:$0xff]  }
 0x34f   : > { %5520 = vmatpush1.bf16.msra.mxu0 %v7947_v34  ;;  %v8028_v34 = vld [vmem:[%s10805_s4 + $0x1e8] ss:$16 sps:$4 sm:$0xff]  }
 0x350   : > { %3444 = vmatpush1.bf16.msra.mxu1 %v7950_v14  ;;  %5521 = vmatprep.subr.bf16.mxu0 %v7955_v9  ;;  %v8033_v14 = vld [vmem:[%s10805_s4 + $0xaec] ss:$16 sps:$4 sm:$0xff]  }
 0x351   : > { %3445 = vmatprep.subr.bf16.mxu1 %v7958_v38  ;;  %v8036_v9 = vld [vmem:[%s10805_s4 + $0x20c] ss:$16 sps:$4 sm:$0xff]   ;;  %v8031_v38 = vld [vmem:[%s10805_s4 + $0xae8] ss:$16 sps:$4 sm:$0xff]  }
 0x353   : > { %5522 = vmatpush1.bf16.msra.mxu0 %v7953_v52  ;;  %v8034_v52 = vld [vmem:[%s10805_s4 + $0x208] ss:$16 sps:$4 sm:$0xff]  }
 0x354   : > { %3446 = vmatpush1.bf16.msra.mxu1 %v7956_v31  ;;  %5523 = vmatprep.subr.bf16.mxu0 %v7961_v60  ;;  %v8039_v31 = vld [vmem:[%s10805_s4 + $0xb0c] ss:$16 sps:$4 sm:$0xff]  }
 0x355   : > { %3447 = vmatprep.subr.bf16.mxu1 %v7964_v37  ;;  %v8042_v60 = vld [vmem:[%s10805_s4 + $0x22c] ss:$16 sps:$4 sm:$0xff]   ;;  %v8037_v37 = vld [vmem:[%s10805_s4 + $0xb08] ss:$16 sps:$4 sm:$0xff]  }
 0x357   : > { %5524 = vmatpush1.bf16.msra.mxu0 %v7959_v61  ;;  %v8040_v61 = vld [vmem:[%s10805_s4 + $0x228] ss:$16 sps:$4 sm:$0xff]  }
 0x358   : > { %3448 = vmatpush1.bf16.msra.mxu1 %v7962_v7  ;;  %5525 = vmatprep.subr.bf16.mxu0 %v7967_v47  ;;  %v8045_v7 = vld [vmem:[%s10805_s4 + $0xb2c] ss:$16 sps:$4 sm:$0xff]  }
 0x359   : > { %3449 = vmatprep.subr.bf16.mxu1 %v7970_v4  ;;  %v8048_v47 = vld [vmem:[%s10805_s4 + $0x24c] ss:$16 sps:$4 sm:$0xff]   ;;  %v8043_v4 = vld [vmem:[%s10805_s4 + $0xb28] ss:$16 sps:$4 sm:$0xff]  }
 0x35b   : > { %5526 = vmatpush1.bf16.msra.mxu0 %v7965_v48  ;;  %v8046_v48 = vld [vmem:[%s10805_s4 + $0x248] ss:$16 sps:$4 sm:$0xff]  }
 0x35c   : > { %3450 = vmatpush1.bf16.msra.mxu1 %v7968_v56  ;;  %5527 = vmatprep.subr.bf16.mxu0 %v7973_v58  ;;  %v8051_v56 = vld [vmem:[%s10805_s4 + $0xb4c] ss:$16 sps:$4 sm:$0xff]  }
 0x35d   : > { %3451 = vmatprep.subr.bf16.mxu1 %v7976_v59  ;;  %v8054_v58 = vld [vmem:[%s10805_s4 + $0x26c] ss:$16 sps:$4 sm:$0xff]   ;;  %v8049_v59 = vld [vmem:[%s10805_s4 + $0xb48] ss:$16 sps:$4 sm:$0xff]  }
 0x35f   : > { %5528 = vmatpush1.bf16.msra.mxu0 %v7971_v26  ;;  %v8052_v26 = vld [vmem:[%s10805_s4 + $0x268] ss:$16 sps:$4 sm:$0xff]  }
 0x360   : > { %3452 = vmatpush1.bf16.msra.mxu1 %v7974_v30  ;;  %5529 = vmatprep.subr.bf16.mxu0 %v7979_v33  ;;  %v8057_v30 = vld [vmem:[%s10805_s4 + $0xb6c] ss:$16 sps:$4 sm:$0xff]  }
 0x361   : > { %3453 = vmatprep.subr.bf16.mxu1 %v7982_v6  ;;  %v8060_v33 = vld [vmem:[%s10805_s4 + $0x28c] ss:$16 sps:$4 sm:$0xff]   ;;  %v8055_v6 = vld [vmem:[%s10805_s4 + $0xb68] ss:$16 sps:$4 sm:$0xff]  }
 0x363   : > { %5530 = vmatpush1.bf16.msra.mxu0 %v7977_v8  ;;  %v8058_v8 = vld [vmem:[%s10805_s4 + $0x288] ss:$16 sps:$4 sm:$0xff]  }
 0x364   : > { %3454 = vmatpush1.bf16.msra.mxu1 %v7980_v15  ;;  %5531 = vmatprep.subr.bf16.mxu0 %v7985_v17  ;;  %v8063_v15 = vld [vmem:[%s10805_s4 + $0xb8c] ss:$16 sps:$4 sm:$0xff]  }
 0x365   : > { %3455 = vmatprep.subr.bf16.mxu1 %v7988_v32  ;;  %v8066_v17 = vld [vmem:[%s10805_s4 + $0x2ac] ss:$16 sps:$4 sm:$0xff]   ;;  %v8061_v32 = vld [vmem:[%s10805_s4 + $0xb88] ss:$16 sps:$4 sm:$0xff]  }
 0x367   : > { %5532 = vmatpush1.bf16.msra.mxu0 %v7983_v27  ;;  %v8064_v27 = vld [vmem:[%s10805_s4 + $0x2a8] ss:$16 sps:$4 sm:$0xff]  }
 0x368   : > { %3456 = vmatpush1.bf16.msra.mxu1 %v7986_v35  ;;  %5533 = vmatprep.subr.bf16.mxu0 %v7991_v43  ;;  %v8069_v35 = vld [vmem:[%s10805_s4 + $0xbac] ss:$16 sps:$4 sm:$0xff]  }
 0x369   : > { %3457 = vmatprep.subr.bf16.mxu1 %v7994_v62  ;;  %v8072_v43 = vld [vmem:[%s10805_s4 + $0x2cc] ss:$16 sps:$4 sm:$0xff]   ;;  %v8067_v62 = vld [vmem:[%s10805_s4 + $0xba8] ss:$16 sps:$4 sm:$0xff]  }
 0x36b   : > { %5534 = vmatpush1.bf16.msra.mxu0 %v7989_v50  ;;  %v8070_v50 = vld [vmem:[%s10805_s4 + $0x2c8] ss:$16 sps:$4 sm:$0xff]  }
 0x36c   : > { %3458 = vmatpush1.bf16.msra.mxu1 %v7992_v23  ;;  %5535 = vmatprep.subr.bf16.mxu0 %v7997_v10  ;;  %v8075_v23 = vld [vmem:[%s10805_s4 + $0xbcc] ss:$16 sps:$4 sm:$0xff]  }
 0x36d   : > { %3459 = vmatprep.subr.bf16.mxu1 %v8000_v12  ;;  %v8078_v10 = vld [vmem:[%s10805_s4 + $0x2ec] ss:$16 sps:$4 sm:$0xff]   ;;  %v8073_v12 = vld [vmem:[%s10805_s4 + $0xbc8] ss:$16 sps:$4 sm:$0xff]  }
 0x36f   : > { %5536 = vmatpush1.bf16.msra.mxu0 %v7995_v63  ;;  %v8076_v63 = vld [vmem:[%s10805_s4 + $0x2e8] ss:$16 sps:$4 sm:$0xff]  }
 0x370   : > { %3460 = vmatpush1.bf16.msra.mxu1 %v7998_v40  ;;  %5537 = vmatprep.subr.bf16.mxu0 %v8003_v2  ;;  %v8081_v40 = vld [vmem:[%s10805_s4 + $0xbec] ss:$16 sps:$4 sm:$0xff]   ;;  %v8084_v2 = vld [vmem:[%s10805_s4 + $0x304] ss:$16 sps:$4 sm:$0xff]  }
 0x371   : > { %3461 = vmatprep.subr.bf16.mxu1 %v8006_v25  ;;  %v8079_v25 = vld [vmem:[%s10805_s4 + $0xbe8] ss:$16 sps:$4 sm:$0xff]  }
 0x373   : > { %5538 = vmatpush1.bf16.msra.mxu0 %v8001_v46  ;;  %v8082_v46 = vld [vmem:[%s10805_s4 + $0x300] ss:$16 sps:$4 sm:$0xff]  }
 0x374   : > { %3462 = vmatpush1.bf16.msra.mxu1 %v8004_v49  ;;  %5539 = vmatprep.subr.bf16.mxu0 %v8009_v21  ;;  %v8087_v49 = vld [vmem:[%s10805_s4 + $0x324] ss:$16 sps:$4 sm:$0xff]   ;;  %v3603_v21 = vrot.slane %v9602_v57, 1 }
 0x375   : > { %3480 = vmatprep.subr.bf16.mxu1 %v8012_v55  ;;  %v5637_v55 = vrot.slane %v9765_v19, 3  ;;  %v8309_v57 = vld [vmem:[%s10805_s4 + $0x964] ss:$16 sps:$4 sm:$0xff]  }
 0x377   : > { %5540 = vmatpush1.bf16.msra.mxu0 %v8007_v11  ;;  %3472 = vmatmul.mubr.bf16.vlgmr.msra.gmra.mrb[8].mxu1 %v9765_v19  ;;  %v8085_v11 = vld [vmem:[%s10805_s4 + $0x320] ss:$16 sps:$4 sm:$0xff]  }
 0x378   : > { %3481 = vmatpush1.bf16.msra.mxu1 %v8010_v1  ;;  %6433 = vmatprep.mubr.msk.bf16.mxu1 %vm3025_vm3, %v9611_v42  ;;  %v8090_v1 = vld [vmem:[%s10805_s4 + $0x344] ss:$16 sps:$4 sm:$0xff]  }
 0x379   : > { %5924 = vmatprep.subr.bf16.mxu0 %v8015_v44  ;;  %3482 = vmatprep.subr.bf16.mxu1 %v8018_v54  ;;  %v8088_v44 = vld [vmem:[%s10805_s4 + $0x340] ss:$16 sps:$4 sm:$0xff]   ;;  %v8093_v54 = vld [vmem:[%s10805_s4 + $0x364] ss:$16 sps:$4 sm:$0xff]  }
 0x37a   : > { %5550 = vmatmul.mubr.bf16.vlgmr.msra.gmra.mrb[32].mxu0 %v5230_v28 }
 0x37b   : > { %5925 = vmatpush1.bf16.msra.mxu0 %v8013_v24  ;;  %7021 = vmatprep.mubr.msk.bf16.mxu0 %vm3025_vm3, %v5638_v20  ;;  %v8091_v24 = vld [vmem:[%s10805_s4 + $0x360] ss:$16 sps:$4 sm:$0xff]  }
 0x37c   : > { %3483 = vmatpush1.bf16.msra.mxu1 %v8016_v13  ;;  %5926 = vmatprep.subr.bf16.mxu0 %v8021_v0  ;;  %v8096_v13 = vld [vmem:[%s10805_s4 + $0x384] ss:$16 sps:$4 sm:$0xff]   ;;  %v8094_v0 = vld [vmem:[%s10805_s4 + $0x380] ss:$16 sps:$4 sm:$0xff]  }
 0x37d   : > { %3484 = vmatprep.subr.bf16.mxu1 %v8024_v22  ;;  %v8099_v22 = vld [vmem:[%s10805_s4 + $0x3a4] ss:$16 sps:$4 sm:$0xff]  }
 0x37f   : > { %5927 = vmatpush1.bf16.msra.mxu0 %v8019_v53  ;;  %v8097_v53 = vld [vmem:[%s10805_s4 + $0x3a0] ss:$16 sps:$4 sm:$0xff]  }
 0x380   : > { %3485 = vmatpush1.bf16.msra.mxu1 %v8022_v5  ;;  %5928 = vmatprep.subr.bf16.mxu0 %v8027_v29  ;;  %v8102_v5 = vld [vmem:[%s10805_s4 + $0x3c4] ss:$16 sps:$4 sm:$0xff]   ;;  %v8100_v29 = vld [vmem:[%s10805_s4 + $0x3c0] ss:$16 sps:$4 sm:$0xff]  }
 0x381   : > { %3486 = vmatprep.subr.bf16.mxu1 %v8030_v39  ;;  %v8105_v39 = vld [vmem:[%s10805_s4 + $0x3e4] ss:$16 sps:$4 sm:$0xff]  }
 0x383   : > { %5929 = vmatpush1.bf16.msra.mxu0 %v8025_v3  ;;  %v8103_v3 = vld [vmem:[%s10805_s4 + $0x3e0] ss:$16 sps:$4 sm:$0xff]  }
 0x384   : > { %3487 = vmatpush1.bf16.msra.mxu1 %v8028_v34  ;;  %5930 = vmatprep.subr.bf16.mxu0 %v8033_v14  ;;  %v8108_v34 = vld [vmem:[%s10805_s4 + $0x404] ss:$16 sps:$4 sm:$0xff]   ;;  %v8106_v14 = vld [vmem:[%s10805_s4 + $0x400] ss:$16 sps:$4 sm:$0xff]  }
 0x385   : > { %3488 = vmatprep.subr.bf16.mxu1 %v8036_v9  ;;  %v8111_v9 = vld [vmem:[%s10805_s4 + $0x424] ss:$16 sps:$4 sm:$0xff]  }
 0x387   : > { %5931 = vmatpush1.bf16.msra.mxu0 %v8031_v38  ;;  %v8109_v38 = vld [vmem:[%s10805_s4 + $0x420] ss:$16 sps:$4 sm:$0xff]  }
 0x388   : > { %3489 = vmatpush1.bf16.msra.mxu1 %v8034_v52  ;;  %5932 = vmatprep.subr.bf16.mxu0 %v8039_v31  ;;  %v8114_v52 = vld [vmem:[%s10805_s4 + $0x444] ss:$16 sps:$4 sm:$0xff]   ;;  %v8112_v31 = vld [vmem:[%s10805_s4 + $0x440] ss:$16 sps:$4 sm:$0xff]  }
 0x389   : > { %3490 = vmatprep.subr.bf16.mxu1 %v8042_v60  ;;  %v8117_v60 = vld [vmem:[%s10805_s4 + $0x464] ss:$16 sps:$4 sm:$0xff]  }
 0x38b   : > { %5933 = vmatpush1.bf16.msra.mxu0 %v8037_v37  ;;  %v8115_v37 = vld [vmem:[%s10805_s4 + $0x460] ss:$16 sps:$4 sm:$0xff]  }
 0x38c   : > { %3491 = vmatpush1.bf16.msra.mxu1 %v8040_v61  ;;  %5934 = vmatprep.subr.bf16.mxu0 %v8045_v7  ;;  %v8120_v61 = vld [vmem:[%s10805_s4 + $0x30c] ss:$16 sps:$4 sm:$0xff]   ;;  %v8118_v7 = vld [vmem:[%s10805_s4 + $0x308] ss:$16 sps:$4 sm:$0xff]  }
 0x38d   : > { %3492 = vmatprep.subr.bf16.mxu1 %v8048_v47  ;;  %v3602_v47 = vrot.slane %v9600_v16, 1  ;;  %v8340_v16 = vld [vmem:[%s10805_s4 + $0xac0] ss:$16 sps:$4 sm:$0xff]  }
 0x38f   : > { %5935 = vmatpush1.bf16.msra.mxu0 %v8043_v4  ;;  %v8123_v4 = vld [vmem:[%s10805_s4 + $0x32c] ss:$16 sps:$4 sm:$0xff]  }
 0x390   : > { %3493 = vmatpush1.bf16.msra.mxu1 %v8046_v48  ;;  %5936 = vmatprep.subr.bf16.mxu0 %v8051_v56  ;;  %v8121_v48 = vld [vmem:[%s10805_s4 + $0x328] ss:$16 sps:$4 sm:$0xff]   ;;  %v8126_v56 = vld [vmem:[%s10805_s4 + $0x34c] ss:$16 sps:$4 sm:$0xff]  }
 0x391   : > { %3494 = vmatprep.subr.bf16.mxu1 %v8054_v58  ;;  %v8124_v58 = vld [vmem:[%s10805_s4 + $0x348] ss:$16 sps:$4 sm:$0xff]  }
 0x393   : > { %5937 = vmatpush1.bf16.msra.mxu0 %v8049_v59  ;;  %v8129_v59 = vld [vmem:[%s10805_s4 + $0x36c] ss:$16 sps:$4 sm:$0xff]  }
 0x394   : > { %3495 = vmatpush1.bf16.msra.mxu1 %v8052_v26  ;;  %5938 = vmatprep.subr.bf16.mxu0 %v8057_v30  ;;  %v8127_v26 = vld [vmem:[%s10805_s4 + $0x368] ss:$16 sps:$4 sm:$0xff]   ;;  %v8132_v30 = vld [vmem:[%s10805_s4 + $0x38c] ss:$16 sps:$4 sm:$0xff]  }
 0x395   : > { %3496 = vmatprep.subr.bf16.mxu1 %v8060_v33  ;;  %v8130_v33 = vld [vmem:[%s10805_s4 + $0x388] ss:$16 sps:$4 sm:$0xff]  }
 0x397   : > { %5939 = vmatpush1.bf16.msra.mxu0 %v8055_v6  ;;  %v8135_v6 = vld [vmem:[%s10805_s4 + $0x3ac] ss:$16 sps:$4 sm:$0xff]  }
 0x398   : > { %3497 = vmatpush1.bf16.msra.mxu1 %v8058_v8  ;;  %5940 = vmatprep.subr.bf16.mxu0 %v8063_v15  ;;  %v8133_v8 = vld [vmem:[%s10805_s4 + $0x3a8] ss:$16 sps:$4 sm:$0xff]   ;;  %v8138_v15 = vld [vmem:[%s10805_s4 + $0x3cc] ss:$16 sps:$4 sm:$0xff]  }
 0x399   : > { %3498 = vmatprep.subr.bf16.mxu1 %v8066_v17 }
 0x39b   : > { %5941 = vmatpush1.bf16.msra.mxu0 %v8061_v32 }
 0x39c   : > { %3499 = vmatpush1.bf16.msra.mxu1 %v8064_v27  ;;  %5942 = vmatprep.subr.bf16.mxu0 %v8069_v35 }
 0x39d   : > { %3500 = vmatprep.subr.bf16.mxu1 %v8072_v43  ;;  %v8136_v43 = vld [vmem:[%s10805_s4 + $0x3c8] ss:$16 sps:$4 sm:$0xff]  }
 0x39f   : > { %5943 = vmatpush1.bf16.msra.mxu0 %v8067_v62 }
 0x3a0   : > { %3501 = vmatpush1.bf16.msra.mxu1 %v8070_v50  ;;  %5944 = vmatprep.subr.bf16.mxu0 %v8075_v23  ;;  %v8141_v23 = vld [vmem:[%s10805_s4 + $0x3ec] ss:$16 sps:$4 sm:$0xff]  }
 0x3a1   : > { %3502 = vmatprep.subr.bf16.mxu1 %v8078_v10 }
 0x3a3   : > { %5945 = vmatpush1.bf16.msra.mxu0 %v8073_v12 }
 0x3a4   : > { %3503 = vmatpush1.bf16.msra.mxu1 %v8076_v63  ;;  %5946 = vmatprep.subr.bf16.mxu0 %v8081_v40 }
 0x3a5   : > { %3848 = vmatprep.subr.bf16.mxu1 %v8084_v2  ;;  %v8139_v2 = vld [vmem:[%s10805_s4 + $0x3e8] ss:$16 sps:$4 sm:$0xff]  }
 0x3a7   : > { %5947 = vmatpush1.bf16.msra.mxu0 %v8079_v25  ;;  %3513 = vmatmul.mubr.bf16.vlgmr.msra.gmra.mrb[12].mxu1 %v9765_v19  ;;  %v8144_v25 = vld [vmem:[%s10805_s4 + $0x40c] ss:$16 sps:$4 sm:$0xff]  }
 0x3a8   : > { %3849 = vmatpush1.bf16.msra.mxu1 %v8082_v46  ;;  %6530 = vmatprep.mubr.msk.bf16.mxu1 %vm3025_vm3, %v3603_v21  ;;  %v8142_v46 = vld [vmem:[%s10805_s4 + $0x408] ss:$16 sps:$4 sm:$0xff]  }
 0x3a9   : > { %3850 = vmatprep.subr.bf16.mxu1 %v8087_v49  ;;  %v8147_v49 = vld [vmem:[%s10805_s4 + $0x42c] ss:$16 sps:$4 sm:$0xff]  }
 0x3aa   : > { %5957 = vmatmul.mubr.bf16.vlgmr.msra.gmra.mrb[36].mxu0 %v5637_v55 }
 0x3ac   : > { %3851 = vmatpush1.bf16.msra.mxu1 %v8085_v11  ;;  %v8150_v11 = vld [vmem:[%s10805_s4 + $0x44c] ss:$16 sps:$4 sm:$0xff]  }
 0x3ad   : > { %3852 = vmatprep.subr.bf16.mxu1 %v8090_v1  ;;  %v8148_v1 = vld [vmem:[%s10805_s4 + $0x448] ss:$16 sps:$4 sm:$0xff]  }
 0x3b0   : > { %3853 = vmatpush1.bf16.msra.mxu1 %v8088_v44  ;;  %v8153_v44 = vld [vmem:[%s10805_s4 + $0x46c] ss:$16 sps:$4 sm:$0xff]  }
 0x3b1   : > { %3854 = vmatprep.subr.bf16.mxu1 %v8093_v54  ;;  %v8151_v54 = vld [vmem:[%s10805_s4 + $0x468] ss:$16 sps:$4 sm:$0xff]  }
 0x3b4   : > { %3855 = vmatpush1.bf16.msra.mxu1 %v8091_v24  ;;  %v8156_v24 = vld [vmem:[%s10805_s4 + $0x484] ss:$16 sps:$4 sm:$0xff]  }
 0x3b5   : > { %3856 = vmatprep.subr.bf16.mxu1 %v8096_v13  ;;  %v8154_v13 = vld [vmem:[%s10805_s4 + $0x480] ss:$16 sps:$4 sm:$0xff]  }
 0x3b8   : > { %3857 = vmatpush1.bf16.msra.mxu1 %v8094_v0  ;;  %v8159_v0 = vld [vmem:[%s10805_s4 + $0x4a4] ss:$16 sps:$4 sm:$0xff]  }
 0x3b9   : > { %3858 = vmatprep.subr.bf16.mxu1 %v8099_v22  ;;  %v4010_v22 = vrot.slane %v9611_v42, 1  ;;  %v8345_v42 = vld [vmem:[%s10805_s4 + $0xae4] ss:$16 sps:$4 sm:$0xff]  }
 0x3bc   : > { %3859 = vmatpush1.bf16.msra.mxu1 %v8097_v53  ;;  %v8157_v53 = vld [vmem:[%s10805_s4 + $0x4a0] ss:$16 sps:$4 sm:$0xff]  }
 0x3bd   : > { %3860 = vmatprep.subr.bf16.mxu1 %v8102_v5  ;;  %v8162_v5 = vld [vmem:[%s10805_s4 + $0x4c4] ss:$16 sps:$4 sm:$0xff]  }
 0x3c0   : > { %3861 = vmatpush1.bf16.msra.mxu1 %v8100_v29  ;;  %v8160_v29 = vld [vmem:[%s10805_s4 + $0x4c0] ss:$16 sps:$4 sm:$0xff]  }
 0x3c1   : > { %3862 = vmatprep.subr.bf16.mxu1 %v8105_v39  ;;  %v8165_v39 = vld [vmem:[%s10805_s4 + $0x4e4] ss:$16 sps:$4 sm:$0xff]  }
 0x3c4   : > { %3863 = vmatpush1.bf16.msra.mxu1 %v8103_v3  ;;  %v8163_v3 = vld [vmem:[%s10805_s4 + $0x4e0] ss:$16 sps:$4 sm:$0xff]  }
 0x3c5   : > { %3864 = vmatprep.subr.bf16.mxu1 %v8108_v34  ;;  %v8168_v34 = vld [vmem:[%s10805_s4 + $0x504] ss:$16 sps:$4 sm:$0xff]  }
 0x3c8   : > { %3865 = vmatpush1.bf16.msra.mxu1 %v8106_v14  ;;  %v8399_v14 = vmov 1966171168  }
 0x3c9   : > { %3866 = vmatprep.subr.bf16.mxu1 %v8111_v9  ;;  %v3118_v9 = vunpack.c.l.s4 %v8399_v14 }
 0x3cc   : > { %3867 = vmatpush1.bf16.msra.mxu1 %v8109_v38  ;;  %v3120_v38 = vlaneseq }
 0x3cd   : > { %3868 = vmatprep.subr.bf16.mxu1 %v8114_v52  ;;  %v8166_v52 = vld [vmem:[%s10805_s4 + $0x500] ss:$16 sps:$4 sm:$0xff]  }
 0x3ce   : > { %vm5997_vm4 = vcmp.lt.s32.totalorder %v3120_v38, 512 }
 0x3d0   : > { %3869 = vmatpush1.bf16.msra.mxu1 %v8112_v31  ;;  %v8171_v31 = vld [vmem:[%s10805_s4 + $0x524] ss:$16 sps:$4 sm:$0xff]  }
 0x3d1   : > { %3870 = vmatprep.subr.bf16.mxu1 %v8117_v60  ;;  %v3119_v60 = vunpack.c.0.s8 %v3118_v9 }
 0x3d4   : > { %3871 = vmatpush1.bf16.msra.mxu1 %v8115_v37  ;;  %v3121_v37 = vshrl.u32 %v3120_v38, 7 }
 0x3d5   : > { %3889 = vmatprep.subr.bf16.mxu1 %v8120_v61  ;;  %v8169_v61 = vld [vmem:[%s10805_s4 + $0x520] ss:$16 sps:$4 sm:$0xff]  }
 0x3d7   : > { %3881 = vmatmul.mubr.bf16.vlgmr.msra.gmra.mrb[16].mxu1 %v3602_v47 }
 0x3d8   : > { %3890 = vmatpush1.bf16.msra.mxu1 %v8118_v7  ;;  %6531 = vmatprep.mubr.msk.bf16.mxu1 %vm3025_vm3, %v3603_v21  ;;  %v8145_v21 = vld [vmem:[%s10805_s4 + $0x428] ss:$16 sps:$4 sm:$0xff]   ;;  %v8174_v7 = vld [vmem:[%s10805_s4 + $0x544] ss:$16 sps:$4 sm:$0xff]  }
 0x3d9   : > { %3891 = vmatprep.subr.bf16.mxu1 %v8123_v4 }
 0x3dc   : > { %3892 = vmatpush1.bf16.msra.mxu1 %v8121_v48 }
 0x3dd   : > { %3893 = vmatprep.subr.bf16.mxu1 %v8126_v56 }
 0x3e0   : > { %3894 = vmatpush1.bf16.msra.mxu1 %v8124_v58 }
 0x3e1   : > { %3895 = vmatprep.subr.bf16.mxu1 %v8129_v59  ;;  %v8172_v59 = vld [vmem:[%s10805_s4 + $0x540] ss:$16 sps:$4 sm:$0xff]  }
 0x3e4   : > { %3896 = vmatpush1.bf16.msra.mxu1 %v8127_v26 }
 0x3e5   : > { %3897 = vmatprep.subr.bf16.mxu1 %v8132_v30 }
 0x3e8   : > { %3898 = vmatpush1.bf16.msra.mxu1 %v8130_v33  ;;  %v8177_v33 = vld [vmem:[%s10805_s4 + $0x564] ss:$16 sps:$4 sm:$0xff]  }
 0x3e9   : > { %3899 = vmatprep.subr.bf16.mxu1 %v8135_v6 }
 0x3ea   : > { %v10193_v17 = vpop.f32.mrb[0].mxu1 }
 0x3eb   : > { %v10195_v32 = vpop.f32.mrb[1].mxu1 }
 0x3ec   : > { %v3115_v27 = vcombine.low %v10193_v17, %v10195_v32  ;;  %3900 = vmatpush1.bf16.msra.mxu1 %v8133_v8  ;;  %v3067_v35 = vpop.f32.mrb[2].mxu1  ;;  %v8175_v17 = vld [vmem:[%s10805_s4 + $0x560] ss:$16 sps:$4 sm:$0xff]   ;;  %v8180_v32 = vld [vmem:[%s10805_s4 + $0x584] ss:$16 sps:$4 sm:$0xff]  }
 0x3ed   : > { %v10202_v62 = vpop.f32.mrb[24].mxu0  ;;  %v3068_v50 = vpop.f32.mrb[3].mxu1  ;;  %3901 = vmatprep.subr.bf16.mxu1 %v8138_v15 }
 0x3ee   : > { %v10207_v10 = vpop.f32.mrb[25].mxu0 }
 0x3ef   : > { %v4749_v12 = vcombine.low %v10202_v62, %v10207_v10  ;;  %v4741_v63 = vpop.f32.mrb[26].mxu0 }
 0x3f0   : > { %3902 = vmatpush1.bf16.msra.mxu1 %v8136_v43  ;;  %v4742_v40 = vpop.f32.mrb[27].mxu0  ;;  %v8183_v63 = vld [vmem:[%s10805_s4 + $0x5a4] ss:$16 sps:$4 sm:$0xff]  }
 0x3f1   : > { %3903 = vmatprep.subr.bf16.mxu1 %v8141_v23  ;;  %v8181_v40 = vld [vmem:[%s10805_s4 + $0x5a0] ss:$16 sps:$4 sm:$0xff]  }
 0x3f4   : > { %3904 = vmatpush1.bf16.msra.mxu1 %v8139_v2  ;;  %v8186_v2 = vld [vmem:[%s10805_s4 + $0x5c4] ss:$16 sps:$4 sm:$0xff]  }
 0x3f5   : > { %3905 = vmatprep.subr.bf16.mxu1 %v8144_v25  ;;  %v8184_v25 = vld [vmem:[%s10805_s4 + $0x5c0] ss:$16 sps:$4 sm:$0xff]  }
 0x3f8   : > { %3906 = vmatpush1.bf16.msra.mxu1 %v8142_v46  ;;  %v8189_v46 = vld [vmem:[%s10805_s4 + $0x5e4] ss:$16 sps:$4 sm:$0xff]  }
 0x3f9   : > { %3907 = vmatprep.subr.bf16.mxu1 %v8147_v49  ;;  %v8187_v49 = vld [vmem:[%s10805_s4 + $0x5e0] ss:$16 sps:$4 sm:$0xff]  }
 0x3fc   : > { %3908 = vmatpush1.bf16.msra.mxu1 %v8145_v21  ;;  %v8192_v21 = vld [vmem:[%s10805_s4 + $0x48c] ss:$16 sps:$4 sm:$0xff]  }
 0x3fd   : > { %3909 = vmatprep.subr.bf16.mxu1 %v8150_v11  ;;  %v8190_v11 = vld [vmem:[%s10805_s4 + $0x488] ss:$16 sps:$4 sm:$0xff]  }
 0x400   : > { %3910 = vmatpush1.bf16.msra.mxu1 %v8148_v1  ;;  %v4009_v1 = vrot.slane %v9765_v19, 1 }
 0x401   : > { %3911 = vmatprep.subr.bf16.mxu1 %v8153_v44  ;;  %v8195_v44 = vld [vmem:[%s10805_s4 + $0x4ac] ss:$16 sps:$4 sm:$0xff]  }
 0x404   : > { %3912 = vmatpush1.bf16.msra.mxu1 %v8151_v54  ;;  %v8193_v54 = vld [vmem:[%s10805_s4 + $0x4a8] ss:$16 sps:$4 sm:$0xff]  }
 0x405   : > { %4255 = vmatprep.subr.bf16.mxu1 %v8156_v24  ;;  %v8198_v24 = vld [vmem:[%s10805_s4 + $0x4cc] ss:$16 sps:$4 sm:$0xff]  }
 0x407   : > { %3922 = vmatmul.mubr.bf16.vlgmr.msra.gmra.mrb[20].mxu1 %v3602_v47  ;;  %v10284_v47 = vsub.s32 %v3119_v60, %v3121_v37 }
 0x408   : > { %4256 = vmatpush1.bf16.msra.mxu1 %v8154_v13  ;;  %6628 = vmatprep.mubr.msk.bf16.mxu1 %vm3025_vm3, %v4010_v22  ;;  %v8196_v13 = vld [vmem:[%s10805_s4 + $0x4c8] ss:$16 sps:$4 sm:$0xff]  }
 0x409   : > { %4257 = vmatprep.subr.bf16.mxu1 %v8159_v0  ;;  %v10298_v6 = vrot.slane %v3115_v27, %v10284_v47  ;;  %v8178_v27 = vld [vmem:[%s10805_s4 + $0x580] ss:$16 sps:$4 sm:$0xff]   ;;  %v8201_v0 = vld [vmem:[%s10805_s4 + $0x4ec] ss:$16 sps:$4 sm:$0xff]  }
 0x40c   : > { %4258 = vmatpush1.bf16.msra.mxu1 %v8157_v53  ;;  %v8204_v53 = vld [vmem:[%s10805_s4 + $0x50c] ss:$16 sps:$4 sm:$0xff]  }
 0x40d   : > { %4259 = vmatprep.subr.bf16.mxu1 %v8162_v5  ;;  %v8202_v5 = vld [vmem:[%s10805_s4 + $0x508] ss:$16 sps:$4 sm:$0xff]  }
 0x410   : > { %4260 = vmatpush1.bf16.msra.mxu1 %v8160_v29  ;;  %v8207_v29 = vld [vmem:[%s10805_s4 + $0x52c] ss:$16 sps:$4 sm:$0xff]  }
 0x411   : > { %4261 = vmatprep.subr.bf16.mxu1 %v8165_v39  ;;  %v8205_v39 = vld [vmem:[%s10805_s4 + $0x528] ss:$16 sps:$4 sm:$0xff]  }
 0x414   : > { %4262 = vmatpush1.bf16.msra.mxu1 %v8163_v3  ;;  %v8210_v3 = vld [vmem:[%s10805_s4 + $0x54c] ss:$16 sps:$4 sm:$0xff]  }
 0x415   : > { %4263 = vmatprep.subr.bf16.mxu1 %v8168_v34 }
 0x418   : > { %4264 = vmatpush1.bf16.msra.mxu1 %v8166_v52 }
 0x419   : > { %4265 = vmatprep.subr.bf16.mxu1 %v8171_v31  ;;  %v8208_v31 = vld [vmem:[%s10805_s4 + $0x548] ss:$16 sps:$4 sm:$0xff]  }
 0x41a   : > { %v3104_v4 = vpop.f32.mrb[4].mxu1 }
 0x41b   : > { %v3106_v48 = vpop.f32.mrb[5].mxu1 }
 0x41c   : > { %v3116_v56 = vcombine.low %v3104_v4, %v3106_v48  ;;  %v3108_v58 = vpop.f32.mrb[6].mxu1  ;;  %4266 = vmatpush1.bf16.msra.mxu1 %v8169_v61  ;;  %v8213_v61 = vld [vmem:[%s10805_s4 + $0x56c] ss:$16 sps:$4 sm:$0xff]  }
 0x41d   : > { %v10289_v26 = vpop.f32.mrb[28].mxu0  ;;  %v3109_v30 = vpop.f32.mrb[7].mxu1  ;;  %4267 = vmatprep.subr.bf16.mxu1 %v8174_v7  ;;  %v8211_v58 = vld [vmem:[%s10805_s4 + $0x568] ss:$16 sps:$4 sm:$0xff]  }
 0x41e   : > { %v10301_v8 = vrot.slane %v3116_v56, %v10284_v47  ;;  %v10303_v15 = vpop.f32.mrb[29].mxu0  ;;  %v8214_v30 = vld [vmem:[%s10805_s4 + $0x588] ss:$16 sps:$4 sm:$0xff]  }
 0x41f   : > { %v5156_v35 = vcombine.low %v10289_v26, %v10303_v15  ;;  %v5148_v43 = vpop.f32.mrb[30].mxu0 }
 0x420   : > { %v3131_v50 = vcombine.low %v10298_v6, %v10301_v8  ;;  %v5149_v23 = vpop.f32.mrb[31].mxu0  ;;  %4268 = vmatpush1.bf16.msra.mxu1 %v8172_v59  ;;  %v8216_v59 = vld [vmem:[%s10805_s4 + $0x58c] ss:$16 sps:$4 sm:$0xff]   ;;  %v8217_v43 = vld [vmem:[%s10805_s4 + $0x5a8] ss:$16 sps:$4 sm:$0xff]  }
 0x421   : > { %4269 = vmatprep.subr.bf16.mxu1 %v8177_v33  ;;  %v8219_v33 = vld [vmem:[%s10805_s4 + $0x5ac] ss:$16 sps:$4 sm:$0xff]   ;;  %v8247_v8 = vld [vmem:[%s10805_s4 + $0x6e0] ss:$16 sps:$4 sm:$0xff]  }
 0x422   : > { %v8222_v23 = vld [vmem:[%s10805_s4 + $0x5cc] ss:$16 sps:$4 sm:$0xff]  }
 0x424   : > { %4270 = vmatpush1.bf16.msra.mxu1 %v8175_v17  ;;  %v8220_v17 = vld [vmem:[%s10805_s4 + $0x5c8] ss:$16 sps:$4 sm:$0xff]  }
 0x425   : > { %4271 = vmatprep.subr.bf16.mxu1 %v8180_v32  ;;  %v8225_v32 = vld [vmem:[%s10805_s4 + $0x5ec] ss:$16 sps:$4 sm:$0xff]  }
 0x428   : > { %4272 = vmatpush1.bf16.msra.mxu1 %v8178_v27  ;;  %v8223_v27 = vld [vmem:[%s10805_s4 + $0x5e8] ss:$16 sps:$4 sm:$0xff]  }
 0x429   : > { %4273 = vmatprep.subr.bf16.mxu1 %v8183_v63  ;;  %v8228_v63 = vld [vmem:[%s10805_s4 + $0x604] ss:$16 sps:$4 sm:$0xff]  }
 0x42c   : > { %4274 = vmatpush1.bf16.msra.mxu1 %v8181_v40  ;;  %v8226_v40 = vld [vmem:[%s10805_s4 + $0x600] ss:$16 sps:$4 sm:$0xff]  }
 0x42d   : > { %4275 = vmatprep.subr.bf16.mxu1 %v8186_v2  ;;  %v8231_v2 = vld [vmem:[%s10805_s4 + $0x624] ss:$16 sps:$4 sm:$0xff]  }
 0x430   : > { %4276 = vmatpush1.bf16.msra.mxu1 %v8184_v25  ;;  %v8229_v25 = vld [vmem:[%s10805_s4 + $0x620] ss:$16 sps:$4 sm:$0xff]  }
 0x431   : > { %4277 = vmatprep.subr.bf16.mxu1 %v8189_v46  ;;  %v8234_v46 = vld [vmem:[%s10805_s4 + $0x644] ss:$16 sps:$4 sm:$0xff]  }
 0x434   : > { %4278 = vmatpush1.bf16.msra.mxu1 %v8187_v49  ;;  %v8232_v49 = vld [vmem:[%s10805_s4 + $0x640] ss:$16 sps:$4 sm:$0xff]  }
 0x435   : > { %4296 = vmatprep.subr.bf16.mxu1 %v8192_v21  ;;  %v8237_v21 = vld [vmem:[%s10805_s4 + $0x664] ss:$16 sps:$4 sm:$0xff]  }
 0x437   : > { %4288 = vmatmul.mubr.bf16.vlgmr.msra.gmra.mrb[24].mxu1 %v4009_v1 }
 0x438   : > { %4297 = vmatpush1.bf16.msra.mxu1 %v8190_v11  ;;  %6629 = vmatprep.mubr.msk.bf16.mxu1 %vm3025_vm3, %v4010_v22  ;;  %v8199_v22 = vld [vmem:[%s10805_s4 + $0x4e8] ss:$16 sps:$4 sm:$0xff]   ;;  %v8240_v11 = vld [vmem:[%s10805_s4 + $0x684] ss:$16 sps:$4 sm:$0xff]  }
 0x439   : > { %4298 = vmatprep.subr.bf16.mxu1 %v8195_v44  ;;  %v8243_v44 = vld [vmem:[%s10805_s4 + $0x6a4] ss:$16 sps:$4 sm:$0xff]  }
 0x43c   : > { %4299 = vmatpush1.bf16.msra.mxu1 %v8193_v54  ;;  %v8241_v54 = vld [vmem:[%s10805_s4 + $0x6a0] ss:$16 sps:$4 sm:$0xff]  }
 0x43d   : > { %4300 = vmatprep.subr.bf16.mxu1 %v8198_v24  ;;  %v8246_v24 = vld [vmem:[%s10805_s4 + $0x6c4] ss:$16 sps:$4 sm:$0xff]  }
 0x440   : > { %4301 = vmatpush1.bf16.msra.mxu1 %v8196_v13 }
 0x441   : > { %4302 = vmatprep.subr.bf16.mxu1 %v8201_v0 }
 0x444   : > { %4303 = vmatpush1.bf16.msra.mxu1 %v8199_v22 }
 0x445   : > { %4304 = vmatprep.subr.bf16.mxu1 %v8204_v53 }
 0x448   : > { %4305 = vmatpush1.bf16.msra.mxu1 %v8202_v5  ;;  %v8244_v5 = vld [vmem:[%s10805_s4 + $0x6c0] ss:$16 sps:$4 sm:$0xff]  }
 0x449   : > { %4306 = vmatprep.subr.bf16.mxu1 %v8207_v29 }
 0x44a   : > { %v10379_v34 = vpop.f32.mrb[8].mxu1 }
 0x44b   : > { %v10381_v14 = vpop.f32.mrb[9].mxu1 }
 0x44c   : > { %v3525_v9 = vcombine.low %v10379_v34, %v10381_v14  ;;  %v3477_v52 = vpop.f32.mrb[10].mxu1  ;;  %4307 = vmatpush1.bf16.msra.mxu1 %v8205_v39 }
 0x44d   : > { %v10388_v60 = vpop.f32.mrb[32].mxu0  ;;  %v3478_v37 = vpop.f32.mrb[11].mxu1  ;;  %4308 = vmatprep.subr.bf16.mxu1 %v8210_v3  ;;  %v8249_v3 = vld [vmem:[%s10805_s4 + $0x6e4] ss:$16 sps:$4 sm:$0xff]   ;;  %v3138_v52 = vrot.slane %v3131_v50, %v10284_v47 }
 0x44e   : > { %v10393_v7 = vpop.f32.mrb[33].mxu0  ;;  %v8252_v50 = vld [vmem:[%s10805_s4 + $0x704] ss:$16 sps:$4 sm:$0xff]  }
 0x44f   : > { %v5563_v4 = vcombine.low %v10388_v60, %v10393_v7  ;;  %v5555_v48 = vpop.f32.mrb[34].mxu0 }
 0x450   : > { %v5556_v56 = vpop.f32.mrb[35].mxu0  ;;  %4309 = vmatpush1.bf16.msra.mxu1 %v8208_v31  ;;  %v3533_v31 = vrot.slane %v3525_v9, %v10284_v47  ;;  %v2734_v48 = vld [vmem:[%s10806_s5] sm:$0xf] }
 0x451   : > { %4310 = vmatprep.subr.bf16.mxu1 %v8213_v61  ;;  %v3140_v34 = vadd.f32 %v3138_v52, %v2734_v48  ;;  %v8286_v52 = vld [vmem:[%s10805_s4 + $0x880] ss:$16 sps:$4 sm:$0xff]   ;;  %v8294_v48 = vld [vmem:[%s10805_s4 + $0x8c4] ss:$16 sps:$4 sm:$0xff]  }
 0x454   : > { %4311 = vmatpush1.bf16.msra.mxu1 %v8211_v58 }
 0x455   : > { %4312 = vmatprep.subr.bf16.mxu1 %v8216_v59 }
 0x458   : > { %4313 = vmatpush1.bf16.msra.mxu1 %v8214_v30  ;;  %v8250_v30 = vld [vmem:[%s10805_s4 + $0x700] ss:$16 sps:$4 sm:$0xff]  }
 0x459   : > { %4314 = vmatprep.subr.bf16.mxu1 %v8219_v33  ;;  %v8255_v33 = vld [vmem:[%s10805_s4 + $0x724] ss:$16 sps:$4 sm:$0xff]  }
 0x45c   : > { %4315 = vmatpush1.bf16.msra.mxu1 %v8217_v43  ;;  %v8253_v43 = vld [vmem:[%s10805_s4 + $0x720] ss:$16 sps:$4 sm:$0xff]  }
 0x45d   : > { %4316 = vmatprep.subr.bf16.mxu1 %v8222_v23  ;;  %v8258_v23 = vld [vmem:[%s10805_s4 + $0x744] ss:$16 sps:$4 sm:$0xff]  }
 0x460   : > { %4317 = vmatpush1.bf16.msra.mxu1 %v8220_v17  ;;  %v8256_v17 = vld [vmem:[%s10805_s4 + $0x740] ss:$16 sps:$4 sm:$0xff]  }
 0x461   : > { %4318 = vmatprep.subr.bf16.mxu1 %v8225_v32  ;;  %v8261_v32 = vld [vmem:[%s10805_s4 + $0x764] ss:$16 sps:$4 sm:$0xff]  }
 0x464   : > { %4319 = vmatpush1.bf16.msra.mxu1 %v8223_v27  ;;  %v8259_v27 = vld [vmem:[%s10805_s4 + $0x760] ss:$16 sps:$4 sm:$0xff]  }
 0x465   : > { %4662 = vmatprep.subr.bf16.mxu1 %v8228_v63  ;;  %v8264_v63 = vld [vmem:[%s10805_s4 + $0x784] ss:$16 sps:$4 sm:$0xff]  }
 0x467   : > { %4329 = vmatmul.mubr.bf16.vlgmr.msra.gmra.mrb[28].mxu1 %v4009_v1  ;;  %v8238_v1 = vld [vmem:[%s10805_s4 + $0x680] ss:$16 sps:$4 sm:$0xff]  }
 0x468   : > { %4663 = vmatpush1.bf16.msra.mxu1 %v8226_v40  ;;  %6726 = vmatprep.mubr.msk.bf16.mxu1 %vm3025_vm3, %v4417_v18  ;;  %v8235_v18 = vld [vmem:[%s10805_s4 + $0x660] ss:$16 sps:$4 sm:$0xff]  }
 0x469   : > { %4664 = vmatprep.subr.bf16.mxu1 %v8231_v2  ;;  %v8262_v40 = vld [vmem:[%s10805_s4 + $0x780] ss:$16 sps:$4 sm:$0xff]   ;;  %v8267_v2 = vld [vmem:[%s10805_s4 + $0x7a4] ss:$16 sps:$4 sm:$0xff]  }
 0x46c   : > { %4665 = vmatpush1.bf16.msra.mxu1 %v8229_v25  ;;  %v8265_v25 = vld [vmem:[%s10805_s4 + $0x7a0] ss:$16 sps:$4 sm:$0xff]  }
 0x46d   : > { %4666 = vmatprep.subr.bf16.mxu1 %v8234_v46  ;;  %v8270_v46 = vld [vmem:[%s10805_s4 + $0x7c4] ss:$16 sps:$4 sm:$0xff]  }
 0x470   : > { %4667 = vmatpush1.bf16.msra.mxu1 %v8232_v49  ;;  %v8268_v49 = vld [vmem:[%s10805_s4 + $0x7c0] ss:$16 sps:$4 sm:$0xff]  }
 0x471   : > { %4668 = vmatprep.subr.bf16.mxu1 %v8237_v21  ;;  %v8276_v21 = vld [vmem:[%s10805_s4 + $0x804] ss:$16 sps:$4 sm:$0xff]  }
 0x474   : > { %4669 = vmatpush1.bf16.msra.mxu1 %v8235_v18  ;;  %v8274_v18 = vld [vmem:[%s10805_s4 + $0x800] ss:$16 sps:$4 sm:$0xff]  }
 0x475   : > { %4670 = vmatprep.subr.bf16.mxu1 %v8240_v11  ;;  %v8279_v11 = vld [vmem:[%s10805_s4 + $0x824] ss:$16 sps:$4 sm:$0xff]  }
 0x478   : > { %4671 = vmatpush1.bf16.msra.mxu1 %v8238_v1  ;;  %v8277_v1 = vld [vmem:[%s10805_s4 + $0x820] ss:$16 sps:$4 sm:$0xff]  }
 0x479   : > { %4672 = vmatprep.subr.bf16.mxu1 %v8243_v44  ;;  %v8282_v44 = vld [vmem:[%s10805_s4 + $0x844] ss:$16 sps:$4 sm:$0xff]  }
 0x47a   : > { %v3514_v13 = vpop.f32.mrb[12].mxu1 }
 0x47b   : > { %v3516_v0 = vpop.f32.mrb[13].mxu1 }
 0x47c   : > { %v3526_v22 = vcombine.low %v3514_v13, %v3516_v0  ;;  %v3518_v53 = vpop.f32.mrb[14].mxu1  ;;  %4673 = vmatpush1.bf16.msra.mxu1 %v8241_v54 }
 0x47d   : > { %v10469_v29 = vpop.f32.mrb[36].mxu0  ;;  %v3519_v39 = vpop.f32.mrb[15].mxu1  ;;  %4674 = vmatprep.subr.bf16.mxu1 %v8246_v24 }
 0x47e   : > { %v3540_v37 = vrot.slane %v3526_v22, %v10284_v47  ;;  %v10483_v61 = vpop.f32.mrb[37].mxu0  ;;  %v8280_v22 = vld [vmem:[%s10805_s4 + $0x840] ss:$16 sps:$4 sm:$0xff]  }
 0x47f   : > { %v5970_v56 = vcombine.low %v10469_v29, %v10483_v61  ;;  %v5962_v58 = vpop.f32.mrb[38].mxu0  ;;  %v8283_v39 = vld [vmem:[%s10805_s4 + $0x860] ss:$16 sps:$4 sm:$0xff]  }
 0x480   : > { %v3541_v59 = vcombine.low %v3533_v31, %v3540_v37  ;;  %v5963_v6 = vpop.f32.mrb[39].mxu0  ;;  %4675 = vmatpush1.bf16.msra.mxu1 %v8244_v5  ;;  %v8285_v5 = vld [vmem:[%s10805_s4 + $0x864] ss:$16 sps:$4 sm:$0xff]   ;;  %v8289_v37 = vld [vmem:[%s10805_s4 + $0x8a0] ss:$16 sps:$4 sm:$0xff]  }
 0x481   : > { %4676 = vmatprep.subr.bf16.mxu1 %v8249_v3  ;;  %v8288_v3 = vld [vmem:[%s10805_s4 + $0x884] ss:$16 sps:$4 sm:$0xff]   ;;  %v8292_v58 = vld [vmem:[%s10805_s4 + $0x8c0] ss:$16 sps:$4 sm:$0xff]  }
 0x482   : > { %v3548_v14 = vrot.slane %v3541_v59, %v10284_v47  ;;  %v8291_v31 = vld [vmem:[%s10805_s4 + $0x8a4] ss:$16 sps:$4 sm:$0xff]   ;;  %v8295_v6 = vld [vmem:[%s10805_s4 + $0x8e0] ss:$16 sps:$4 sm:$0xff]  }
 0x483   : > { %v8297_v59 = vld [vmem:[%s10805_s4 + $0x8e4] ss:$16 sps:$4 sm:$0xff]  }
 0x484   : > { %v10497_v9 = vadd.f32 %v3548_v14, %v3140_v34  ;;  %4677 = vmatpush1.bf16.msra.mxu1 %v8247_v8  ;;  %v8300_v8 = vld [vmem:[%s10805_s4 + $0x904] ss:$16 sps:$4 sm:$0xff]   ;;  %v8301_v14 = vld [vmem:[%s10805_s4 + $0x920] ss:$16 sps:$4 sm:$0xff]  }
 0x485   : > { %4678 = vmatprep.subr.bf16.mxu1 %v8252_v50  ;;  %v8298_v50 = vld [vmem:[%s10805_s4 + $0x900] ss:$16 sps:$4 sm:$0xff]   ;;  %v8303_v34 = vld [vmem:[%s10805_s4 + $0x924] ss:$16 sps:$4 sm:$0xff]  }
 0x488   : > { %4679 = vmatpush1.bf16.msra.mxu1 %v8250_v30  ;;  %v8306_v30 = vld [vmem:[%s10805_s4 + $0x944] ss:$16 sps:$4 sm:$0xff]  }
 0x489   : > { %4680 = vmatprep.subr.bf16.mxu1 %v8255_v33  ;;  %v8304_v33 = vld [vmem:[%s10805_s4 + $0x940] ss:$16 sps:$4 sm:$0xff]  }
 0x48c   : > { %4681 = vmatpush1.bf16.msra.mxu1 %v8253_v43  ;;  %v8310_v43 = vld [vmem:[%s10805_s4 + $0x980] ss:$16 sps:$4 sm:$0xff]  }
 0x48d   : > { %4682 = vmatprep.subr.bf16.mxu1 %v8258_v23  ;;  %v8315_v23 = vld [vmem:[%s10805_s4 + $0x9a4] ss:$16 sps:$4 sm:$0xff]  }
 0x490   : > { %4683 = vmatpush1.bf16.msra.mxu1 %v8256_v17  ;;  %v8313_v17 = vld [vmem:[%s10805_s4 + $0x9a0] ss:$16 sps:$4 sm:$0xff]  }
 0x491   : > { %4684 = vmatprep.subr.bf16.mxu1 %v8261_v32  ;;  %v8318_v32 = vld [vmem:[%s10805_s4 + $0x9c4] ss:$16 sps:$4 sm:$0xff]  }
 0x494   : > { %4685 = vmatpush1.bf16.msra.mxu1 %v8259_v27 }
 0x495   : > { %5069 = vmatprep.subr.bf16.mxu1 %v8264_v63 }
 0x497   : > { %4695 = vmatmul.mubr.bf16.vlgmr.msra.gmra.mrb[32].mxu1 %v4416_v36  ;;  %v8273_v36 = vld [vmem:[%s10805_s4 + $0x7e4] ss:$16 sps:$4 sm:$0xff]  }
 0x498   : > { %5070 = vmatpush1.bf16.msra.mxu1 %v8262_v40  ;;  %6824 = vmatprep.mubr.msk.bf16.mxu1 %vm3025_vm3, %v4824_v51  ;;  %v8271_v51 = vld [vmem:[%s10805_s4 + $0x7e0] ss:$16 sps:$4 sm:$0xff]  }
 0x499   : > { %5071 = vmatprep.subr.bf16.mxu1 %v8267_v2 }
 0x49c   : > { %5072 = vmatpush1.bf16.msra.mxu1 %v8265_v25  ;;  %v8316_v25 = vld [vmem:[%s10805_s4 + $0x9c0] ss:$16 sps:$4 sm:$0xff]  }
 0x49d   : > { %5073 = vmatprep.subr.bf16.mxu1 %v8270_v46 }
 0x4a0   : > { %5074 = vmatpush1.bf16.msra.mxu1 %v8268_v49  ;;  %v8321_v49 = vld [vmem:[%s10805_s4 + $0x9e4] ss:$16 sps:$4 sm:$0xff]  }
 0x4a1   : > { %5075 = vmatprep.subr.bf16.mxu1 %v8273_v36 }
 0x4a4   : > { %5076 = vmatpush1.bf16.msra.mxu1 %v8271_v51 }
 0x4a5   : > { %5077 = vmatprep.subr.bf16.mxu1 %v8276_v21 }
 0x4a8   : > { %5078 = vmatpush1.bf16.msra.mxu1 %v8274_v18  ;;  %v8319_v18 = vld [vmem:[%s10805_s4 + $0x9e0] ss:$16 sps:$4 sm:$0xff]  }
 0x4a9   : > { %5079 = vmatprep.subr.bf16.mxu1 %v8279_v11  ;;  %v8324_v11 = vld [vmem:[%s10805_s4 + $0xa04] ss:$16 sps:$4 sm:$0xff]  }
 0x4aa   : > { %v10564_v54 = vpop.f32.mrb[16].mxu1 }
 0x4ab   : > { %v10566_v24 = vpop.f32.mrb[17].mxu1 }
 0x4ac   : > { %v3934_v13 = vcombine.low %v10564_v54, %v10566_v24  ;;  %v3886_v0 = vpop.f32.mrb[18].mxu1  ;;  %5080 = vmatpush1.bf16.msra.mxu1 %v8277_v1  ;;  %v8322_v54 = vld [vmem:[%s10805_s4 + $0xa00] ss:$16 sps:$4 sm:$0xff]   ;;  %v8327_v24 = vld [vmem:[%s10805_s4 + $0xa24] ss:$16 sps:$4 sm:$0xff]  }
 0x4ad   : > { %v3887_v53 = vpop.f32.mrb[19].mxu1  ;;  %5081 = vmatprep.subr.bf16.mxu1 %v8282_v44  ;;  %v8328_v0 = vld [vmem:[%s10805_s4 + $0xa40] ss:$16 sps:$4 sm:$0xff]  }
 0x4ae   : > { %v3942_v36 = vrot.slane %v3934_v13, %v10284_v47  ;;  %v8325_v13 = vld [vmem:[%s10805_s4 + $0xa20] ss:$16 sps:$4 sm:$0xff]  }
 0x4af   : > { %v8331_v53 = vld [vmem:[%s10805_s4 + $0xa60] ss:$16 sps:$4 sm:$0xff]  }
 0x4b0   : > { %5082 = vmatpush1.bf16.msra.mxu1 %v8280_v22  ;;  %v8333_v22 = vld [vmem:[%s10805_s4 + $0xa64] ss:$16 sps:$4 sm:$0xff]  }
 0x4b1   : > { %5083 = vmatprep.subr.bf16.mxu1 %v8285_v5  ;;  %v8336_v5 = vld [vmem:[%s10805_s4 + $0xa84] ss:$16 sps:$4 sm:$0xff]  }
 0x4b4   : > { %5084 = vmatpush1.bf16.msra.mxu1 %v8283_v39  ;;  %v8334_v39 = vld [vmem:[%s10805_s4 + $0xa80] ss:$16 sps:$4 sm:$0xff]  }
 0x4b5   : > { %5085 = vmatprep.subr.bf16.mxu1 %v8288_v3  ;;  %v8339_v3 = vld [vmem:[%s10805_s4 + $0xaa4] ss:$16 sps:$4 sm:$0xff]  }
 0x4b8   : > { %5086 = vmatpush1.bf16.msra.mxu1 %v8286_v52  ;;  %v8337_v52 = vld [vmem:[%s10805_s4 + $0xaa0] ss:$16 sps:$4 sm:$0xff]  }
 0x4b9   : > { %5087 = vmatprep.subr.bf16.mxu1 %v8291_v31  ;;  %v8342_v31 = vld [vmem:[%s10805_s4 + $0xac4] ss:$16 sps:$4 sm:$0xff]  }
 0x4bc   : > { %5088 = vmatpush1.bf16.msra.mxu1 %v8289_v37  ;;  %v8346_v37 = vld [vmem:[%s10805_s4 + $0xb00] ss:$16 sps:$4 sm:$0xff]  }
 0x4bd   : > { %5089 = vmatprep.subr.bf16.mxu1 %v8294_v48  ;;  %v8351_v48 = vld [vmem:[%s10805_s4 + $0xb24] ss:$16 sps:$4 sm:$0xff]  }
 0x4c0   : > { %5090 = vmatpush1.bf16.msra.mxu1 %v8292_v58  ;;  %v8349_v58 = vld [vmem:[%s10805_s4 + $0xb20] ss:$16 sps:$4 sm:$0xff]  }
 0x4c1   : > { %5091 = vmatprep.subr.bf16.mxu1 %v8297_v59  ;;  %v8354_v59 = vld [vmem:[%s10805_s4 + $0xb44] ss:$16 sps:$4 sm:$0xff]  }
 0x4c4   : > { %5092 = vmatpush1.bf16.msra.mxu1 %v8295_v6 }
 0x4c5   : > { %5476 = vmatprep.subr.bf16.mxu1 %v8300_v8 }
 0x4c7   : > { %5102 = vmatmul.mubr.bf16.vlgmr.msra.gmra.mrb[36].mxu1 %v4823_v45  ;;  %v8307_v45 = vld [vmem:[%s10805_s4 + $0x960] ss:$16 sps:$4 sm:$0xff]  }
 0x4c8   : > { %5477 = vmatpush1.bf16.msra.mxu1 %v8298_v50  ;;  %6922 = vmatprep.mubr.msk.bf16.mxu1 %vm3025_vm3, %v5231_v41  ;;  %v8312_v41 = vld [vmem:[%s10805_s4 + $0x984] ss:$16 sps:$4 sm:$0xff]  }
 0x4c9   : > { %5478 = vmatprep.subr.bf16.mxu1 %v8303_v34 }
 0x4cc   : > { %5479 = vmatpush1.bf16.msra.mxu1 %v8301_v14  ;;  %v8352_v14 = vld [vmem:[%s10805_s4 + $0xb40] ss:$16 sps:$4 sm:$0xff]  }
 0x4cd   : > { %5480 = vmatprep.subr.bf16.mxu1 %v8306_v30 }
 0x4d0   : > { %5481 = vmatpush1.bf16.msra.mxu1 %v8304_v33  ;;  %v8357_v33 = vld [vmem:[%s10805_s4 + $0xb64] ss:$16 sps:$4 sm:$0xff]  }
 0x4d1   : > { %5482 = vmatprep.subr.bf16.mxu1 %v8309_v57  ;;  %v8355_v57 = vld [vmem:[%s10805_s4 + $0xb60] ss:$16 sps:$4 sm:$0xff]  }
 0x4d4   : > { %5483 = vmatpush1.bf16.msra.mxu1 %v8307_v45  ;;  %v8360_v45 = vld [vmem:[%s10805_s4 + $0xb84] ss:$16 sps:$4 sm:$0xff]  }
 0x4d5   : > { %5484 = vmatprep.subr.bf16.mxu1 %v8312_v41  ;;  %v8358_v41 = vld [vmem:[%s10805_s4 + $0xb80] ss:$16 sps:$4 sm:$0xff]  }
 0x4d8   : > { %5485 = vmatpush1.bf16.msra.mxu1 %v8310_v43  ;;  %v8363_v43 = vld [vmem:[%s10805_s4 + $0xba4] ss:$16 sps:$4 sm:$0xff]  }
 0x4d9   : > { %5486 = vmatprep.subr.bf16.mxu1 %v8315_v23  ;;  %v8361_v23 = vld [vmem:[%s10805_s4 + $0xba0] ss:$16 sps:$4 sm:$0xff]  }
 0x4da   : > { %v3923_v27 = vpop.f32.mrb[20].mxu1 }
 0x4db   : > { %v3925_v63 = vpop.f32.mrb[21].mxu1 }
 0x4dc   : > { %v3935_v40 = vcombine.low %v3923_v27, %v3925_v63  ;;  %v3927_v2 = vpop.f32.mrb[22].mxu1  ;;  %5487 = vmatpush1.bf16.msra.mxu1 %v8313_v17  ;;  %v8366_v17 = vld [vmem:[%s10805_s4 + $0xbc4] ss:$16 sps:$4 sm:$0xff]   ;;  %v8367_v63 = vld [vmem:[%s10805_s4 + $0xbe0] ss:$16 sps:$4 sm:$0xff]  }
 0x4dd   : > { %v3928_v46 = vpop.f32.mrb[23].mxu1  ;;  %5488 = vmatprep.subr.bf16.mxu1 %v8318_v32  ;;  %v8364_v32 = vld [vmem:[%s10805_s4 + $0xbc0] ss:$16 sps:$4 sm:$0xff]   ;;  %v8369_v27 = vld [vmem:[%s10805_s4 + $0xbe4] ss:$16 sps:$4 sm:$0xff]  }
 0x4de   : > { %v3949_v51 = vrot.slane %v3935_v40, %v10284_v47 }
 0x4e0   : > { %v3950_v21 = vcombine.low %v3942_v36, %v3949_v51  ;;  %5489 = vmatpush1.bf16.msra.mxu1 %v8316_v25 }
 0x4e1   : > { %5490 = vmatprep.subr.bf16.mxu1 %v8321_v49 }
 0x4e2   : > { %v3957_v1 = vrot.slane %v3950_v21, %v10284_v47 }
 0x4e4   : > { %v10663_v44 = vadd.f32 %v3957_v1, %v10497_v9  ;;  %5491 = vmatpush1.bf16.msra.mxu1 %v8319_v18  ;;  %v8330_v9 = vld [vmem:[%s10805_s4 + $0xa44] ss:$16 sps:$4 sm:$0xff]  }
 0x4e5   : > { %5492 = vmatprep.subr.bf16.mxu1 %v8324_v11 }
 0x4e8   : > { %5493 = vmatpush1.bf16.msra.mxu1 %v8322_v54 }
 0x4e9   : > { %5494 = vmatprep.subr.bf16.mxu1 %v8327_v24 }
 0x4ec   : > { %5495 = vmatpush1.bf16.msra.mxu1 %v8325_v13 }
 0x4ed   : > { %5496 = vmatprep.subr.bf16.mxu1 %v8330_v9 }
 0x4f0   : > { %5497 = vmatpush1.bf16.msra.mxu1 %v8328_v0 }
 0x4f1   : > { %5498 = vmatprep.subr.bf16.mxu1 %v8333_v22 }
 0x4f4   : > { %5499 = vmatpush1.bf16.msra.mxu1 %v8331_v53 }
 0x4f5   : > { %5883 = vmatprep.subr.bf16.mxu1 %v8336_v5 }
 0x4f7   : > { %5509 = vmatmul.mubr.bf16.vlgmr.msra.gmra.mrb[40].mxu1 %v5230_v28  ;;  %v8343_v28 = vld [vmem:[%s10805_s4 + $0xae0] ss:$16 sps:$4 sm:$0xff]  }
 0x4f8   : > { %5884 = vmatpush1.bf16.msra.mxu1 %v8334_v39  ;;  %7020 = vmatprep.mubr.msk.bf16.mxu1 %vm3025_vm3, %v5638_v20  ;;  %v8348_v20 = vld [vmem:[%s10805_s4 + $0xb04] ss:$16 sps:$4 sm:$0xff]  }
 0x4f9   : > { %5885 = vmatprep.subr.bf16.mxu1 %v8339_v3 }
 0x4fc   : > { %5886 = vmatpush1.bf16.msra.mxu1 %v8337_v52 }
 0x4fd   : > { %5887 = vmatprep.subr.bf16.mxu1 %v8342_v31  ;;  %v5170_v31 = vrot.slane %v5156_v35, %v10284_v47 }
 0x500   : > { %5888 = vmatpush1.bf16.msra.mxu1 %v8340_v16 }
 0x501   : > { %5889 = vmatprep.subr.bf16.mxu1 %v8345_v42 }
 0x504   : > { %5890 = vmatpush1.bf16.msra.mxu1 %v8343_v28 }
 0x505   : > { %5891 = vmatprep.subr.bf16.mxu1 %v8348_v20 }
 0x508   : > { %5892 = vmatpush1.bf16.msra.mxu1 %v8346_v37 }
 0x509   : > { %5893 = vmatprep.subr.bf16.mxu1 %v8351_v48 }
 0x50a   : > { %v4289_v6 = vpop.f32.mrb[24].mxu1 }
 0x50b   : > { %v4291_v8 = vpop.f32.mrb[25].mxu1 }
 0x50c   : > { %v4341_v50 = vcombine.low %v4289_v6, %v4291_v8  ;;  %v4293_v34 = vpop.f32.mrb[26].mxu1  ;;  %5894 = vmatpush1.bf16.msra.mxu1 %v8349_v58  ;;  %v5577_v58 = vrot.slane %v5563_v4, %v10284_v47 }
 0x50d   : > { %v4294_v30 = vpop.f32.mrb[27].mxu1  ;;  %5895 = vmatprep.subr.bf16.mxu1 %v8354_v59 }
 0x50e   : > { %v4349_v36 = vrot.slane %v4341_v50, %v10284_v47  ;;  %v5984_v30 = vrot.slane %v5970_v56, %v10284_v47 }
 0x510   : > { %5896 = vmatpush1.bf16.msra.mxu1 %v8352_v14 }
 0x511   : > { %5897 = vmatprep.subr.bf16.mxu1 %v8357_v33 }
 0x514   : > { %5898 = vmatpush1.bf16.msra.mxu1 %v8355_v57 }
 0x515   : > { %5899 = vmatprep.subr.bf16.mxu1 %v8360_v45 }
 0x518   : > { %5900 = vmatpush1.bf16.msra.mxu1 %v8358_v41 }
 0x519   : > { %5901 = vmatprep.subr.bf16.mxu1 %v8363_v43 }
 0x51c   : > { %5902 = vmatpush1.bf16.msra.mxu1 %v8361_v23 }
 0x51d   : > { %5903 = vmatprep.subr.bf16.mxu1 %v8366_v17 }
 0x520   : > { %5904 = vmatpush1.bf16.msra.mxu1 %v8364_v32 }
 0x521   : > { %5905 = vmatprep.subr.bf16.mxu1 %v8369_v27 }
 0x524   : > { %5906 = vmatpush1.bf16.msra.mxu1 %v8367_v63 }
 0x527   : > { %5916 = vmatmul.mubr.bf16.vlgmr.msra.gmra.mrb[44].mxu1 %v5637_v55  ;;  %v4763_v55 = vrot.slane %v4749_v12, %v10284_v47 }
 0x53a   : > { %v4330_v40 = vpop.f32.mrb[28].mxu1 }
 0x53b   : > { %v4332_v2 = vpop.f32.mrb[29].mxu1 }
 0x53c   : > { %v4342_v25 = vcombine.low %v4330_v40, %v4332_v2  ;;  %v4334_v46 = vpop.f32.mrb[30].mxu1 }
 0x53d   : > { %v4335_v49 = vpop.f32.mrb[31].mxu1 }
 0x53e   : > { %v4356_v51 = vrot.slane %v4342_v25, %v10284_v47 }
 0x540   : > { %v4357_v21 = vcombine.low %v4349_v36, %v4356_v51 }
 0x542   : > { %v4364_v18 = vrot.slane %v4357_v21, %v10284_v47 }
 0x544   : > { %v4366_v11 = vadd.f32 %v4364_v18, %v10663_v44 }
 0x56a   : > { %v4696_v1 = vpop.f32.mrb[32].mxu1 }
 0x56b   : > { %v4698_v54 = vpop.f32.mrb[33].mxu1 }
 0x56c   : > { %v4748_v24 = vcombine.low %v4696_v1, %v4698_v54  ;;  %v4700_v13 = vpop.f32.mrb[34].mxu1 }
 0x56d   : > { %v4701_v19 = vpop.f32.mrb[35].mxu1 }
 0x56e   : > { %v4756_v9 = vrot.slane %v4748_v24, %v10284_v47 }
 0x570   : > { %v4764_v0 = vcombine.low %v4756_v9, %v4763_v55 }
 0x572   : > { %v4771_v22 = vrot.slane %v4764_v0, %v10284_v47 }
 0x574   : > { %v4773_v53 = vadd.f32 %v4771_v22, %v4366_v11 }
 0x59a   : > { %v5103_v5 = vpop.f32.mrb[36].mxu1 }
 0x59b   : > { %v5105_v39 = vpop.f32.mrb[37].mxu1 }
 0x59c   : > { %v5155_v3 = vcombine.low %v5103_v5, %v5105_v39  ;;  %v5107_v44 = vpop.f32.mrb[38].mxu1 }
 0x59d   : > { %v5108_v52 = vpop.f32.mrb[39].mxu1 }
 0x59e   : > { %v5163_v16 = vrot.slane %v5155_v3, %v10284_v47 }
 0x5a0   : > { %v5171_v62 = vcombine.low %v5163_v16, %v5170_v31 }
 0x5a2   : > { %v5178_v10 = vrot.slane %v5171_v62, %v10284_v47 }
 0x5a4   : > { %v5180_v12 = vadd.f32 %v5178_v10, %v4773_v53 }
 0x5ca   : > { %v5510_v42 = vpop.f32.mrb[40].mxu1 }
 0x5cb   : > { %v5512_v28 = vpop.f32.mrb[41].mxu1 }
 0x5cc   : > { %v5562_v20 = vcombine.low %v5510_v42, %v5512_v28  ;;  %v5514_v37 = vpop.f32.mrb[42].mxu1 }
 0x5cd   : > { %v5515_v48 = vpop.f32.mrb[43].mxu1 }
 0x5ce   : > { %v5570_v26 = vrot.slane %v5562_v20, %v10284_v47 }
 0x5d0   : > { %v5578_v15 = vcombine.low %v5570_v26, %v5577_v58 }
 0x5d2   : > { %v5585_v35 = vrot.slane %v5578_v15, %v10284_v47 }
 0x5d4   : > { %v5587_v59 = vadd.f32 %v5585_v35, %v5180_v12 }
 0x5fa   : > { %v5917_v6 = vpop.f32.mrb[44].mxu1 }
 0x5fb   : > { %v5919_v8 = vpop.f32.mrb[45].mxu1 }
 0x5fc   : > { %v5969_v50 = vcombine.low %v5917_v6, %v5919_v8  ;;  %v5921_v34 = vpop.f32.mrb[46].mxu1 }
 0x5fd   : > { %v5922_v14 = vpop.f32.mrb[47].mxu1 }
 0x5fe   : > { %v5977_v33 = vrot.slane %v5969_v50, %v10284_v47 }
 0x600   : > { %v5985_v60 = vcombine.low %v5977_v33, %v5984_v30 }
 0x602   : > { %v5992_v7 = vrot.slane %v5985_v60, %v10284_v47 }
 0x604   : > { %v5994_v4 = vadd.f32 %v5992_v7, %v5587_v59 }
 0x606   : > { %5999 = vst.msk [vmem:[%s249_s30] sm:$0xf] %vm5997_vm4, %v5994_v4 }
 0x607 PF: > { %s16_s21 = sadd.s32 1, %s8397_s21  }
 0x608   : > { %p13_p4 = scmp.ge.s32.totalorder %s16_s21, 10  }
 0x60a   :  { %15 = sbr.rel (!%p13_p4) target bundleno = 1 (0x1), region = 89 }

</bundles_post_ra>
